<compile_context>
chip_gen: v7x
topology: tpu7x:2x2x1
jax: 0.10.0
libtpu: 0.0.40
codegen_flags: <defaults>
</compile_context>

<pallas_src>
import functools

import jax
import jax.numpy as jnp
from jax import lax
from jax.experimental import pallas as pl
from jax.experimental.pallas import tpu as pltpu

# ----------------------------- config (args) ---------------------------------
EMB_DIM = 16
POS_DIM = 8
RNN_HIDDEN = 16                 # h
H2 = 2 * RNN_HIDDEN             # 2h (BiLSTM output dim)
G3 = 3 * H2                     # per-GRU gate width (r,z,n)
TOKEN_VOCAB = 50
POS_VOCAB = 10
N_BIO = 5                       # len(args.dicts['bio'])
N_LABEL = 6                     # len(args.dicts['label'])
ROUNDS = 2
B = 2
S = 8
IN_DIM = EMB_DIM + POS_DIM
IN2 = 2 * IN_DIM                # paired (fwd,bwd) input width
N_LANE = 128


def _r8(n):
    return ((n + 7) // 8) * 8


# slab A (128 lanes): BiLSTM + Cg + Lr + Cr weights/biases (row offsets, 8-aligned)
A_WIH = 0                       # (2*IN, 8H) paired input projection
A_BLS = A_WIH + IN2             # (1, 8H)
A_WHH = _r8(A_BLS + 1)          # (2H, 8H) recurrent weights (block-diag fwd/bwd)
A_WCG = A_WHH + H2              # (2H, 128) Cg, padded to 128 cols
A_BCG = A_WCG + H2              # (1, 128)
A_WLR = _r8(A_BCG + 1)          # (2H, 128) [W_Lr1 | W_Lr2 | 0]
A_BLR = A_WLR + H2              # (1, 128)  [b_Lr | 0]
A_WCR = _r8(A_BLR + 1)          # (2H, 128) Cr, padded to 128 cols
A_BCR = A_WCR + H2              # (1, 128)
A_ROWS = _r8(A_BCR + 1)

# slab B (192 lanes): fused GRU weights
B_WHH = 0                       # (2H, 6H2)  [GRUg_hh | GRUr_hh]
B_BHH = B_WHH + H2              # (1, 6H2)
B_WGI = _r8(B_BHH + 1)          # (256, 6H2): rows 0:5 GRUg_ih, rows 128:134 GRUr_ih
B_BGI = B_WGI + 2 * N_LANE      # (1, 6H2)
B_ROWS = _r8(B_BGI + 1)


# ----------------------------- fused Pallas kernel ----------------------------
def _joint_kernel(xp_ref, mcat_ref, mrc_ref, sa_ref, sb_ref, out_cg_ref, out_cr_ref):
    """Whole batch in one invocation: BiLSTM -> joint rounds -> final heads."""
    Bb, Ss, two_in = xp_ref.shape
    BS = Bb * Ss
    Hh = RNN_HIDDEN

    mcat = mcat_ref[...]                                     # (B,S,2H) blended mask
    mrc = mrc_ref[...]                                       # (B,S,S,1) RC mask

    # ---------------- BiLSTM encoder (batched over B, fwd+bwd fused) ----------
    w_ih = sa_ref[pl.ds(A_WIH, two_in), :]                   # (2*IN, 8H)
    b_ih = sa_ref[pl.ds(A_BLS, 1), :]                        # (1, 8H)
    w_hh = sa_ref[pl.ds(A_WHH, H2), :]                       # (2H, 8H)

    # input projection hoisted out of the recurrent loop (one matmul)
    xg3 = (jnp.dot(xp_ref[...].reshape(BS, two_in), w_ih,
                   preferred_element_type=jnp.float32) + b_ih).reshape(Bb, Ss, 8 * Hh)

    hcat = jnp.zeros((Bb, H2), jnp.float32)                  # [h_fwd | h_bwd]
    ccat = jnp.zeros((Bb, H2), jnp.float32)
    outs = []
    for t in range(Ss):                                      # static unroll
        gates = xg3[:, t, :] + jnp.dot(hcat, w_hh, preferred_element_type=jnp.float32)
        gi = jax.nn.sigmoid(gates[:, 0 * H2:1 * H2])
        gf = jax.nn.sigmoid(gates[:, 1 * H2:2 * H2])
        gg = jnp.tanh(gates[:, 2 * H2:3 * H2])
        go = jax.nn.sigmoid(gates[:, 3 * H2:4 * H2])
        c_new = gf * ccat + gi * gg
        h_new = go * jnp.tanh(c_new)
        m_t = mcat[:, t, :]                                  # pre-blended length mask
        hcat = m_t * h_new + (1.0 - m_t) * hcat
        ccat = m_t * c_new + (1.0 - m_t) * ccat
        outs.append(m_t * h_new)                             # [fwd@t | bwd@(S-1-t)]

    # assemble H0 (B,S,2H) entirely in registers (no scratch round-trip)
    fwd_half = lax.broadcasted_iota(jnp.int32, (1, H2), 1) < Hh
    t_iota = lax.broadcasted_iota(jnp.int32, (Bb, Ss, H2), 1)
    H0_3 = jnp.zeros((Bb, Ss, H2), jnp.float32)
    for t in range(Ss):
        row_t = jnp.where(fwd_half, outs[t], outs[Ss - 1 - t])       # (B, 2H) @ time t
        H0_3 = H0_3 + jnp.where(t_iota == t, row_t[:, None, :], 0.0)
    H0 = H0_3.reshape(BS, H2)
    msk_flat = mcat.reshape(BS, H2)[:, 0:1]                  # mask_s flattened, (BS,1)

    # ---------------- helpers (weights read from slabs at use site) -----------
    bio_lane = lax.broadcasted_iota(jnp.int32, (1, N_LANE), 1) < N_BIO
    NEG = jnp.float32(-1e30)

    def bio_logits(hg):                                      # (BS,2H) -> (BS,128)
        lg = (jnp.dot(hg, sa_ref[pl.ds(A_WCG, H2), :],
                      preferred_element_type=jnp.float32) + sa_ref[pl.ds(A_BCG, 1), :])
        return jnp.where(bio_lane, lg, NEG)                  # pad lanes -> -1e30

    def pairwise_prob(hr):                                   # (BS,2H) -> (B,S,S,128)
        ab = (jnp.dot(hr, sa_ref[pl.ds(A_WLR, H2), :],
                      preferred_element_type=jnp.float32) + sa_ref[pl.ds(A_BLR, 1), :])
        a3 = ab[:, 0:H2].reshape(Bb, Ss, H2)                 # Lr half acting on Hr_i (+b)
        b3 = ab[:, H2:2 * H2].reshape(Bb, Ss, H2)            # Lr half acting on Hr_j
        z = jnp.maximum(a3[:, :, None, :] + b3[:, None, :, :], 0.0)   # (B,S,S,2H)
        lg = (jnp.dot(z.reshape(BS * Ss, H2), sa_ref[pl.ds(A_WCR, H2), :],
                      preferred_element_type=jnp.float32) + sa_ref[pl.ds(A_BCR, 1), :])
        prob = jax.nn.sigmoid(lg).reshape(Bb, Ss, Ss, N_LANE)
        return prob * mrc                                    # masked (pad cols sliced off)

    def gru(gi_x, gh_x, h):                                  # PyTorch GRUCell (r,z,n)
        r = jax.nn.sigmoid(gi_x[:, 0:H2] + gh_x[:, 0:H2])
        zz = jax.nn.sigmoid(gi_x[:, H2:2 * H2] + gh_x[:, H2:2 * H2])
        n = jnp.tanh(gi_x[:, 2 * H2:3 * H2] + r * gh_x[:, 2 * H2:3 * H2])
        return (1.0 - zz) * n + zz * h

    # ---------------- joint rounds (statically unrolled) ----------------------
    Hc, Hg, Hr = H0, H0, H0
    for _ in range(ROUNDS):
        lg_g = bio_logits(Hg)
        mx = jnp.max(lg_g, axis=-1, keepdims=True)
        ex = jnp.exp(lg_g - mx)
        prob_cg = ex * pl.reciprocal(jnp.sum(ex, axis=-1, keepdims=True), approx=True)

        pfull = pairwise_prob(Hr)
        masked = jnp.where(mrc < 0.5, jnp.float32(-1e11), pfull)       # as in torch ref
        prob_cr = jnp.max(masked, axis=2).reshape(BS, N_LANE)          # (BS,128)

        gh_all = (jnp.dot(Hc, sb_ref[pl.ds(B_WHH, H2), :],
                          preferred_element_type=jnp.float32) + sb_ref[pl.ds(B_BHH, 1), :])
        cat_p = jnp.concatenate([prob_cg, prob_cr], axis=-1)           # (BS,256) aligned
        gi_all = (jnp.dot(cat_p, sb_ref[pl.ds(B_WGI, 2 * N_LANE), :],
                          preferred_element_type=jnp.float32) + sb_ref[pl.ds(B_BGI, 1), :])
        Hg = gru(gi_all[:, 0:G3], gh_all[:, 0:G3], Hc)
        Hr = gru(gi_all[:, G3:2 * G3], gh_all[:, G3:2 * G3], Hc)
        Hc = Hc + Hr + Hg

    # ---------------- final heads (lane-dense 128-wide stores) ----------------
    lg_g = bio_logits(Hg)
    mx = jnp.max(lg_g, axis=-1, keepdims=True)
    lse = jnp.log(jnp.sum(jnp.exp(lg_g - mx), axis=-1, keepdims=True))
    out_cg_ref[...] = ((lg_g - mx - lse) * msk_flat).reshape(Bb, Ss, N_LANE)
    out_cr_ref[...] = pairwise_prob(Hr).reshape(Bb, Ss * Ss, N_LANE)


# ----------------------------- forward pass -----------------------------------
def joint_classifier_forward(params, tokens, pos, mask_s, head):
    del head  # only used by the (disabled) GCN branch
    Hh = RNN_HIDDEN
    Bb, Ss = mask_s.shape

    # --- embeddings (glue) ---
    tok_e = params['emb'][tokens]                            # (B,S,EMB_DIM)
    pos_e = params['pos_emb'][pos]                           # (B,S,POS_DIM)
    x = jnp.concatenate([tok_e, pos_e], axis=2)              # (B,S,IN_DIM)

    # --- direction-paired inputs & blended masks (hoists per-step blends) ---
    x_pair = jnp.concatenate([x, x[:, ::-1, :]], axis=-1)    # (B,S,2*IN)
    m_fwd = mask_s[:, :, None]
    m_bwd = mask_s[:, ::-1, None]
    m_cat = jnp.concatenate([jnp.broadcast_to(m_fwd, (Bb, Ss, Hh)),
                             jnp.broadcast_to(m_bwd, (Bb, Ss, Hh))], axis=-1)  # (B,S,2H)

    real_len = jnp.sum(mask_s, axis=1)                       # (B,)
    idx = jnp.arange(Ss, dtype=jnp.float32)
    box = ((idx[None, :, None] < real_len[:, None, None])
           & (idx[None, None, :] < real_len[:, None, None])).astype(jnp.float32)
    mask_rc = (box * mask_s[:, None, :])[..., None]          # (B,S,S,1)

    # --- weight slabs (layout plumbing; tiny) ---
    def interleave_gates(wf, wb):
        # [i|f|g|o] x 2 directions -> [i_f i_b f_f f_b g_f g_b o_f o_b]
        parts = []
        for g in range(4):
            parts.append(wf[..., g * Hh:(g + 1) * Hh])
            parts.append(wb[..., g * Hh:(g + 1) * Hh])
        return jnp.concatenate(parts, axis=-1)

    z_in = jnp.zeros((IN_DIM, 4 * Hh), jnp.float32)
    z_h = jnp.zeros((Hh, 4 * Hh), jnp.float32)
    w_big = jnp.concatenate([interleave_gates(params['lstm_w_ih_f'], z_in),
                             interleave_gates(z_in, params['lstm_w_ih_b'])], axis=0)
    b_lstm = interleave_gates(params['lstm_b_f'], params['lstm_b_b'])          # (1,8H)
    w_hh = jnp.concatenate([interleave_gates(params['lstm_w_hh_f'], z_h),
                            interleave_gates(z_h, params['lstm_w_hh_b'])], axis=0)
    w_lr = jnp.concatenate([params['w_Lr1'], params['w_Lr2']], axis=1)         # (2H,4H)

    sa = jnp.zeros((A_ROWS, N_LANE), jnp.float32)
    sa = sa.at[A_WIH:A_WIH + IN2, :].set(w_big)
    sa = sa.at[A_BLS, :].set(b_lstm[0])
    sa = sa.at[A_WHH:A_WHH + H2, :].set(w_hh)
    sa = sa.at[A_WCG:A_WCG + H2, :N_BIO].set(params['w_Cg'])
    sa = sa.at[A_BCG, :N_BIO].set(params['b_Cg'][0])
    sa = sa.at[A_WLR:A_WLR + H2, :2 * H2].set(w_lr)
    sa = sa.at[A_BLR, :H2].set(params['b_Lr'][0])
    sa = sa.at[A_WCR:A_WCR + H2, :N_LABEL].set(params['w_Cr'])
    sa = sa.at[A_BCR, :N_LABEL].set(params['b_Cr'][0])

    sb = jnp.zeros((B_ROWS, 2 * G3), jnp.float32)
    sb = sb.at[B_WHH:B_WHH + H2, :G3].set(params['grug_w_hh'])
    sb = sb.at[B_WHH:B_WHH + H2, G3:].set(params['grur_w_hh'])
    sb = sb.at[B_BHH, :G3].set(params['grug_b_hh'][0])
    sb = sb.at[B_BHH, G3:].set(params['grur_b_hh'][0])
    sb = sb.at[B_WGI:B_WGI + N_BIO, :G3].set(params['grug_w_ih'])
    sb = sb.at[B_WGI + N_LANE:B_WGI + N_LANE + N_LABEL, G3:].set(params['grur_w_ih'])
    sb = sb.at[B_BGI, :G3].set(params['grug_b_ih'][0])
    sb = sb.at[B_BGI, G3:].set(params['grur_b_ih'][0])

    out_cg_pad, out_cr_pad = pl.pallas_call(
        _joint_kernel,
        grid=(1,),
        in_specs=[
            pl.BlockSpec((Bb, Ss, IN2), lambda i: (0, 0, 0)),
            pl.BlockSpec((Bb, Ss, H2), lambda i: (0, 0, 0)),
            pl.BlockSpec((Bb, Ss, Ss, 1), lambda i: (0, 0, 0, 0)),
            pl.BlockSpec((A_ROWS, N_LANE), lambda i: (0, 0)),
            pl.BlockSpec((B_ROWS, 2 * G3), lambda i: (0, 0)),
        ],
        out_specs=[
            pl.BlockSpec((Bb, Ss, N_LANE), lambda i: (0, 0, 0)),
            pl.BlockSpec((Bb, Ss * Ss, N_LANE), lambda i: (0, 0, 0)),
        ],
        out_shape=[
            jax.ShapeDtypeStruct((Bb, Ss, N_LANE), jnp.float32),
            jax.ShapeDtypeStruct((Bb, Ss * Ss, N_LANE), jnp.float32),
        ],
        compiler_params=pltpu.CompilerParams(dimension_semantics=("arbitrary",)),
    )(x_pair, m_cat, mask_rc, sa, sb)

    logits_Cg = out_cg_pad[:, :, :N_BIO]                                 # (B,S,N_BIO)
    logits_Cr = out_cr_pad[:, :, :N_LABEL].reshape(Bb, Ss, Ss, N_LABEL)  # (B,S,S,NL)
    return logits_Cg, logits_Cr


# ----------------------------- parameters --------------------------------------
def _unif(key, shape, scale):
    return jax.random.uniform(key, shape, jnp.float32, -scale, scale)


def init_params(key):
    ks = jax.random.split(key, 24)
    sc = 0.1
    p = {}
    p['emb'] = jnp.concatenate(
        [jnp.zeros((1, EMB_DIM), jnp.float32),
         _unif(ks[0], (TOKEN_VOCAB - 1, EMB_DIM), 1.0)], axis=0)
    p['pos_emb'] = jnp.concatenate(
        [jnp.zeros((1, POS_DIM), jnp.float32),
         _unif(ks[1], (POS_VOCAB - 1, POS_DIM), sc)], axis=0)
    # BiLSTM (gate order i,f,g,o); weights stored (in, out); bias = b_ih + b_hh
    p['lstm_w_ih_f'] = _unif(ks[2], (IN_DIM, 4 * RNN_HIDDEN), sc)
    p['lstm_w_hh_f'] = _unif(ks[3], (RNN_HIDDEN, 4 * RNN_HIDDEN), sc)
    p['lstm_b_f'] = _unif(ks[4], (1, 4 * RNN_HIDDEN), sc)
    p['lstm_w_ih_b'] = _unif(ks[5], (IN_DIM, 4 * RNN_HIDDEN), sc)
    p['lstm_w_hh_b'] = _unif(ks[6], (RNN_HIDDEN, 4 * RNN_HIDDEN), sc)
    p['lstm_b_b'] = _unif(ks[7], (1, 4 * RNN_HIDDEN), sc)
    # GRUg (input = n_bio), GRUr (input = n_label); gate order r,z,n
    p['grug_w_ih'] = _unif(ks[8], (N_BIO, 3 * H2), sc)
    p['grug_w_hh'] = _unif(ks[9], (H2, 3 * H2), sc)
    p['grug_b_ih'] = _unif(ks[10], (1, 3 * H2), sc)
    p['grug_b_hh'] = _unif(ks[11], (1, 3 * H2), sc)
    p['grur_w_ih'] = _unif(ks[12], (N_LABEL, 3 * H2), sc)
    p['grur_w_hh'] = _unif(ks[13], (H2, 3 * H2), sc)
    p['grur_b_ih'] = _unif(ks[14], (1, 3 * H2), sc)
    p['grur_b_hh'] = _unif(ks[15], (1, 3 * H2), sc)
    # Lr: (4h -> 2h) split into halves acting on Hr_i / Hr_j
    w_lr = _unif(ks[16], (2 * H2, H2), sc)
    p['w_Lr1'] = w_lr[:H2]
    p['w_Lr2'] = w_lr[H2:]
    p['b_Lr'] = _unif(ks[17], (1, H2), sc)
    # Cr: (2h -> n_label), Cg: (2h -> n_bio)
    p['w_Cr'] = _unif(ks[18], (H2, N_LABEL), sc)
    p['b_Cr'] = _unif(ks[19], (1, N_LABEL), sc)
    p['w_Cg'] = _unif(ks[20], (H2, N_BIO), sc)
    p['b_Cg'] = _unif(ks[21], (1, N_BIO), sc)
    return p


# ----------------------------- main ---------------------------------------------
if __name__ == "__main__":
    root = jax.random.PRNGKey(0)
    pkey, dkey = jax.random.split(root)
    params = init_params(pkey)

    k1, k2 = jax.random.split(dkey)
    lens = jnp.array([S, 5], dtype=jnp.int32)                # sorted, max == S
    mask_s = (jnp.arange(S)[None, :] < lens[:, None]).astype(jnp.float32)
    tokens = jax.random.randint(k1, (B, S), 1, TOKEN_VOCAB) * mask_s.astype(jnp.int32)
    pos = jax.random.randint(k2, (B, S), 1, POS_VOCAB) * mask_s.astype(jnp.int32)
    head = jnp.zeros((B, S), jnp.int32)                      # unused (use_GCN=False)

    fwd = jax.jit(functools.partial(joint_classifier_forward, params))
    logits_Cg, logits_Cr = fwd(tokens, pos, mask_s, head)
    jax.block_until_ready((logits_Cg, logits_Cr))

    assert logits_Cg.shape == (B, S, N_BIO)
    assert logits_Cr.shape == (B, S, S, N_LABEL)
    assert bool(jnp.all(jnp.isfinite(logits_Cg)))
    assert bool(jnp.all(jnp.isfinite(logits_Cr)))
    print("KERNEL_OK")
</pallas_src>

<mosaic_0001>
module attributes {stable_mosaic.version = 11 : i64} {
  func.func @_joint_kernel(%arg0: i32, %arg1: memref<2x8x48xf32, #tpu.memory_space<vmem>>, %arg2: memref<2x8x32xf32, #tpu.memory_space<vmem>>, %arg3: memref<2x8x8x1xf32, #tpu.memory_space<vmem>>, %arg4: memref<208x128xf32, #tpu.memory_space<vmem>>, %arg5: memref<304x192xf32, #tpu.memory_space<vmem>>, %arg6: memref<2x8x128xf32, #tpu.memory_space<vmem>>, %arg7: memref<2x64x128xf32, #tpu.memory_space<vmem>>) attributes {dimension_semantics = [#tpu.dimension_semantics<arbitrary>], iteration_bounds = array<i64: 1>, scalar_prefetch = 0 : i64, scratch_operands = 0 : i64, tpu.core_type = #tpu.core_type<tc>, window_params = [{pipeline_mode = #tpu.pipeline_mode<synchronous>, transform_indices = @transform_0, window_bounds = array<i64: 2, 8, 48>}, {pipeline_mode = #tpu.pipeline_mode<synchronous>, transform_indices = @transform_1, window_bounds = array<i64: 2, 8, 32>}, {pipeline_mode = #tpu.pipeline_mode<synchronous>, transform_indices = @transform_2, window_bounds = array<i64: 2, 8, 8, 1>}, {pipeline_mode = #tpu.pipeline_mode<synchronous>, transform_indices = @transform_3, window_bounds = array<i64: 208, 128>}, {pipeline_mode = #tpu.pipeline_mode<synchronous>, transform_indices = @transform_4, window_bounds = array<i64: 304, 192>}, {pipeline_mode = #tpu.pipeline_mode<synchronous>, transform_indices = @transform_5, window_bounds = array<i64: 2, 8, 128>}, {pipeline_mode = #tpu.pipeline_mode<synchronous>, transform_indices = @transform_6, window_bounds = array<i64: 2, 64, 128>}]} {
    %c0 = arith.constant 0 : index
    %c0_0 = arith.constant 0 : index
    %c0_1 = arith.constant 0 : index
    %0 = vector.load %arg2[%c0, %c0_0, %c0_1] : memref<2x8x32xf32, #tpu.memory_space<vmem>>, vector<2x8x32xf32>
    %c0_2 = arith.constant 0 : index
    %c0_3 = arith.constant 0 : index
    %c0_4 = arith.constant 0 : index
    %c0_5 = arith.constant 0 : index
    %1 = vector.load %arg3[%c0_2, %c0_3, %c0_4, %c0_5] : memref<2x8x8x1xf32, #tpu.memory_space<vmem>>, vector<2x8x8x1xf32>
    %c0_6 = arith.constant 0 : index
    %c0_7 = arith.constant 0 : index
    %2 = vector.load %arg4[%c0_6, %c0_7] : memref<208x128xf32, #tpu.memory_space<vmem>>, vector<48x128xf32>
    %c48 = arith.constant 48 : index
    %c0_8 = arith.constant 0 : index
    %3 = vector.load %arg4[%c48, %c0_8] : memref<208x128xf32, #tpu.memory_space<vmem>>, vector<1x128xf32>
    %c56 = arith.constant 56 : index
    %c0_9 = arith.constant 0 : index
    %4 = vector.load %arg4[%c56, %c0_9] : memref<208x128xf32, #tpu.memory_space<vmem>>, vector<32x128xf32>
    %c0_10 = arith.constant 0 : index
    %c0_11 = arith.constant 0 : index
    %c0_12 = arith.constant 0 : index
    %5 = vector.load %arg1[%c0_10, %c0_11, %c0_12] : memref<2x8x48xf32, #tpu.memory_space<vmem>>, vector<2x8x48xf32>
    %6 = vector.shape_cast %5 : vector<2x8x48xf32> to vector<16x48xf32>
    %cst = arith.constant dense<0.000000e+00> : vector<16x128xf32>
    %7 = tpu.matmul %6, %2, %cst {dimension_numbers = #tpu.dot_dimension_numbers<[1], [0], [0], [1], [0, 0, 1, 1], [], []>} : vector<16x48xf32>, vector<48x128xf32>, vector<16x128xf32> -> vector<16x128xf32>
    %8 = vector.broadcast %3 : vector<1x128xf32> to vector<16x128xf32>
    %9 = arith.addf %7, %8 : vector<16x128xf32>
    %10 = vector.shape_cast %9 : vector<16x128xf32> to vector<2x8x128xf32>
    %cst_13 = arith.constant 0.000000e+00 : f32
    %11 = vector.broadcast %cst_13 : f32 to vector<2x32xf32>
    %cst_14 = arith.constant 0.000000e+00 : f32
    %12 = vector.broadcast %cst_14 : f32 to vector<2x32xf32>
    %13 = vector.extract_strided_slice %10 {offsets = [0, 0, 0], sizes = [2, 1, 128], strides = [1, 1, 1]} : vector<2x8x128xf32> to vector<2x1x128xf32>
    %14 = vector.shape_cast %13 : vector<2x1x128xf32> to vector<2x128xf32>
    %cst_15 = arith.constant dense<0.000000e+00> : vector<2x128xf32>
    %15 = tpu.matmul %11, %4, %cst_15 {dimension_numbers = #tpu.dot_dimension_numbers<[1], [0], [0], [1], [0, 0, 1, 1], [], []>} : vector<2x32xf32>, vector<32x128xf32>, vector<2x128xf32> -> vector<2x128xf32>
    %16 = arith.addf %14, %15 : vector<2x128xf32>
    %17 = vector.extract_strided_slice %16 {offsets = [0, 0], sizes = [2, 32], strides = [1, 1]} : vector<2x128xf32> to vector<2x32xf32>
    %18 = arith.negf %17 : vector<2x32xf32>
    %19 = math.exp %18 : vector<2x32xf32>
    %cst_16 = arith.constant 1.000000e+00 : f32
    %20 = vector.broadcast %cst_16 : f32 to vector<2x32xf32>
    %21 = arith.addf %20, %19 : vector<2x32xf32>
    %22 = arith.divf %20, %21 : vector<2x32xf32>
    %23 = vector.extract_strided_slice %16 {offsets = [0, 32], sizes = [2, 32], strides = [1, 1]} : vector<2x128xf32> to vector<2x32xf32>
    %24 = arith.negf %23 : vector<2x32xf32>
    %25 = math.exp %24 : vector<2x32xf32>
    %cst_17 = arith.constant 1.000000e+00 : f32
    %26 = vector.broadcast %cst_17 : f32 to vector<2x32xf32>
    %27 = arith.addf %26, %25 : vector<2x32xf32>
    %28 = arith.divf %26, %27 : vector<2x32xf32>
    %29 = vector.extract_strided_slice %16 {offsets = [0, 64], sizes = [2, 32], strides = [1, 1]} : vector<2x128xf32> to vector<2x32xf32>
    %30 = math.tanh %29 : vector<2x32xf32>
    %31 = vector.extract_strided_slice %16 {offsets = [0, 96], sizes = [2, 32], strides = [1, 1]} : vector<2x128xf32> to vector<2x32xf32>
    %32 = arith.negf %31 : vector<2x32xf32>
    %33 = math.exp %32 : vector<2x32xf32>
    %cst_18 = arith.constant 1.000000e+00 : f32
    %34 = vector.broadcast %cst_18 : f32 to vector<2x32xf32>
    %35 = arith.addf %34, %33 : vector<2x32xf32>
    %36 = arith.divf %34, %35 : vector<2x32xf32>
    %37 = arith.mulf %28, %12 : vector<2x32xf32>
    %38 = arith.mulf %22, %30 : vector<2x32xf32>
    %39 = arith.addf %37, %38 : vector<2x32xf32>
    %40 = math.tanh %39 : vector<2x32xf32>
    %41 = arith.mulf %36, %40 : vector<2x32xf32>
    %42 = vector.extract_strided_slice %0 {offsets = [0, 0, 0], sizes = [2, 1, 32], strides = [1, 1, 1]} : vector<2x8x32xf32> to vector<2x1x32xf32>
    %43 = vector.shape_cast %42 : vector<2x1x32xf32> to vector<2x32xf32>
    %44 = arith.mulf %43, %41 : vector<2x32xf32>
    %cst_19 = arith.constant 1.000000e+00 : f32
    %45 = vector.broadcast %cst_19 : f32 to vector<2x32xf32>
    %46 = arith.subf %45, %43 : vector<2x32xf32>
    %47 = arith.mulf %46, %11 : vector<2x32xf32>
    %48 = arith.addf %44, %47 : vector<2x32xf32>
    %49 = arith.mulf %43, %39 : vector<2x32xf32>
    %cst_20 = arith.constant 1.000000e+00 : f32
    %50 = vector.broadcast %cst_20 : f32 to vector<2x32xf32>
    %51 = arith.subf %50, %43 : vector<2x32xf32>
    %52 = arith.mulf %51, %12 : vector<2x32xf32>
    %53 = arith.addf %49, %52 : vector<2x32xf32>
    %54 = arith.mulf %43, %41 : vector<2x32xf32>
    %55 = vector.extract_strided_slice %10 {offsets = [0, 1, 0], sizes = [2, 1, 128], strides = [1, 1, 1]} : vector<2x8x128xf32> to vector<2x1x128xf32>
    %56 = vector.shape_cast %55 : vector<2x1x128xf32> to vector<2x128xf32>
    %cst_21 = arith.constant dense<0.000000e+00> : vector<2x128xf32>
    %57 = tpu.matmul %48, %4, %cst_21 {dimension_numbers = #tpu.dot_dimension_numbers<[1], [0], [0], [1], [0, 0, 1, 1], [], []>} : vector<2x32xf32>, vector<32x128xf32>, vector<2x128xf32> -> vector<2x128xf32>
    %58 = arith.addf %56, %57 : vector<2x128xf32>
    %59 = vector.extract_strided_slice %58 {offsets = [0, 0], sizes = [2, 32], strides = [1, 1]} : vector<2x128xf32> to vector<2x32xf32>
    %60 = arith.negf %59 : vector<2x32xf32>
    %61 = math.exp %60 : vector<2x32xf32>
    %cst_22 = arith.constant 1.000000e+00 : f32
    %62 = vector.broadcast %cst_22 : f32 to vector<2x32xf32>
    %63 = arith.addf %62, %61 : vector<2x32xf32>
    %64 = arith.divf %62, %63 : vector<2x32xf32>
    %65 = vector.extract_strided_slice %58 {offsets = [0, 32], sizes = [2, 32], strides = [1, 1]} : vector<2x128xf32> to vector<2x32xf32>
    %66 = arith.negf %65 : vector<2x32xf32>
    %67 = math.exp %66 : vector<2x32xf32>
    %cst_23 = arith.constant 1.000000e+00 : f32
    %68 = vector.broadcast %cst_23 : f32 to vector<2x32xf32>
    %69 = arith.addf %68, %67 : vector<2x32xf32>
    %70 = arith.divf %68, %69 : vector<2x32xf32>
    %71 = vector.extract_strided_slice %58 {offsets = [0, 64], sizes = [2, 32], strides = [1, 1]} : vector<2x128xf32> to vector<2x32xf32>
    %72 = math.tanh %71 : vector<2x32xf32>
    %73 = vector.extract_strided_slice %58 {offsets = [0, 96], sizes = [2, 32], strides = [1, 1]} : vector<2x128xf32> to vector<2x32xf32>
    %74 = arith.negf %73 : vector<2x32xf32>
    %75 = math.exp %74 : vector<2x32xf32>
    %cst_24 = arith.constant 1.000000e+00 : f32
    %76 = vector.broadcast %cst_24 : f32 to vector<2x32xf32>
    %77 = arith.addf %76, %75 : vector<2x32xf32>
    %78 = arith.divf %76, %77 : vector<2x32xf32>
    %79 = arith.mulf %70, %53 : vector<2x32xf32>
    %80 = arith.mulf %64, %72 : vector<2x32xf32>
    %81 = arith.addf %79, %80 : vector<2x32xf32>
    %82 = math.tanh %81 : vector<2x32xf32>
    %83 = arith.mulf %78, %82 : vector<2x32xf32>
    %84 = vector.extract_strided_slice %0 {offsets = [0, 1, 0], sizes = [2, 1, 32], strides = [1, 1, 1]} : vector<2x8x32xf32> to vector<2x1x32xf32>
    %85 = vector.shape_cast %84 : vector<2x1x32xf32> to vector<2x32xf32>
    %86 = arith.mulf %85, %83 : vector<2x32xf32>
    %cst_25 = arith.constant 1.000000e+00 : f32
    %87 = vector.broadcast %cst_25 : f32 to vector<2x32xf32>
    %88 = arith.subf %87, %85 : vector<2x32xf32>
    %89 = arith.mulf %88, %48 : vector<2x32xf32>
    %90 = arith.addf %86, %89 : vector<2x32xf32>
    %91 = arith.mulf %85, %81 : vector<2x32xf32>
    %cst_26 = arith.constant 1.000000e+00 : f32
    %92 = vector.broadcast %cst_26 : f32 to vector<2x32xf32>
    %93 = arith.subf %92, %85 : vector<2x32xf32>
    %94 = arith.mulf %93, %53 : vector<2x32xf32>
    %95 = arith.addf %91, %94 : vector<2x32xf32>
    %96 = arith.mulf %85, %83 : vector<2x32xf32>
    %97 = vector.extract_strided_slice %10 {offsets = [0, 2, 0], sizes = [2, 1, 128], strides = [1, 1, 1]} : vector<2x8x128xf32> to vector<2x1x128xf32>
    %98 = vector.shape_cast %97 : vector<2x1x128xf32> to vector<2x128xf32>
    %cst_27 = arith.constant dense<0.000000e+00> : vector<2x128xf32>
    %99 = tpu.matmul %90, %4, %cst_27 {dimension_numbers = #tpu.dot_dimension_numbers<[1], [0], [0], [1], [0, 0, 1, 1], [], []>} : vector<2x32xf32>, vector<32x128xf32>, vector<2x128xf32> -> vector<2x128xf32>
    %100 = arith.addf %98, %99 : vector<2x128xf32>
    %101 = vector.extract_strided_slice %100 {offsets = [0, 0], sizes = [2, 32], strides = [1, 1]} : vector<2x128xf32> to vector<2x32xf32>
    %102 = arith.negf %101 : vector<2x32xf32>
    %103 = math.exp %102 : vector<2x32xf32>
    %cst_28 = arith.constant 1.000000e+00 : f32
    %104 = vector.broadcast %cst_28 : f32 to vector<2x32xf32>
    %105 = arith.addf %104, %103 : vector<2x32xf32>
    %106 = arith.divf %104, %105 : vector<2x32xf32>
    %107 = vector.extract_strided_slice %100 {offsets = [0, 32], sizes = [2, 32], strides = [1, 1]} : vector<2x128xf32> to vector<2x32xf32>
    %108 = arith.negf %107 : vector<2x32xf32>
    %109 = math.exp %108 : vector<2x32xf32>
    %cst_29 = arith.constant 1.000000e+00 : f32
    %110 = vector.broadcast %cst_29 : f32 to vector<2x32xf32>
    %111 = arith.addf %110, %109 : vector<2x32xf32>
    %112 = arith.divf %110, %111 : vector<2x32xf32>
    %113 = vector.extract_strided_slice %100 {offsets = [0, 64], sizes = [2, 32], strides = [1, 1]} : vector<2x128xf32> to vector<2x32xf32>
    %114 = math.tanh %113 : vector<2x32xf32>
    %115 = vector.extract_strided_slice %100 {offsets = [0, 96], sizes = [2, 32], strides = [1, 1]} : vector<2x128xf32> to vector<2x32xf32>
    %116 = arith.negf %115 : vector<2x32xf32>
    %117 = math.exp %116 : vector<2x32xf32>
    %cst_30 = arith.constant 1.000000e+00 : f32
    %118 = vector.broadcast %cst_30 : f32 to vector<2x32xf32>
    %119 = arith.addf %118, %117 : vector<2x32xf32>
    %120 = arith.divf %118, %119 : vector<2x32xf32>
    %121 = arith.mulf %112, %95 : vector<2x32xf32>
    %122 = arith.mulf %106, %114 : vector<2x32xf32>
    %123 = arith.addf %121, %122 : vector<2x32xf32>
    %124 = math.tanh %123 : vector<2x32xf32>
    %125 = arith.mulf %120, %124 : vector<2x32xf32>
    %126 = vector.extract_strided_slice %0 {offsets = [0, 2, 0], sizes = [2, 1, 32], strides = [1, 1, 1]} : vector<2x8x32xf32> to vector<2x1x32xf32>
    %127 = vector.shape_cast %126 : vector<2x1x32xf32> to vector<2x32xf32>
    %128 = arith.mulf %127, %125 : vector<2x32xf32>
    %cst_31 = arith.constant 1.000000e+00 : f32
    %129 = vector.broadcast %cst_31 : f32 to vector<2x32xf32>
    %130 = arith.subf %129, %127 : vector<2x32xf32>
    %131 = arith.mulf %130, %90 : vector<2x32xf32>
    %132 = arith.addf %128, %131 : vector<2x32xf32>
    %133 = arith.mulf %127, %123 : vector<2x32xf32>
    %cst_32 = arith.constant 1.000000e+00 : f32
    %134 = vector.broadcast %cst_32 : f32 to vector<2x32xf32>
    %135 = arith.subf %134, %127 : vector<2x32xf32>
    %136 = arith.mulf %135, %95 : vector<2x32xf32>
    %137 = arith.addf %133, %136 : vector<2x32xf32>
    %138 = arith.mulf %127, %125 : vector<2x32xf32>
    %139 = vector.extract_strided_slice %10 {offsets = [0, 3, 0], sizes = [2, 1, 128], strides = [1, 1, 1]} : vector<2x8x128xf32> to vector<2x1x128xf32>
    %140 = vector.shape_cast %139 : vector<2x1x128xf32> to vector<2x128xf32>
    %cst_33 = arith.constant dense<0.000000e+00> : vector<2x128xf32>
    %141 = tpu.matmul %132, %4, %cst_33 {dimension_numbers = #tpu.dot_dimension_numbers<[1], [0], [0], [1], [0, 0, 1, 1], [], []>} : vector<2x32xf32>, vector<32x128xf32>, vector<2x128xf32> -> vector<2x128xf32>
    %142 = arith.addf %140, %141 : vector<2x128xf32>
    %143 = vector.extract_strided_slice %142 {offsets = [0, 0], sizes = [2, 32], strides = [1, 1]} : vector<2x128xf32> to vector<2x32xf32>
    %144 = arith.negf %143 : vector<2x32xf32>
    %145 = math.exp %144 : vector<2x32xf32>
    %cst_34 = arith.constant 1.000000e+00 : f32
    %146 = vector.broadcast %cst_34 : f32 to vector<2x32xf32>
    %147 = arith.addf %146, %145 : vector<2x32xf32>
    %148 = arith.divf %146, %147 : vector<2x32xf32>
    %149 = vector.extract_strided_slice %142 {offsets = [0, 32], sizes = [2, 32], strides = [1, 1]} : vector<2x128xf32> to vector<2x32xf32>
    %150 = arith.negf %149 : vector<2x32xf32>
    %151 = math.exp %150 : vector<2x32xf32>
    %cst_35 = arith.constant 1.000000e+00 : f32
    %152 = vector.broadcast %cst_35 : f32 to vector<2x32xf32>
    %153 = arith.addf %152, %151 : vector<2x32xf32>
    %154 = arith.divf %152, %153 : vector<2x32xf32>
    %155 = vector.extract_strided_slice %142 {offsets = [0, 64], sizes = [2, 32], strides = [1, 1]} : vector<2x128xf32> to vector<2x32xf32>
    %156 = math.tanh %155 : vector<2x32xf32>
    %157 = vector.extract_strided_slice %142 {offsets = [0, 96], sizes = [2, 32], strides = [1, 1]} : vector<2x128xf32> to vector<2x32xf32>
    %158 = arith.negf %157 : vector<2x32xf32>
    %159 = math.exp %158 : vector<2x32xf32>
    %cst_36 = arith.constant 1.000000e+00 : f32
    %160 = vector.broadcast %cst_36 : f32 to vector<2x32xf32>
    %161 = arith.addf %160, %159 : vector<2x32xf32>
    %162 = arith.divf %160, %161 : vector<2x32xf32>
    %163 = arith.mulf %154, %137 : vector<2x32xf32>
    %164 = arith.mulf %148, %156 : vector<2x32xf32>
    %165 = arith.addf %163, %164 : vector<2x32xf32>
    %166 = math.tanh %165 : vector<2x32xf32>
    %167 = arith.mulf %162, %166 : vector<2x32xf32>
    %168 = vector.extract_strided_slice %0 {offsets = [0, 3, 0], sizes = [2, 1, 32], strides = [1, 1, 1]} : vector<2x8x32xf32> to vector<2x1x32xf32>
    %169 = vector.shape_cast %168 : vector<2x1x32xf32> to vector<2x32xf32>
    %170 = arith.mulf %169, %167 : vector<2x32xf32>
    %cst_37 = arith.constant 1.000000e+00 : f32
    %171 = vector.broadcast %cst_37 : f32 to vector<2x32xf32>
    %172 = arith.subf %171, %169 : vector<2x32xf32>
    %173 = arith.mulf %172, %132 : vector<2x32xf32>
    %174 = arith.addf %170, %173 : vector<2x32xf32>
    %175 = arith.mulf %169, %165 : vector<2x32xf32>
    %cst_38 = arith.constant 1.000000e+00 : f32
    %176 = vector.broadcast %cst_38 : f32 to vector<2x32xf32>
    %177 = arith.subf %176, %169 : vector<2x32xf32>
    %178 = arith.mulf %177, %137 : vector<2x32xf32>
    %179 = arith.addf %175, %178 : vector<2x32xf32>
    %180 = arith.mulf %169, %167 : vector<2x32xf32>
    %181 = vector.extract_strided_slice %10 {offsets = [0, 4, 0], sizes = [2, 1, 128], strides = [1, 1, 1]} : vector<2x8x128xf32> to vector<2x1x128xf32>
    %182 = vector.shape_cast %181 : vector<2x1x128xf32> to vector<2x128xf32>
    %cst_39 = arith.constant dense<0.000000e+00> : vector<2x128xf32>
    %183 = tpu.matmul %174, %4, %cst_39 {dimension_numbers = #tpu.dot_dimension_numbers<[1], [0], [0], [1], [0, 0, 1, 1], [], []>} : vector<2x32xf32>, vector<32x128xf32>, vector<2x128xf32> -> vector<2x128xf32>
    %184 = arith.addf %182, %183 : vector<2x128xf32>
    %185 = vector.extract_strided_slice %184 {offsets = [0, 0], sizes = [2, 32], strides = [1, 1]} : vector<2x128xf32> to vector<2x32xf32>
    %186 = arith.negf %185 : vector<2x32xf32>
    %187 = math.exp %186 : vector<2x32xf32>
    %cst_40 = arith.constant 1.000000e+00 : f32
    %188 = vector.broadcast %cst_40 : f32 to vector<2x32xf32>
    %189 = arith.addf %188, %187 : vector<2x32xf32>
    %190 = arith.divf %188, %189 : vector<2x32xf32>
    %191 = vector.extract_strided_slice %184 {offsets = [0, 32], sizes = [2, 32], strides = [1, 1]} : vector<2x128xf32> to vector<2x32xf32>
    %192 = arith.negf %191 : vector<2x32xf32>
    %193 = math.exp %192 : vector<2x32xf32>
    %cst_41 = arith.constant 1.000000e+00 : f32
    %194 = vector.broadcast %cst_41 : f32 to vector<2x32xf32>
    %195 = arith.addf %194, %193 : vector<2x32xf32>
    %196 = arith.divf %194, %195 : vector<2x32xf32>
    %197 = vector.extract_strided_slice %184 {offsets = [0, 64], sizes = [2, 32], strides = [1, 1]} : vector<2x128xf32> to vector<2x32xf32>
    %198 = math.tanh %197 : vector<2x32xf32>
    %199 = vector.extract_strided_slice %184 {offsets = [0, 96], sizes = [2, 32], strides = [1, 1]} : vector<2x128xf32> to vector<2x32xf32>
    %200 = arith.negf %199 : vector<2x32xf32>
    %201 = math.exp %200 : vector<2x32xf32>
    %cst_42 = arith.constant 1.000000e+00 : f32
    %202 = vector.broadcast %cst_42 : f32 to vector<2x32xf32>
    %203 = arith.addf %202, %201 : vector<2x32xf32>
    %204 = arith.divf %202, %203 : vector<2x32xf32>
    %205 = arith.mulf %196, %179 : vector<2x32xf32>
    %206 = arith.mulf %190, %198 : vector<2x32xf32>
    %207 = arith.addf %205, %206 : vector<2x32xf32>
    %208 = math.tanh %207 : vector<2x32xf32>
    %209 = arith.mulf %204, %208 : vector<2x32xf32>
    %210 = vector.extract_strided_slice %0 {offsets = [0, 4, 0], sizes = [2, 1, 32], strides = [1, 1, 1]} : vector<2x8x32xf32> to vector<2x1x32xf32>
    %211 = vector.shape_cast %210 : vector<2x1x32xf32> to vector<2x32xf32>
    %212 = arith.mulf %211, %209 : vector<2x32xf32>
    %cst_43 = arith.constant 1.000000e+00 : f32
    %213 = vector.broadcast %cst_43 : f32 to vector<2x32xf32>
    %214 = arith.subf %213, %211 : vector<2x32xf32>
    %215 = arith.mulf %214, %174 : vector<2x32xf32>
    %216 = arith.addf %212, %215 : vector<2x32xf32>
    %217 = arith.mulf %211, %207 : vector<2x32xf32>
    %cst_44 = arith.constant 1.000000e+00 : f32
    %218 = vector.broadcast %cst_44 : f32 to vector<2x32xf32>
    %219 = arith.subf %218, %211 : vector<2x32xf32>
    %220 = arith.mulf %219, %179 : vector<2x32xf32>
    %221 = arith.addf %217, %220 : vector<2x32xf32>
    %222 = arith.mulf %211, %209 : vector<2x32xf32>
    %223 = vector.extract_strided_slice %10 {offsets = [0, 5, 0], sizes = [2, 1, 128], strides = [1, 1, 1]} : vector<2x8x128xf32> to vector<2x1x128xf32>
    %224 = vector.shape_cast %223 : vector<2x1x128xf32> to vector<2x128xf32>
    %cst_45 = arith.constant dense<0.000000e+00> : vector<2x128xf32>
    %225 = tpu.matmul %216, %4, %cst_45 {dimension_numbers = #tpu.dot_dimension_numbers<[1], [0], [0], [1], [0, 0, 1, 1], [], []>} : vector<2x32xf32>, vector<32x128xf32>, vector<2x128xf32> -> vector<2x128xf32>
    %226 = arith.addf %224, %225 : vector<2x128xf32>
    %227 = vector.extract_strided_slice %226 {offsets = [0, 0], sizes = [2, 32], strides = [1, 1]} : vector<2x128xf32> to vector<2x32xf32>
    %228 = arith.negf %227 : vector<2x32xf32>
    %229 = math.exp %228 : vector<2x32xf32>
    %cst_46 = arith.constant 1.000000e+00 : f32
    %230 = vector.broadcast %cst_46 : f32 to vector<2x32xf32>
    %231 = arith.addf %230, %229 : vector<2x32xf32>
    %232 = arith.divf %230, %231 : vector<2x32xf32>
    %233 = vector.extract_strided_slice %226 {offsets = [0, 32], sizes = [2, 32], strides = [1, 1]} : vector<2x128xf32> to vector<2x32xf32>
    %234 = arith.negf %233 : vector<2x32xf32>
    %235 = math.exp %234 : vector<2x32xf32>
    %cst_47 = arith.constant 1.000000e+00 : f32
    %236 = vector.broadcast %cst_47 : f32 to vector<2x32xf32>
    %237 = arith.addf %236, %235 : vector<2x32xf32>
    %238 = arith.divf %236, %237 : vector<2x32xf32>
    %239 = vector.extract_strided_slice %226 {offsets = [0, 64], sizes = [2, 32], strides = [1, 1]} : vector<2x128xf32> to vector<2x32xf32>
    %240 = math.tanh %239 : vector<2x32xf32>
    %241 = vector.extract_strided_slice %226 {offsets = [0, 96], sizes = [2, 32], strides = [1, 1]} : vector<2x128xf32> to vector<2x32xf32>
    %242 = arith.negf %241 : vector<2x32xf32>
    %243 = math.exp %242 : vector<2x32xf32>
    %cst_48 = arith.constant 1.000000e+00 : f32
    %244 = vector.broadcast %cst_48 : f32 to vector<2x32xf32>
    %245 = arith.addf %244, %243 : vector<2x32xf32>
    %246 = arith.divf %244, %245 : vector<2x32xf32>
    %247 = arith.mulf %238, %221 : vector<2x32xf32>
    %248 = arith.mulf %232, %240 : vector<2x32xf32>
    %249 = arith.addf %247, %248 : vector<2x32xf32>
    %250 = math.tanh %249 : vector<2x32xf32>
    %251 = arith.mulf %246, %250 : vector<2x32xf32>
    %252 = vector.extract_strided_slice %0 {offsets = [0, 5, 0], sizes = [2, 1, 32], strides = [1, 1, 1]} : vector<2x8x32xf32> to vector<2x1x32xf32>
    %253 = vector.shape_cast %252 : vector<2x1x32xf32> to vector<2x32xf32>
    %254 = arith.mulf %253, %251 : vector<2x32xf32>
    %cst_49 = arith.constant 1.000000e+00 : f32
    %255 = vector.broadcast %cst_49 : f32 to vector<2x32xf32>
    %256 = arith.subf %255, %253 : vector<2x32xf32>
    %257 = arith.mulf %256, %216 : vector<2x32xf32>
    %258 = arith.addf %254, %257 : vector<2x32xf32>
    %259 = arith.mulf %253, %249 : vector<2x32xf32>
    %cst_50 = arith.constant 1.000000e+00 : f32
    %260 = vector.broadcast %cst_50 : f32 to vector<2x32xf32>
    %261 = arith.subf %260, %253 : vector<2x32xf32>
    %262 = arith.mulf %261, %221 : vector<2x32xf32>
    %263 = arith.addf %259, %262 : vector<2x32xf32>
    %264 = arith.mulf %253, %251 : vector<2x32xf32>
    %265 = vector.extract_strided_slice %10 {offsets = [0, 6, 0], sizes = [2, 1, 128], strides = [1, 1, 1]} : vector<2x8x128xf32> to vector<2x1x128xf32>
    %266 = vector.shape_cast %265 : vector<2x1x128xf32> to vector<2x128xf32>
    %cst_51 = arith.constant dense<0.000000e+00> : vector<2x128xf32>
    %267 = tpu.matmul %258, %4, %cst_51 {dimension_numbers = #tpu.dot_dimension_numbers<[1], [0], [0], [1], [0, 0, 1, 1], [], []>} : vector<2x32xf32>, vector<32x128xf32>, vector<2x128xf32> -> vector<2x128xf32>
    %268 = arith.addf %266, %267 : vector<2x128xf32>
    %269 = vector.extract_strided_slice %268 {offsets = [0, 0], sizes = [2, 32], strides = [1, 1]} : vector<2x128xf32> to vector<2x32xf32>
    %270 = arith.negf %269 : vector<2x32xf32>
    %271 = math.exp %270 : vector<2x32xf32>
    %cst_52 = arith.constant 1.000000e+00 : f32
    %272 = vector.broadcast %cst_52 : f32 to vector<2x32xf32>
    %273 = arith.addf %272, %271 : vector<2x32xf32>
    %274 = arith.divf %272, %273 : vector<2x32xf32>
    %275 = vector.extract_strided_slice %268 {offsets = [0, 32], sizes = [2, 32], strides = [1, 1]} : vector<2x128xf32> to vector<2x32xf32>
    %276 = arith.negf %275 : vector<2x32xf32>
    %277 = math.exp %276 : vector<2x32xf32>
    %cst_53 = arith.constant 1.000000e+00 : f32
    %278 = vector.broadcast %cst_53 : f32 to vector<2x32xf32>
    %279 = arith.addf %278, %277 : vector<2x32xf32>
    %280 = arith.divf %278, %279 : vector<2x32xf32>
    %281 = vector.extract_strided_slice %268 {offsets = [0, 64], sizes = [2, 32], strides = [1, 1]} : vector<2x128xf32> to vector<2x32xf32>
    %282 = math.tanh %281 : vector<2x32xf32>
    %283 = vector.extract_strided_slice %268 {offsets = [0, 96], sizes = [2, 32], strides = [1, 1]} : vector<2x128xf32> to vector<2x32xf32>
    %284 = arith.negf %283 : vector<2x32xf32>
    %285 = math.exp %284 : vector<2x32xf32>
    %cst_54 = arith.constant 1.000000e+00 : f32
    %286 = vector.broadcast %cst_54 : f32 to vector<2x32xf32>
    %287 = arith.addf %286, %285 : vector<2x32xf32>
    %288 = arith.divf %286, %287 : vector<2x32xf32>
    %289 = arith.mulf %280, %263 : vector<2x32xf32>
    %290 = arith.mulf %274, %282 : vector<2x32xf32>
    %291 = arith.addf %289, %290 : vector<2x32xf32>
    %292 = math.tanh %291 : vector<2x32xf32>
    %293 = arith.mulf %288, %292 : vector<2x32xf32>
    %294 = vector.extract_strided_slice %0 {offsets = [0, 6, 0], sizes = [2, 1, 32], strides = [1, 1, 1]} : vector<2x8x32xf32> to vector<2x1x32xf32>
    %295 = vector.shape_cast %294 : vector<2x1x32xf32> to vector<2x32xf32>
    %296 = arith.mulf %295, %293 : vector<2x32xf32>
    %cst_55 = arith.constant 1.000000e+00 : f32
    %297 = vector.broadcast %cst_55 : f32 to vector<2x32xf32>
    %298 = arith.subf %297, %295 : vector<2x32xf32>
    %299 = arith.mulf %298, %258 : vector<2x32xf32>
    %300 = arith.addf %296, %299 : vector<2x32xf32>
    %301 = arith.mulf %295, %291 : vector<2x32xf32>
    %cst_56 = arith.constant 1.000000e+00 : f32
    %302 = vector.broadcast %cst_56 : f32 to vector<2x32xf32>
    %303 = arith.subf %302, %295 : vector<2x32xf32>
    %304 = arith.mulf %303, %263 : vector<2x32xf32>
    %305 = arith.addf %301, %304 : vector<2x32xf32>
    %306 = arith.mulf %295, %293 : vector<2x32xf32>
    %307 = vector.extract_strided_slice %10 {offsets = [0, 7, 0], sizes = [2, 1, 128], strides = [1, 1, 1]} : vector<2x8x128xf32> to vector<2x1x128xf32>
    %308 = vector.shape_cast %307 : vector<2x1x128xf32> to vector<2x128xf32>
    %cst_57 = arith.constant dense<0.000000e+00> : vector<2x128xf32>
    %309 = tpu.matmul %300, %4, %cst_57 {dimension_numbers = #tpu.dot_dimension_numbers<[1], [0], [0], [1], [0, 0, 1, 1], [], []>} : vector<2x32xf32>, vector<32x128xf32>, vector<2x128xf32> -> vector<2x128xf32>
    %310 = arith.addf %308, %309 : vector<2x128xf32>
    %311 = vector.extract_strided_slice %310 {offsets = [0, 0], sizes = [2, 32], strides = [1, 1]} : vector<2x128xf32> to vector<2x32xf32>
    %312 = arith.negf %311 : vector<2x32xf32>
    %313 = math.exp %312 : vector<2x32xf32>
    %cst_58 = arith.constant 1.000000e+00 : f32
    %314 = vector.broadcast %cst_58 : f32 to vector<2x32xf32>
    %315 = arith.addf %314, %313 : vector<2x32xf32>
    %316 = arith.divf %314, %315 : vector<2x32xf32>
    %317 = vector.extract_strided_slice %310 {offsets = [0, 32], sizes = [2, 32], strides = [1, 1]} : vector<2x128xf32> to vector<2x32xf32>
    %318 = arith.negf %317 : vector<2x32xf32>
    %319 = math.exp %318 : vector<2x32xf32>
    %cst_59 = arith.constant 1.000000e+00 : f32
    %320 = vector.broadcast %cst_59 : f32 to vector<2x32xf32>
    %321 = arith.addf %320, %319 : vector<2x32xf32>
    %322 = arith.divf %320, %321 : vector<2x32xf32>
    %323 = vector.extract_strided_slice %310 {offsets = [0, 64], sizes = [2, 32], strides = [1, 1]} : vector<2x128xf32> to vector<2x32xf32>
    %324 = math.tanh %323 : vector<2x32xf32>
    %325 = vector.extract_strided_slice %310 {offsets = [0, 96], sizes = [2, 32], strides = [1, 1]} : vector<2x128xf32> to vector<2x32xf32>
    %326 = arith.negf %325 : vector<2x32xf32>
    %327 = math.exp %326 : vector<2x32xf32>
    %cst_60 = arith.constant 1.000000e+00 : f32
    %328 = vector.broadcast %cst_60 : f32 to vector<2x32xf32>
    %329 = arith.addf %328, %327 : vector<2x32xf32>
    %330 = arith.divf %328, %329 : vector<2x32xf32>
    %331 = arith.mulf %322, %305 : vector<2x32xf32>
    %332 = arith.mulf %316, %324 : vector<2x32xf32>
    %333 = arith.addf %331, %332 : vector<2x32xf32>
    %334 = math.tanh %333 : vector<2x32xf32>
    %335 = arith.mulf %330, %334 : vector<2x32xf32>
    %336 = vector.extract_strided_slice %0 {offsets = [0, 7, 0], sizes = [2, 1, 32], strides = [1, 1, 1]} : vector<2x8x32xf32> to vector<2x1x32xf32>
    %337 = vector.shape_cast %336 : vector<2x1x32xf32> to vector<2x32xf32>
    %338 = arith.mulf %337, %335 : vector<2x32xf32>
    %339 = tpu.iota {dimensions = array<i32: 1>} : vector<1x32xi32>
    %c16_i32 = arith.constant 16 : i32
    %340 = vector.broadcast %c16_i32 : i32 to vector<1x32xi32>
    %341 = arith.cmpi slt, %339, %340 : vector<1x32xi32>
    %342 = tpu.iota {dimensions = array<i32: 1>} : vector<2x8x32xi32>
    %cst_61 = arith.constant 0.000000e+00 : f32
    %343 = vector.broadcast %cst_61 : f32 to vector<2x8x32xf32>
    %344 = vector.shape_cast %341 : vector<1x32xi1> to vector<1x32xi1>
    %345 = vector.broadcast %344 : vector<1x32xi1> to vector<2x32xi1>
    %346 = arith.select %345, %54, %338 : vector<2x32xi1>, vector<2x32xf32>
    %c0_i32 = arith.constant 0 : i32
    %347 = vector.broadcast %c0_i32 : i32 to vector<2x8x32xi32>
    %348 = arith.cmpi eq, %342, %347 : vector<2x8x32xi32>
    %349 = vector.shape_cast %346 : vector<2x32xf32> to vector<2x1x32xf32>
    %cst_62 = arith.constant 0.000000e+00 : f32
    %350 = vector.shape_cast %349 : vector<2x1x32xf32> to vector<2x1x32xf32>
    %351 = vector.broadcast %350 : vector<2x1x32xf32> to vector<2x8x32xf32>
    %352 = vector.broadcast %cst_62 : f32 to vector<2x8x32xf32>
    %353 = arith.select %348, %351, %352 : vector<2x8x32xi1>, vector<2x8x32xf32>
    %354 = arith.addf %343, %353 : vector<2x8x32xf32>
    %355 = vector.shape_cast %341 : vector<1x32xi1> to vector<1x32xi1>
    %356 = vector.broadcast %355 : vector<1x32xi1> to vector<2x32xi1>
    %357 = arith.select %356, %96, %306 : vector<2x32xi1>, vector<2x32xf32>
    %c1_i32 = arith.constant 1 : i32
    %358 = vector.broadcast %c1_i32 : i32 to vector<2x8x32xi32>
    %359 = arith.cmpi eq, %342, %358 : vector<2x8x32xi32>
    %360 = vector.shape_cast %357 : vector<2x32xf32> to vector<2x1x32xf32>
    %cst_63 = arith.constant 0.000000e+00 : f32
    %361 = vector.shape_cast %360 : vector<2x1x32xf32> to vector<2x1x32xf32>
    %362 = vector.broadcast %361 : vector<2x1x32xf32> to vector<2x8x32xf32>
    %363 = vector.broadcast %cst_63 : f32 to vector<2x8x32xf32>
    %364 = arith.select %359, %362, %363 : vector<2x8x32xi1>, vector<2x8x32xf32>
    %365 = arith.addf %354, %364 : vector<2x8x32xf32>
    %366 = vector.shape_cast %341 : vector<1x32xi1> to vector<1x32xi1>
    %367 = vector.broadcast %366 : vector<1x32xi1> to vector<2x32xi1>
    %368 = arith.select %367, %138, %264 : vector<2x32xi1>, vector<2x32xf32>
    %c2_i32 = arith.constant 2 : i32
    %369 = vector.broadcast %c2_i32 : i32 to vector<2x8x32xi32>
    %370 = arith.cmpi eq, %342, %369 : vector<2x8x32xi32>
    %371 = vector.shape_cast %368 : vector<2x32xf32> to vector<2x1x32xf32>
    %cst_64 = arith.constant 0.000000e+00 : f32
    %372 = vector.shape_cast %371 : vector<2x1x32xf32> to vector<2x1x32xf32>
    %373 = vector.broadcast %372 : vector<2x1x32xf32> to vector<2x8x32xf32>
    %374 = vector.broadcast %cst_64 : f32 to vector<2x8x32xf32>
    %375 = arith.select %370, %373, %374 : vector<2x8x32xi1>, vector<2x8x32xf32>
    %376 = arith.addf %365, %375 : vector<2x8x32xf32>
    %377 = vector.shape_cast %341 : vector<1x32xi1> to vector<1x32xi1>
    %378 = vector.broadcast %377 : vector<1x32xi1> to vector<2x32xi1>
    %379 = arith.select %378, %180, %222 : vector<2x32xi1>, vector<2x32xf32>
    %c3_i32 = arith.constant 3 : i32
    %380 = vector.broadcast %c3_i32 : i32 to vector<2x8x32xi32>
    %381 = arith.cmpi eq, %342, %380 : vector<2x8x32xi32>
    %382 = vector.shape_cast %379 : vector<2x32xf32> to vector<2x1x32xf32>
    %cst_65 = arith.constant 0.000000e+00 : f32
    %383 = vector.shape_cast %382 : vector<2x1x32xf32> to vector<2x1x32xf32>
    %384 = vector.broadcast %383 : vector<2x1x32xf32> to vector<2x8x32xf32>
    %385 = vector.broadcast %cst_65 : f32 to vector<2x8x32xf32>
    %386 = arith.select %381, %384, %385 : vector<2x8x32xi1>, vector<2x8x32xf32>
    %387 = arith.addf %376, %386 : vector<2x8x32xf32>
    %388 = vector.shape_cast %341 : vector<1x32xi1> to vector<1x32xi1>
    %389 = vector.broadcast %388 : vector<1x32xi1> to vector<2x32xi1>
    %390 = arith.select %389, %222, %180 : vector<2x32xi1>, vector<2x32xf32>
    %c4_i32 = arith.constant 4 : i32
    %391 = vector.broadcast %c4_i32 : i32 to vector<2x8x32xi32>
    %392 = arith.cmpi eq, %342, %391 : vector<2x8x32xi32>
    %393 = vector.shape_cast %390 : vector<2x32xf32> to vector<2x1x32xf32>
    %cst_66 = arith.constant 0.000000e+00 : f32
    %394 = vector.shape_cast %393 : vector<2x1x32xf32> to vector<2x1x32xf32>
    %395 = vector.broadcast %394 : vector<2x1x32xf32> to vector<2x8x32xf32>
    %396 = vector.broadcast %cst_66 : f32 to vector<2x8x32xf32>
    %397 = arith.select %392, %395, %396 : vector<2x8x32xi1>, vector<2x8x32xf32>
    %398 = arith.addf %387, %397 : vector<2x8x32xf32>
    %399 = vector.shape_cast %341 : vector<1x32xi1> to vector<1x32xi1>
    %400 = vector.broadcast %399 : vector<1x32xi1> to vector<2x32xi1>
    %401 = arith.select %400, %264, %138 : vector<2x32xi1>, vector<2x32xf32>
    %c5_i32 = arith.constant 5 : i32
    %402 = vector.broadcast %c5_i32 : i32 to vector<2x8x32xi32>
    %403 = arith.cmpi eq, %342, %402 : vector<2x8x32xi32>
    %404 = vector.shape_cast %401 : vector<2x32xf32> to vector<2x1x32xf32>
    %cst_67 = arith.constant 0.000000e+00 : f32
    %405 = vector.shape_cast %404 : vector<2x1x32xf32> to vector<2x1x32xf32>
    %406 = vector.broadcast %405 : vector<2x1x32xf32> to vector<2x8x32xf32>
    %407 = vector.broadcast %cst_67 : f32 to vector<2x8x32xf32>
    %408 = arith.select %403, %406, %407 : vector<2x8x32xi1>, vector<2x8x32xf32>
    %409 = arith.addf %398, %408 : vector<2x8x32xf32>
    %410 = vector.shape_cast %341 : vector<1x32xi1> to vector<1x32xi1>
    %411 = vector.broadcast %410 : vector<1x32xi1> to vector<2x32xi1>
    %412 = arith.select %411, %306, %96 : vector<2x32xi1>, vector<2x32xf32>
    %c6_i32 = arith.constant 6 : i32
    %413 = vector.broadcast %c6_i32 : i32 to vector<2x8x32xi32>
    %414 = arith.cmpi eq, %342, %413 : vector<2x8x32xi32>
    %415 = vector.shape_cast %412 : vector<2x32xf32> to vector<2x1x32xf32>
    %cst_68 = arith.constant 0.000000e+00 : f32
    %416 = vector.shape_cast %415 : vector<2x1x32xf32> to vector<2x1x32xf32>
    %417 = vector.broadcast %416 : vector<2x1x32xf32> to vector<2x8x32xf32>
    %418 = vector.broadcast %cst_68 : f32 to vector<2x8x32xf32>
    %419 = arith.select %414, %417, %418 : vector<2x8x32xi1>, vector<2x8x32xf32>
    %420 = arith.addf %409, %419 : vector<2x8x32xf32>
    %421 = vector.shape_cast %341 : vector<1x32xi1> to vector<1x32xi1>
    %422 = vector.broadcast %421 : vector<1x32xi1> to vector<2x32xi1>
    %423 = arith.select %422, %338, %54 : vector<2x32xi1>, vector<2x32xf32>
    %c7_i32 = arith.constant 7 : i32
    %424 = vector.broadcast %c7_i32 : i32 to vector<2x8x32xi32>
    %425 = arith.cmpi eq, %342, %424 : vector<2x8x32xi32>
    %426 = vector.shape_cast %423 : vector<2x32xf32> to vector<2x1x32xf32>
    %cst_69 = arith.constant 0.000000e+00 : f32
    %427 = vector.shape_cast %426 : vector<2x1x32xf32> to vector<2x1x32xf32>
    %428 = vector.broadcast %427 : vector<2x1x32xf32> to vector<2x8x32xf32>
    %429 = vector.broadcast %cst_69 : f32 to vector<2x8x32xf32>
    %430 = arith.select %425, %428, %429 : vector<2x8x32xi1>, vector<2x8x32xf32>
    %431 = arith.addf %420, %430 : vector<2x8x32xf32>
    %432 = vector.shape_cast %431 : vector<2x8x32xf32> to vector<16x32xf32>
    %433 = vector.shape_cast %0 : vector<2x8x32xf32> to vector<16x32xf32>
    %434 = vector.extract_strided_slice %433 {offsets = [0, 0], sizes = [16, 1], strides = [1, 1]} : vector<16x32xf32> to vector<16x1xf32>
    %435 = tpu.iota {dimensions = array<i32: 1>} : vector<1x128xi32>
    %c5_i32_70 = arith.constant 5 : i32
    %436 = vector.broadcast %c5_i32_70 : i32 to vector<1x128xi32>
    %437 = arith.cmpi slt, %435, %436 : vector<1x128xi32>
    %c88 = arith.constant 88 : index
    %c0_71 = arith.constant 0 : index
    %438 = vector.load %arg4[%c88, %c0_71] : memref<208x128xf32, #tpu.memory_space<vmem>>, vector<32x128xf32>
    %cst_72 = arith.constant dense<0.000000e+00> : vector<16x128xf32>
    %439 = tpu.matmul %432, %438, %cst_72 {dimension_numbers = #tpu.dot_dimension_numbers<[1], [0], [0], [1], [0, 0, 1, 1], [], []>} : vector<16x32xf32>, vector<32x128xf32>, vector<16x128xf32> -> vector<16x128xf32>
    %c120 = arith.constant 120 : index
    %c0_73 = arith.constant 0 : index
    %440 = vector.load %arg4[%c120, %c0_73] : memref<208x128xf32, #tpu.memory_space<vmem>>, vector<1x128xf32>
    %441 = vector.broadcast %440 : vector<1x128xf32> to vector<16x128xf32>
    %442 = arith.addf %439, %441 : vector<16x128xf32>
    %cst_74 = arith.constant -1.000000e+30 : f32
    %443 = vector.shape_cast %437 : vector<1x128xi1> to vector<1x128xi1>
    %444 = vector.broadcast %443 : vector<1x128xi1> to vector<16x128xi1>
    %445 = vector.broadcast %cst_74 : f32 to vector<16x128xf32>
    %446 = arith.select %444, %442, %445 : vector<16x128xi1>, vector<16x128xf32>
    %cst_75 = arith.constant dense<0xFF800000> : vector<16xf32>
    %447 = vector.multi_reduction <maximumf>, %446, %cst_75 [1] : vector<16x128xf32> to vector<16xf32>
    %448 = vector.shape_cast %447 : vector<16xf32> to vector<16x1xf32>
    %449 = vector.broadcast %448 : vector<16x1xf32> to vector<16x128xf32>
    %450 = arith.subf %446, %449 : vector<16x128xf32>
    %451 = math.exp %450 : vector<16x128xf32>
    %cst_76 = arith.constant dense<0.000000e+00> : vector<16xf32>
    %452 = vector.multi_reduction <add>, %451, %cst_76 [1] : vector<16x128xf32> to vector<16xf32>
    %453 = vector.shape_cast %452 : vector<16xf32> to vector<16x1xf32>
    %454 = tpu.reciprocal %453 {approx = true} : vector<16x1xf32> -> vector<16x1xf32>
    %455 = vector.broadcast %454 : vector<16x1xf32> to vector<16x128xf32>
    %456 = arith.mulf %451, %455 : vector<16x128xf32>
    %c128 = arith.constant 128 : index
    %c0_77 = arith.constant 0 : index
    %457 = vector.load %arg4[%c128, %c0_77] : memref<208x128xf32, #tpu.memory_space<vmem>>, vector<32x128xf32>
    %cst_78 = arith.constant dense<0.000000e+00> : vector<16x128xf32>
    %458 = tpu.matmul %432, %457, %cst_78 {dimension_numbers = #tpu.dot_dimension_numbers<[1], [0], [0], [1], [0, 0, 1, 1], [], []>} : vector<16x32xf32>, vector<32x128xf32>, vector<16x128xf32> -> vector<16x128xf32>
    %c160 = arith.constant 160 : index
    %c0_79 = arith.constant 0 : index
    %459 = vector.load %arg4[%c160, %c0_79] : memref<208x128xf32, #tpu.memory_space<vmem>>, vector<1x128xf32>
    %460 = vector.broadcast %459 : vector<1x128xf32> to vector<16x128xf32>
    %461 = arith.addf %458, %460 : vector<16x128xf32>
    %462 = vector.extract_strided_slice %461 {offsets = [0, 0], sizes = [16, 32], strides = [1, 1]} : vector<16x128xf32> to vector<16x32xf32>
    %463 = vector.shape_cast %462 : vector<16x32xf32> to vector<2x8x32xf32>
    %464 = vector.extract_strided_slice %461 {offsets = [0, 32], sizes = [16, 32], strides = [1, 1]} : vector<16x128xf32> to vector<16x32xf32>
    %465 = vector.shape_cast %464 : vector<16x32xf32> to vector<2x8x32xf32>
    %466 = vector.shape_cast %463 : vector<2x8x32xf32> to vector<2x8x1x32xf32>
    %467 = vector.shape_cast %465 : vector<2x8x32xf32> to vector<2x1x8x32xf32>
    %468 = vector.broadcast %466 : vector<2x8x1x32xf32> to vector<2x8x8x32xf32>
    %469 = vector.broadcast %467 : vector<2x1x8x32xf32> to vector<2x8x8x32xf32>
    %470 = arith.addf %468, %469 : vector<2x8x8x32xf32>
    %cst_80 = arith.constant 0.000000e+00 : f32
    %471 = vector.broadcast %cst_80 : f32 to vector<2x8x8x32xf32>
    %472 = arith.maximumf %470, %471 : vector<2x8x8x32xf32>
    %473 = vector.shape_cast %472 : vector<2x8x8x32xf32> to vector<128x32xf32>
    %c168 = arith.constant 168 : index
    %c0_81 = arith.constant 0 : index
    %474 = vector.load %arg4[%c168, %c0_81] : memref<208x128xf32, #tpu.memory_space<vmem>>, vector<32x128xf32>
    %cst_82 = arith.constant dense<0.000000e+00> : vector<128x128xf32>
    %475 = tpu.matmul %473, %474, %cst_82 {dimension_numbers = #tpu.dot_dimension_numbers<[1], [0], [0], [1], [0, 0, 1, 1], [], []>} : vector<128x32xf32>, vector<32x128xf32>, vector<128x128xf32> -> vector<128x128xf32>
    %c200 = arith.constant 200 : index
    %c0_83 = arith.constant 0 : index
    %476 = vector.load %arg4[%c200, %c0_83] : memref<208x128xf32, #tpu.memory_space<vmem>>, vector<1x128xf32>
    %477 = vector.broadcast %476 : vector<1x128xf32> to vector<128x128xf32>
    %478 = arith.addf %475, %477 : vector<128x128xf32>
    %479 = arith.negf %478 : vector<128x128xf32>
    %480 = math.exp %479 : vector<128x128xf32>
    %cst_84 = arith.constant 1.000000e+00 : f32
    %481 = vector.broadcast %cst_84 : f32 to vector<128x128xf32>
    %482 = arith.addf %481, %480 : vector<128x128xf32>
    %483 = arith.divf %481, %482 : vector<128x128xf32>
    %484 = vector.shape_cast %483 : vector<128x128xf32> to vector<2x8x8x128xf32>
    %485 = vector.broadcast %1 : vector<2x8x8x1xf32> to vector<2x8x8x128xf32>
    %486 = arith.mulf %484, %485 : vector<2x8x8x128xf32>
    %cst_85 = arith.constant 5.000000e-01 : f32
    %487 = vector.broadcast %cst_85 : f32 to vector<2x8x8x1xf32>
    %488 = arith.cmpf olt, %1, %487 : vector<2x8x8x1xf32>
    %cst_86 = arith.constant -9.99999979E+10 : f32
    %489 = vector.shape_cast %488 : vector<2x8x8x1xi1> to vector<2x8x8x1xi1>
    %490 = vector.broadcast %489 : vector<2x8x8x1xi1> to vector<2x8x8x128xi1>
    %491 = vector.broadcast %cst_86 : f32 to vector<2x8x8x128xf32>
    %492 = arith.select %490, %491, %486 : vector<2x8x8x128xi1>, vector<2x8x8x128xf32>
    %cst_87 = arith.constant dense<0xFF800000> : vector<2x8x128xf32>
    %493 = vector.multi_reduction <maximumf>, %492, %cst_87 [2] : vector<2x8x8x128xf32> to vector<2x8x128xf32>
    %494 = vector.shape_cast %493 : vector<2x8x128xf32> to vector<16x128xf32>
    %c0_88 = arith.constant 0 : index
    %c0_89 = arith.constant 0 : index
    %495 = vector.load %arg5[%c0_88, %c0_89] : memref<304x192xf32, #tpu.memory_space<vmem>>, vector<32x192xf32>
    %cst_90 = arith.constant dense<0.000000e+00> : vector<16x192xf32>
    %496 = tpu.matmul %432, %495, %cst_90 {dimension_numbers = #tpu.dot_dimension_numbers<[1], [0], [0], [1], [0, 0, 1, 1], [], []>} : vector<16x32xf32>, vector<32x192xf32>, vector<16x192xf32> -> vector<16x192xf32>
    %c32 = arith.constant 32 : index
    %c0_91 = arith.constant 0 : index
    %497 = vector.load %arg5[%c32, %c0_91] : memref<304x192xf32, #tpu.memory_space<vmem>>, vector<1x192xf32>
    %498 = vector.broadcast %497 : vector<1x192xf32> to vector<16x192xf32>
    %499 = arith.addf %496, %498 : vector<16x192xf32>
    %500 = tpu.concatenate %456, %494 in 1 : vector<16x128xf32>, vector<16x128xf32> -> vector<16x256xf32>
    %c40 = arith.constant 40 : index
    %c0_92 = arith.constant 0 : index
    %501 = vector.load %arg5[%c40, %c0_92] : memref<304x192xf32, #tpu.memory_space<vmem>>, vector<256x192xf32>
    %cst_93 = arith.constant dense<0.000000e+00> : vector<16x192xf32>
    %502 = tpu.matmul %500, %501, %cst_93 {dimension_numbers = #tpu.dot_dimension_numbers<[1], [0], [0], [1], [0, 0, 1, 1], [], []>} : vector<16x256xf32>, vector<256x192xf32>, vector<16x192xf32> -> vector<16x192xf32>
    %c296 = arith.constant 296 : index
    %c0_94 = arith.constant 0 : index
    %503 = vector.load %arg5[%c296, %c0_94] : memref<304x192xf32, #tpu.memory_space<vmem>>, vector<1x192xf32>
    %504 = vector.broadcast %503 : vector<1x192xf32> to vector<16x192xf32>
    %505 = arith.addf %502, %504 : vector<16x192xf32>
    %506 = vector.extract_strided_slice %505 {offsets = [0, 0], sizes = [16, 96], strides = [1, 1]} : vector<16x192xf32> to vector<16x96xf32>
    %507 = vector.extract_strided_slice %499 {offsets = [0, 0], sizes = [16, 96], strides = [1, 1]} : vector<16x192xf32> to vector<16x96xf32>
    %508 = vector.extract_strided_slice %506 {offsets = [0, 0], sizes = [16, 32], strides = [1, 1]} : vector<16x96xf32> to vector<16x32xf32>
    %509 = vector.extract_strided_slice %507 {offsets = [0, 0], sizes = [16, 32], strides = [1, 1]} : vector<16x96xf32> to vector<16x32xf32>
    %510 = arith.addf %508, %509 : vector<16x32xf32>
    %511 = arith.negf %510 : vector<16x32xf32>
    %512 = math.exp %511 : vector<16x32xf32>
    %cst_95 = arith.constant 1.000000e+00 : f32
    %513 = vector.broadcast %cst_95 : f32 to vector<16x32xf32>
    %514 = arith.addf %513, %512 : vector<16x32xf32>
    %515 = arith.divf %513, %514 : vector<16x32xf32>
    %516 = vector.extract_strided_slice %506 {offsets = [0, 32], sizes = [16, 32], strides = [1, 1]} : vector<16x96xf32> to vector<16x32xf32>
    %517 = vector.extract_strided_slice %507 {offsets = [0, 32], sizes = [16, 32], strides = [1, 1]} : vector<16x96xf32> to vector<16x32xf32>
    %518 = arith.addf %516, %517 : vector<16x32xf32>
    %519 = arith.negf %518 : vector<16x32xf32>
    %520 = math.exp %519 : vector<16x32xf32>
    %cst_96 = arith.constant 1.000000e+00 : f32
    %521 = vector.broadcast %cst_96 : f32 to vector<16x32xf32>
    %522 = arith.addf %521, %520 : vector<16x32xf32>
    %523 = arith.divf %521, %522 : vector<16x32xf32>
    %524 = vector.extract_strided_slice %506 {offsets = [0, 64], sizes = [16, 32], strides = [1, 1]} : vector<16x96xf32> to vector<16x32xf32>
    %525 = vector.extract_strided_slice %507 {offsets = [0, 64], sizes = [16, 32], strides = [1, 1]} : vector<16x96xf32> to vector<16x32xf32>
    %526 = arith.mulf %515, %525 : vector<16x32xf32>
    %527 = arith.addf %524, %526 : vector<16x32xf32>
    %528 = math.tanh %527 : vector<16x32xf32>
    %cst_97 = arith.constant 1.000000e+00 : f32
    %529 = vector.broadcast %cst_97 : f32 to vector<16x32xf32>
    %530 = arith.subf %529, %523 : vector<16x32xf32>
    %531 = arith.mulf %530, %528 : vector<16x32xf32>
    %532 = arith.mulf %523, %432 : vector<16x32xf32>
    %533 = arith.addf %531, %532 : vector<16x32xf32>
    %534 = vector.extract_strided_slice %505 {offsets = [0, 96], sizes = [16, 96], strides = [1, 1]} : vector<16x192xf32> to vector<16x96xf32>
    %535 = vector.extract_strided_slice %499 {offsets = [0, 96], sizes = [16, 96], strides = [1, 1]} : vector<16x192xf32> to vector<16x96xf32>
    %536 = vector.extract_strided_slice %534 {offsets = [0, 0], sizes = [16, 32], strides = [1, 1]} : vector<16x96xf32> to vector<16x32xf32>
    %537 = vector.extract_strided_slice %535 {offsets = [0, 0], sizes = [16, 32], strides = [1, 1]} : vector<16x96xf32> to vector<16x32xf32>
    %538 = arith.addf %536, %537 : vector<16x32xf32>
    %539 = arith.negf %538 : vector<16x32xf32>
    %540 = math.exp %539 : vector<16x32xf32>
    %cst_98 = arith.constant 1.000000e+00 : f32
    %541 = vector.broadcast %cst_98 : f32 to vector<16x32xf32>
    %542 = arith.addf %541, %540 : vector<16x32xf32>
    %543 = arith.divf %541, %542 : vector<16x32xf32>
    %544 = vector.extract_strided_slice %534 {offsets = [0, 32], sizes = [16, 32], strides = [1, 1]} : vector<16x96xf32> to vector<16x32xf32>
    %545 = vector.extract_strided_slice %535 {offsets = [0, 32], sizes = [16, 32], strides = [1, 1]} : vector<16x96xf32> to vector<16x32xf32>
    %546 = arith.addf %544, %545 : vector<16x32xf32>
    %547 = arith.negf %546 : vector<16x32xf32>
    %548 = math.exp %547 : vector<16x32xf32>
    %cst_99 = arith.constant 1.000000e+00 : f32
    %549 = vector.broadcast %cst_99 : f32 to vector<16x32xf32>
    %550 = arith.addf %549, %548 : vector<16x32xf32>
    %551 = arith.divf %549, %550 : vector<16x32xf32>
    %552 = vector.extract_strided_slice %534 {offsets = [0, 64], sizes = [16, 32], strides = [1, 1]} : vector<16x96xf32> to vector<16x32xf32>
    %553 = vector.extract_strided_slice %535 {offsets = [0, 64], sizes = [16, 32], strides = [1, 1]} : vector<16x96xf32> to vector<16x32xf32>
    %554 = arith.mulf %543, %553 : vector<16x32xf32>
    %555 = arith.addf %552, %554 : vector<16x32xf32>
    %556 = math.tanh %555 : vector<16x32xf32>
    %cst_100 = arith.constant 1.000000e+00 : f32
    %557 = vector.broadcast %cst_100 : f32 to vector<16x32xf32>
    %558 = arith.subf %557, %551 : vector<16x32xf32>
    %559 = arith.mulf %558, %556 : vector<16x32xf32>
    %560 = arith.mulf %551, %432 : vector<16x32xf32>
    %561 = arith.addf %559, %560 : vector<16x32xf32>
    %562 = arith.addf %432, %561 : vector<16x32xf32>
    %563 = arith.addf %562, %533 : vector<16x32xf32>
    %c88_101 = arith.constant 88 : index
    %c0_102 = arith.constant 0 : index
    %564 = vector.load %arg4[%c88_101, %c0_102] : memref<208x128xf32, #tpu.memory_space<vmem>>, vector<32x128xf32>
    %cst_103 = arith.constant dense<0.000000e+00> : vector<16x128xf32>
    %565 = tpu.matmul %533, %564, %cst_103 {dimension_numbers = #tpu.dot_dimension_numbers<[1], [0], [0], [1], [0, 0, 1, 1], [], []>} : vector<16x32xf32>, vector<32x128xf32>, vector<16x128xf32> -> vector<16x128xf32>
    %c120_104 = arith.constant 120 : index
    %c0_105 = arith.constant 0 : index
    %566 = vector.load %arg4[%c120_104, %c0_105] : memref<208x128xf32, #tpu.memory_space<vmem>>, vector<1x128xf32>
    %567 = vector.broadcast %566 : vector<1x128xf32> to vector<16x128xf32>
    %568 = arith.addf %565, %567 : vector<16x128xf32>
    %cst_106 = arith.constant -1.000000e+30 : f32
    %569 = vector.shape_cast %437 : vector<1x128xi1> to vector<1x128xi1>
    %570 = vector.broadcast %569 : vector<1x128xi1> to vector<16x128xi1>
    %571 = vector.broadcast %cst_106 : f32 to vector<16x128xf32>
    %572 = arith.select %570, %568, %571 : vector<16x128xi1>, vector<16x128xf32>
    %cst_107 = arith.constant dense<0xFF800000> : vector<16xf32>
    %573 = vector.multi_reduction <maximumf>, %572, %cst_107 [1] : vector<16x128xf32> to vector<16xf32>
    %574 = vector.shape_cast %573 : vector<16xf32> to vector<16x1xf32>
    %575 = vector.broadcast %574 : vector<16x1xf32> to vector<16x128xf32>
    %576 = arith.subf %572, %575 : vector<16x128xf32>
    %577 = math.exp %576 : vector<16x128xf32>
    %cst_108 = arith.constant dense<0.000000e+00> : vector<16xf32>
    %578 = vector.multi_reduction <add>, %577, %cst_108 [1] : vector<16x128xf32> to vector<16xf32>
    %579 = vector.shape_cast %578 : vector<16xf32> to vector<16x1xf32>
    %580 = tpu.reciprocal %579 {approx = true} : vector<16x1xf32> -> vector<16x1xf32>
    %581 = vector.broadcast %580 : vector<16x1xf32> to vector<16x128xf32>
    %582 = arith.mulf %577, %581 : vector<16x128xf32>
    %c128_109 = arith.constant 128 : index
    %c0_110 = arith.constant 0 : index
    %583 = vector.load %arg4[%c128_109, %c0_110] : memref<208x128xf32, #tpu.memory_space<vmem>>, vector<32x128xf32>
    %cst_111 = arith.constant dense<0.000000e+00> : vector<16x128xf32>
    %584 = tpu.matmul %561, %583, %cst_111 {dimension_numbers = #tpu.dot_dimension_numbers<[1], [0], [0], [1], [0, 0, 1, 1], [], []>} : vector<16x32xf32>, vector<32x128xf32>, vector<16x128xf32> -> vector<16x128xf32>
    %c160_112 = arith.constant 160 : index
    %c0_113 = arith.constant 0 : index
    %585 = vector.load %arg4[%c160_112, %c0_113] : memref<208x128xf32, #tpu.memory_space<vmem>>, vector<1x128xf32>
    %586 = vector.broadcast %585 : vector<1x128xf32> to vector<16x128xf32>
    %587 = arith.addf %584, %586 : vector<16x128xf32>
    %588 = vector.extract_strided_slice %587 {offsets = [0, 0], sizes = [16, 32], strides = [1, 1]} : vector<16x128xf32> to vector<16x32xf32>
    %589 = vector.shape_cast %588 : vector<16x32xf32> to vector<2x8x32xf32>
    %590 = vector.extract_strided_slice %587 {offsets = [0, 32], sizes = [16, 32], strides = [1, 1]} : vector<16x128xf32> to vector<16x32xf32>
    %591 = vector.shape_cast %590 : vector<16x32xf32> to vector<2x8x32xf32>
    %592 = vector.shape_cast %589 : vector<2x8x32xf32> to vector<2x8x1x32xf32>
    %593 = vector.shape_cast %591 : vector<2x8x32xf32> to vector<2x1x8x32xf32>
    %594 = vector.broadcast %592 : vector<2x8x1x32xf32> to vector<2x8x8x32xf32>
    %595 = vector.broadcast %593 : vector<2x1x8x32xf32> to vector<2x8x8x32xf32>
    %596 = arith.addf %594, %595 : vector<2x8x8x32xf32>
    %cst_114 = arith.constant 0.000000e+00 : f32
    %597 = vector.broadcast %cst_114 : f32 to vector<2x8x8x32xf32>
    %598 = arith.maximumf %596, %597 : vector<2x8x8x32xf32>
    %599 = vector.shape_cast %598 : vector<2x8x8x32xf32> to vector<128x32xf32>
    %c168_115 = arith.constant 168 : index
    %c0_116 = arith.constant 0 : index
    %600 = vector.load %arg4[%c168_115, %c0_116] : memref<208x128xf32, #tpu.memory_space<vmem>>, vector<32x128xf32>
    %cst_117 = arith.constant dense<0.000000e+00> : vector<128x128xf32>
    %601 = tpu.matmul %599, %600, %cst_117 {dimension_numbers = #tpu.dot_dimension_numbers<[1], [0], [0], [1], [0, 0, 1, 1], [], []>} : vector<128x32xf32>, vector<32x128xf32>, vector<128x128xf32> -> vector<128x128xf32>
    %c200_118 = arith.constant 200 : index
    %c0_119 = arith.constant 0 : index
    %602 = vector.load %arg4[%c200_118, %c0_119] : memref<208x128xf32, #tpu.memory_space<vmem>>, vector<1x128xf32>
    %603 = vector.broadcast %602 : vector<1x128xf32> to vector<128x128xf32>
    %604 = arith.addf %601, %603 : vector<128x128xf32>
    %605 = arith.negf %604 : vector<128x128xf32>
    %606 = math.exp %605 : vector<128x128xf32>
    %cst_120 = arith.constant 1.000000e+00 : f32
    %607 = vector.broadcast %cst_120 : f32 to vector<128x128xf32>
    %608 = arith.addf %607, %606 : vector<128x128xf32>
    %609 = arith.divf %607, %608 : vector<128x128xf32>
    %610 = vector.shape_cast %609 : vector<128x128xf32> to vector<2x8x8x128xf32>
    %611 = vector.broadcast %1 : vector<2x8x8x1xf32> to vector<2x8x8x128xf32>
    %612 = arith.mulf %610, %611 : vector<2x8x8x128xf32>
    %cst_121 = arith.constant 5.000000e-01 : f32
    %613 = vector.broadcast %cst_121 : f32 to vector<2x8x8x1xf32>
    %614 = arith.cmpf olt, %1, %613 : vector<2x8x8x1xf32>
    %cst_122 = arith.constant -9.99999979E+10 : f32
    %615 = vector.shape_cast %614 : vector<2x8x8x1xi1> to vector<2x8x8x1xi1>
    %616 = vector.broadcast %615 : vector<2x8x8x1xi1> to vector<2x8x8x128xi1>
    %617 = vector.broadcast %cst_122 : f32 to vector<2x8x8x128xf32>
    %618 = arith.select %616, %617, %612 : vector<2x8x8x128xi1>, vector<2x8x8x128xf32>
    %cst_123 = arith.constant dense<0xFF800000> : vector<2x8x128xf32>
    %619 = vector.multi_reduction <maximumf>, %618, %cst_123 [2] : vector<2x8x8x128xf32> to vector<2x8x128xf32>
    %620 = vector.shape_cast %619 : vector<2x8x128xf32> to vector<16x128xf32>
    %c0_124 = arith.constant 0 : index
    %c0_125 = arith.constant 0 : index
    %621 = vector.load %arg5[%c0_124, %c0_125] : memref<304x192xf32, #tpu.memory_space<vmem>>, vector<32x192xf32>
    %cst_126 = arith.constant dense<0.000000e+00> : vector<16x192xf32>
    %622 = tpu.matmul %563, %621, %cst_126 {dimension_numbers = #tpu.dot_dimension_numbers<[1], [0], [0], [1], [0, 0, 1, 1], [], []>} : vector<16x32xf32>, vector<32x192xf32>, vector<16x192xf32> -> vector<16x192xf32>
    %c32_127 = arith.constant 32 : index
    %c0_128 = arith.constant 0 : index
    %623 = vector.load %arg5[%c32_127, %c0_128] : memref<304x192xf32, #tpu.memory_space<vmem>>, vector<1x192xf32>
    %624 = vector.broadcast %623 : vector<1x192xf32> to vector<16x192xf32>
    %625 = arith.addf %622, %624 : vector<16x192xf32>
    %626 = tpu.concatenate %582, %620 in 1 : vector<16x128xf32>, vector<16x128xf32> -> vector<16x256xf32>
    %c40_129 = arith.constant 40 : index
    %c0_130 = arith.constant 0 : index
    %627 = vector.load %arg5[%c40_129, %c0_130] : memref<304x192xf32, #tpu.memory_space<vmem>>, vector<256x192xf32>
    %cst_131 = arith.constant dense<0.000000e+00> : vector<16x192xf32>
    %628 = tpu.matmul %626, %627, %cst_131 {dimension_numbers = #tpu.dot_dimension_numbers<[1], [0], [0], [1], [0, 0, 1, 1], [], []>} : vector<16x256xf32>, vector<256x192xf32>, vector<16x192xf32> -> vector<16x192xf32>
    %c296_132 = arith.constant 296 : index
    %c0_133 = arith.constant 0 : index
    %629 = vector.load %arg5[%c296_132, %c0_133] : memref<304x192xf32, #tpu.memory_space<vmem>>, vector<1x192xf32>
    %630 = vector.broadcast %629 : vector<1x192xf32> to vector<16x192xf32>
    %631 = arith.addf %628, %630 : vector<16x192xf32>
    %632 = vector.extract_strided_slice %631 {offsets = [0, 0], sizes = [16, 96], strides = [1, 1]} : vector<16x192xf32> to vector<16x96xf32>
    %633 = vector.extract_strided_slice %625 {offsets = [0, 0], sizes = [16, 96], strides = [1, 1]} : vector<16x192xf32> to vector<16x96xf32>
    %634 = vector.extract_strided_slice %632 {offsets = [0, 0], sizes = [16, 32], strides = [1, 1]} : vector<16x96xf32> to vector<16x32xf32>
    %635 = vector.extract_strided_slice %633 {offsets = [0, 0], sizes = [16, 32], strides = [1, 1]} : vector<16x96xf32> to vector<16x32xf32>
    %636 = arith.addf %634, %635 : vector<16x32xf32>
    %637 = arith.negf %636 : vector<16x32xf32>
    %638 = math.exp %637 : vector<16x32xf32>
    %cst_134 = arith.constant 1.000000e+00 : f32
    %639 = vector.broadcast %cst_134 : f32 to vector<16x32xf32>
    %640 = arith.addf %639, %638 : vector<16x32xf32>
    %641 = arith.divf %639, %640 : vector<16x32xf32>
    %642 = vector.extract_strided_slice %632 {offsets = [0, 32], sizes = [16, 32], strides = [1, 1]} : vector<16x96xf32> to vector<16x32xf32>
    %643 = vector.extract_strided_slice %633 {offsets = [0, 32], sizes = [16, 32], strides = [1, 1]} : vector<16x96xf32> to vector<16x32xf32>
    %644 = arith.addf %642, %643 : vector<16x32xf32>
    %645 = arith.negf %644 : vector<16x32xf32>
    %646 = math.exp %645 : vector<16x32xf32>
    %cst_135 = arith.constant 1.000000e+00 : f32
    %647 = vector.broadcast %cst_135 : f32 to vector<16x32xf32>
    %648 = arith.addf %647, %646 : vector<16x32xf32>
    %649 = arith.divf %647, %648 : vector<16x32xf32>
    %650 = vector.extract_strided_slice %632 {offsets = [0, 64], sizes = [16, 32], strides = [1, 1]} : vector<16x96xf32> to vector<16x32xf32>
    %651 = vector.extract_strided_slice %633 {offsets = [0, 64], sizes = [16, 32], strides = [1, 1]} : vector<16x96xf32> to vector<16x32xf32>
    %652 = arith.mulf %641, %651 : vector<16x32xf32>
    %653 = arith.addf %650, %652 : vector<16x32xf32>
    %654 = math.tanh %653 : vector<16x32xf32>
    %cst_136 = arith.constant 1.000000e+00 : f32
    %655 = vector.broadcast %cst_136 : f32 to vector<16x32xf32>
    %656 = arith.subf %655, %649 : vector<16x32xf32>
    %657 = arith.mulf %656, %654 : vector<16x32xf32>
    %658 = arith.mulf %649, %563 : vector<16x32xf32>
    %659 = arith.addf %657, %658 : vector<16x32xf32>
    %660 = vector.extract_strided_slice %631 {offsets = [0, 96], sizes = [16, 96], strides = [1, 1]} : vector<16x192xf32> to vector<16x96xf32>
    %661 = vector.extract_strided_slice %625 {offsets = [0, 96], sizes = [16, 96], strides = [1, 1]} : vector<16x192xf32> to vector<16x96xf32>
    %662 = vector.extract_strided_slice %660 {offsets = [0, 0], sizes = [16, 32], strides = [1, 1]} : vector<16x96xf32> to vector<16x32xf32>
    %663 = vector.extract_strided_slice %661 {offsets = [0, 0], sizes = [16, 32], strides = [1, 1]} : vector<16x96xf32> to vector<16x32xf32>
    %664 = arith.addf %662, %663 : vector<16x32xf32>
    %665 = arith.negf %664 : vector<16x32xf32>
    %666 = math.exp %665 : vector<16x32xf32>
    %cst_137 = arith.constant 1.000000e+00 : f32
    %667 = vector.broadcast %cst_137 : f32 to vector<16x32xf32>
    %668 = arith.addf %667, %666 : vector<16x32xf32>
    %669 = arith.divf %667, %668 : vector<16x32xf32>
    %670 = vector.extract_strided_slice %660 {offsets = [0, 32], sizes = [16, 32], strides = [1, 1]} : vector<16x96xf32> to vector<16x32xf32>
    %671 = vector.extract_strided_slice %661 {offsets = [0, 32], sizes = [16, 32], strides = [1, 1]} : vector<16x96xf32> to vector<16x32xf32>
    %672 = arith.addf %670, %671 : vector<16x32xf32>
    %673 = arith.negf %672 : vector<16x32xf32>
    %674 = math.exp %673 : vector<16x32xf32>
    %cst_138 = arith.constant 1.000000e+00 : f32
    %675 = vector.broadcast %cst_138 : f32 to vector<16x32xf32>
    %676 = arith.addf %675, %674 : vector<16x32xf32>
    %677 = arith.divf %675, %676 : vector<16x32xf32>
    %678 = vector.extract_strided_slice %660 {offsets = [0, 64], sizes = [16, 32], strides = [1, 1]} : vector<16x96xf32> to vector<16x32xf32>
    %679 = vector.extract_strided_slice %661 {offsets = [0, 64], sizes = [16, 32], strides = [1, 1]} : vector<16x96xf32> to vector<16x32xf32>
    %680 = arith.mulf %669, %679 : vector<16x32xf32>
    %681 = arith.addf %678, %680 : vector<16x32xf32>
    %682 = math.tanh %681 : vector<16x32xf32>
    %cst_139 = arith.constant 1.000000e+00 : f32
    %683 = vector.broadcast %cst_139 : f32 to vector<16x32xf32>
    %684 = arith.subf %683, %677 : vector<16x32xf32>
    %685 = arith.mulf %684, %682 : vector<16x32xf32>
    %686 = arith.mulf %677, %563 : vector<16x32xf32>
    %687 = arith.addf %685, %686 : vector<16x32xf32>
    %c88_140 = arith.constant 88 : index
    %c0_141 = arith.constant 0 : index
    %688 = vector.load %arg4[%c88_140, %c0_141] : memref<208x128xf32, #tpu.memory_space<vmem>>, vector<32x128xf32>
    %cst_142 = arith.constant dense<0.000000e+00> : vector<16x128xf32>
    %689 = tpu.matmul %659, %688, %cst_142 {dimension_numbers = #tpu.dot_dimension_numbers<[1], [0], [0], [1], [0, 0, 1, 1], [], []>} : vector<16x32xf32>, vector<32x128xf32>, vector<16x128xf32> -> vector<16x128xf32>
    %c120_143 = arith.constant 120 : index
    %c0_144 = arith.constant 0 : index
    %690 = vector.load %arg4[%c120_143, %c0_144] : memref<208x128xf32, #tpu.memory_space<vmem>>, vector<1x128xf32>
    %691 = vector.broadcast %690 : vector<1x128xf32> to vector<16x128xf32>
    %692 = arith.addf %689, %691 : vector<16x128xf32>
    %cst_145 = arith.constant -1.000000e+30 : f32
    %693 = vector.shape_cast %437 : vector<1x128xi1> to vector<1x128xi1>
    %694 = vector.broadcast %693 : vector<1x128xi1> to vector<16x128xi1>
    %695 = vector.broadcast %cst_145 : f32 to vector<16x128xf32>
    %696 = arith.select %694, %692, %695 : vector<16x128xi1>, vector<16x128xf32>
    %cst_146 = arith.constant dense<0xFF800000> : vector<16xf32>
    %697 = vector.multi_reduction <maximumf>, %696, %cst_146 [1] : vector<16x128xf32> to vector<16xf32>
    %698 = vector.shape_cast %697 : vector<16xf32> to vector<16x1xf32>
    %699 = vector.broadcast %698 : vector<16x1xf32> to vector<16x128xf32>
    %700 = arith.subf %696, %699 : vector<16x128xf32>
    %701 = math.exp %700 : vector<16x128xf32>
    %cst_147 = arith.constant dense<0.000000e+00> : vector<16xf32>
    %702 = vector.multi_reduction <add>, %701, %cst_147 [1] : vector<16x128xf32> to vector<16xf32>
    %703 = vector.shape_cast %702 : vector<16xf32> to vector<16x1xf32>
    %704 = math.log %703 : vector<16x1xf32>
    %705 = vector.broadcast %698 : vector<16x1xf32> to vector<16x128xf32>
    %706 = arith.subf %696, %705 : vector<16x128xf32>
    %707 = vector.broadcast %704 : vector<16x1xf32> to vector<16x128xf32>
    %708 = arith.subf %706, %707 : vector<16x128xf32>
    %709 = vector.broadcast %434 : vector<16x1xf32> to vector<16x128xf32>
    %710 = arith.mulf %708, %709 : vector<16x128xf32>
    %711 = vector.shape_cast %710 : vector<16x128xf32> to vector<2x8x128xf32>
    %c0_148 = arith.constant 0 : index
    %c0_149 = arith.constant 0 : index
    %c0_150 = arith.constant 0 : index
    %712 = vector.load %arg6[%c0_148, %c0_149, %c0_150] : memref<2x8x128xf32, #tpu.memory_space<vmem>>, vector<2x8x128xf32>
    tpu.vector_store %arg6[%c0_148, %c0_149, %c0_150], %711 {strides = array<i32>} : memref<2x8x128xf32, #tpu.memory_space<vmem>>, vector<2x8x128xf32>,
    %c128_151 = arith.constant 128 : index
    %c0_152 = arith.constant 0 : index
    %713 = vector.load %arg4[%c128_151, %c0_152] : memref<208x128xf32, #tpu.memory_space<vmem>>, vector<32x128xf32>
    %cst_153 = arith.constant dense<0.000000e+00> : vector<16x128xf32>
    %714 = tpu.matmul %687, %713, %cst_153 {dimension_numbers = #tpu.dot_dimension_numbers<[1], [0], [0], [1], [0, 0, 1, 1], [], []>} : vector<16x32xf32>, vector<32x128xf32>, vector<16x128xf32> -> vector<16x128xf32>
    %c160_154 = arith.constant 160 : index
    %c0_155 = arith.constant 0 : index
    %715 = vector.load %arg4[%c160_154, %c0_155] : memref<208x128xf32, #tpu.memory_space<vmem>>, vector<1x128xf32>
    %716 = vector.broadcast %715 : vector<1x128xf32> to vector<16x128xf32>
    %717 = arith.addf %714, %716 : vector<16x128xf32>
    %718 = vector.extract_strided_slice %717 {offsets = [0, 0], sizes = [16, 32], strides = [1, 1]} : vector<16x128xf32> to vector<16x32xf32>
    %719 = vector.shape_cast %718 : vector<16x32xf32> to vector<2x8x32xf32>
    %720 = vector.extract_strided_slice %717 {offsets = [0, 32], sizes = [16, 32], strides = [1, 1]} : vector<16x128xf32> to vector<16x32xf32>
    %721 = vector.shape_cast %720 : vector<16x32xf32> to vector<2x8x32xf32>
    %722 = vector.shape_cast %719 : vector<2x8x32xf32> to vector<2x8x1x32xf32>
    %723 = vector.shape_cast %721 : vector<2x8x32xf32> to vector<2x1x8x32xf32>
    %724 = vector.broadcast %722 : vector<2x8x1x32xf32> to vector<2x8x8x32xf32>
    %725 = vector.broadcast %723 : vector<2x1x8x32xf32> to vector<2x8x8x32xf32>
    %726 = arith.addf %724, %725 : vector<2x8x8x32xf32>
    %cst_156 = arith.constant 0.000000e+00 : f32
    %727 = vector.broadcast %cst_156 : f32 to vector<2x8x8x32xf32>
    %728 = arith.maximumf %726, %727 : vector<2x8x8x32xf32>
    %729 = vector.shape_cast %728 : vector<2x8x8x32xf32> to vector<128x32xf32>
    %c168_157 = arith.constant 168 : index
    %c0_158 = arith.constant 0 : index
    %730 = vector.load %arg4[%c168_157, %c0_158] : memref<208x128xf32, #tpu.memory_space<vmem>>, vector<32x128xf32>
    %cst_159 = arith.constant dense<0.000000e+00> : vector<128x128xf32>
    %731 = tpu.matmul %729, %730, %cst_159 {dimension_numbers = #tpu.dot_dimension_numbers<[1], [0], [0], [1], [0, 0, 1, 1], [], []>} : vector<128x32xf32>, vector<32x128xf32>, vector<128x128xf32> -> vector<128x128xf32>
    %c200_160 = arith.constant 200 : index
    %c0_161 = arith.constant 0 : index
    %732 = vector.load %arg4[%c200_160, %c0_161] : memref<208x128xf32, #tpu.memory_space<vmem>>, vector<1x128xf32>
    %733 = vector.broadcast %732 : vector<1x128xf32> to vector<128x128xf32>
    %734 = arith.addf %731, %733 : vector<128x128xf32>
    %735 = arith.negf %734 : vector<128x128xf32>
    %736 = math.exp %735 : vector<128x128xf32>
    %cst_162 = arith.constant 1.000000e+00 : f32
    %737 = vector.broadcast %cst_162 : f32 to vector<128x128xf32>
    %738 = arith.addf %737, %736 : vector<128x128xf32>
    %739 = arith.divf %737, %738 : vector<128x128xf32>
    %740 = vector.shape_cast %739 : vector<128x128xf32> to vector<2x8x8x128xf32>
    %741 = vector.broadcast %1 : vector<2x8x8x1xf32> to vector<2x8x8x128xf32>
    %742 = arith.mulf %740, %741 : vector<2x8x8x128xf32>
    %743 = vector.shape_cast %742 : vector<2x8x8x128xf32> to vector<2x64x128xf32>
    %c0_163 = arith.constant 0 : index
    %c0_164 = arith.constant 0 : index
    %c0_165 = arith.constant 0 : index
    %744 = vector.load %arg7[%c0_163, %c0_164, %c0_165] : memref<2x64x128xf32, #tpu.memory_space<vmem>>, vector<2x64x128xf32>
    tpu.vector_store %arg7[%c0_163, %c0_164, %c0_165], %743 {strides = array<i32>} : memref<2x64x128xf32, #tpu.memory_space<vmem>>, vector<2x64x128xf32>,
    return
  }
  func.func @transform_0(%arg0: i32) -> (i32, i32, i32) {
    %c0_i32 = arith.constant 0 : i32
    %c0_i32_0 = arith.constant 0 : i32
    %c0_i32_1 = arith.constant 0 : i32
    %c0_i32_2 = arith.constant 0 : i32
    return %c0_i32, %c0_i32_0, %c0_i32_1 : i32, i32, i32
  }
  func.func @transform_1(%arg0: i32) -> (i32, i32, i32) {
    %c0_i32 = arith.constant 0 : i32
    %c0_i32_0 = arith.constant 0 : i32
    %c0_i32_1 = arith.constant 0 : i32
    %c0_i32_2 = arith.constant 0 : i32
    return %c0_i32, %c0_i32_0, %c0_i32_1 : i32, i32, i32
  }
  func.func @transform_2(%arg0: i32) -> (i32, i32, i32, i32) {
    %c0_i32 = arith.constant 0 : i32
    %c0_i32_0 = arith.constant 0 : i32
    %c0_i32_1 = arith.constant 0 : i32
    %c0_i32_2 = arith.constant 0 : i32
    %c0_i32_3 = arith.constant 0 : i32
    return %c0_i32, %c0_i32_0, %c0_i32_1, %c0_i32_2 : i32, i32, i32, i32
  }
  func.func @transform_3(%arg0: i32) -> (i32, i32) {
    %c0_i32 = arith.constant 0 : i32
    %c0_i32_0 = arith.constant 0 : i32
    %c0_i32_1 = arith.constant 0 : i32
    return %c0_i32, %c0_i32_0 : i32, i32
  }
  func.func @transform_4(%arg0: i32) -> (i32, i32) {
    %c0_i32 = arith.constant 0 : i32
    %c0_i32_0 = arith.constant 0 : i32
    %c0_i32_1 = arith.constant 0 : i32
    return %c0_i32, %c0_i32_0 : i32, i32
  }
  func.func @transform_5(%arg0: i32) -> (i32, i32, i32) {
    %c0_i32 = arith.constant 0 : i32
    %c0_i32_0 = arith.constant 0 : i32
    %c0_i32_1 = arith.constant 0 : i32
    %c0_i32_2 = arith.constant 0 : i32
    return %c0_i32, %c0_i32_0, %c0_i32_1 : i32, i32, i32
  }
  func.func @transform_6(%arg0: i32) -> (i32, i32, i32) {
    %c0_i32 = arith.constant 0 : i32
    %c0_i32_0 = arith.constant 0 : i32
    %c0_i32_1 = arith.constant 0 : i32
    %c0_i32_2 = arith.constant 0 : i32
    return %c0_i32, %c0_i32_0, %c0_i32_1 : i32, i32, i32
  }
}

</mosaic_0001>

<bundles_post_ra>
// kernel: joint_classifier_forward.1
= control target key start
LH: loop header
LB: loop body
LE: loop exit
PB: predicated region body
PF: predicated region fallthrough
CT: control target
= control target key end

     0   :  { %vm57_vm0 = vcmask 392192   ;;  %v6426_v3 = vmov 0.0|0.0   ;;  %vm6427_vm1 = vmmov 0   ;;  %v8345_v4 = vmov 0.0   ;;  %s6429_s22 = smov 64   ;;  %s6430_s23 = smov 32   ;;  %s8338_s3 = inlined_call_operand.vmem [shape: f32[208,128], index: 3, kind: input, shape index: {}]   ;;  %s8339_s0 = inlined_call_operand.vmem [shape: f32[2,8,48], index: 0, kind: input, shape index: {}]   ;;  %s8340_s1 = inlined_call_operand.vmem [shape: f32[2,8,32], index: 1, kind: input, shape index: {}]   ;;  %s8341_s4 = inlined_call_operand.vmem [shape: f32[304,192], index: 4, kind: input, shape index: {}]   ;;  %s8342_s2 = inlined_call_operand.vmem [shape: f32[2,8,8,1], index: 2, kind: input, shape index: {}]   ;;  %s8343_s5 = inlined_call_operand.vmem [shape: f32[2,8,128], index: 5, kind: output, shape index: {0}]   ;;  %s8344_s6 = inlined_call_operand.vmem [shape: f32[2,64,128], index: 6, kind: output, shape index: {1}]  }
   0x1   :  { %v40_v0 = vld [vmem:[%s8338_s3] sm:$0xff]  ;;  %v41_v1 = vld [vmem:[%s8338_s3 + $0x8] sm:$0xff]  ;;  %v42_v2 = vld [vmem:[%s8338_s3 + $0x10] sm:$0xff]  ;;  %5758 = vmatprep.subr.bf16.mxu1 %v6426_v3  ;;  %5509 = vmatprep.mubr.msk.f32.mxu1 %vm6427_vm1, %v8345_v4  ;;  %s6431_s24 = smov 96   ;;  %vm298_vm2 = vcmask 1041409   ;;  %vm139_vm3 = vcmask 261120  }
   0x2   :  { %v5740_v5 = vpack.c.bf16 %v41_v1, %v40_v0  ;;  %v43_v6 = vld [vmem:[%s8338_s3 + $0x18] sm:$0xff]  ;;  %v44_v7 = vld [vmem:[%s8338_s3 + $0x20] sm:$0xff]  ;;  %v45_v9 = vld [vmem:[%s8338_s3 + $0x28] sm:$0xff] }
   0x3   :  { %v5744_v8 = vpack.c.bf16 %v43_v6, %v42_v2  ;;  %v51_v10 = vld [vmem:[%s8339_s0] sm:$0xff]  ;;  %v47_v11 = vld [vmem:[%s8338_s3 + $0x38] sm:$0xff]  ;;  %v5748_v14 = vpack.c.bf16 %v45_v9, %v44_v7  ;;  %v49_v15 = vld [vmem:[%s8338_s3 + $0x48] sm:$0xff] }
   0x4   :  { %5741 = vmatprep.subr.bf16.mxu0 %v5740_v5  ;;  %5487 = vmatprep.mubr.msk.f32.mxu0 %vm57_vm0, %v51_v10  ;;  %v48_v12 = vld [vmem:[%s8338_s3 + $0x40] sm:$0xff]  ;;  %v50_v16 = vld [vmem:[%s8338_s3 + $0x50] sm:$0xff]  ;;  %v52_v18 = vld [vmem:[%s8339_s0 + $0x8] sm:$0xff] }
   0x5   :  { %5743 = vmatpush3.bf16.msra.mxu0 %v5740_v5  ;;  %v6500_v13 = vpack.c.bf16 %v48_v12, %v47_v11  ;;  %v6510_v17 = vpack.c.bf16 %v50_v16, %v49_v15  ;;  %v5178_v21 = vld [vmem:[%s8338_s3 + $0x30] ss:$0 sm:$0xff]  ;;  %v6554_v55 = vld [vmem:[%s8340_s1 + $0x8] sm:$0xff]  ;;  %v6562_v57 = vld [vmem:[%s8340_s1] sm:$0xff] }
   0x6   :  { %5745 = vmatprep.subr.bf16.mxu0 %v5744_v8  ;;  %v6557_v56 = vsub.f32 1.0, %v6554_v55  ;;  %v6566_v59 = vsub.f32 1.0, %v6562_v57 }
   0x7   :  { %5760 = vmatpush3.bf16.msra.mxu1 %v6500_v13 }
   0x8   :  { %5761 = vmatprep.subr.bf16.mxu1 %v6426_v3  ;;  %v280_v58 = vmul.f32 0.0, %v6557_v56  ;;  %v279_v63 = vmul.f32 0.0, %v6566_v59 }
   0x9   :  { %5747 = vmatpush3.bf16.msra.mxu0 %v5744_v8 }
   0xa   :  { %5749 = vmatprep.subr.bf16.mxu0 %v5748_v14 }
   0xb   :  { %5763 = vmatpush3.bf16.msra.mxu1 %v6510_v17 }
   0xc   :  { %5770 = vmatprep.subr.bf16.mxu1 %v6426_v3 }
   0xd   :  { %5751 = vmatpush3.bf16.msra.mxu0 %v5748_v14 }
   0xe   :  { %5752 = vmatprep.subr.bf16.mxu0 %v6426_v3 }
  0x10   :  { %5488 = vmatmul.mubr.msk.f32.vlgmr.msra.gmra.mrb[0].mxu0 %vm57_vm0, %v52_v18 }
  0x11   :  { %5754 = vmatpush3.bf16.msra.mxu0 %v6500_v13  ;;  %5498 = vmatprep.mubr.msk.f32.mxu0 %vm6427_vm1, %v8345_v4 }
  0x12   :  { %5755 = vmatprep.subr.bf16.mxu0 %v6426_v3 }
  0x15   :  { %5757 = vmatpush3.bf16.msra.mxu0 %v6510_v17 }
  0x16   :  { %5764 = vmatprep.subr.bf16.mxu0 %v6426_v3 }
  0x18   :  { %5499 = vmatmul.mubr.f32.vlgmr.msra.gmra.mrb[2].mxu0 %v8345_v4 }
  0x19   :  { %5766 = vmatpush3.bf16.msra.mxu0 %v6500_v13  ;;  %5520 = vmatprep.mubr.msk.f32.mxu0 %vm6427_vm1, %v8345_v4 }
  0x1a   :  { %5767 = vmatprep.subr.bf16.mxu0 %v6426_v3 }
  0x1d   :  { %5769 = vmatpush3.bf16.msra.mxu0 %v6510_v17 }
  0x1e   :  { %5776 = vmatprep.subr.bf16.mxu0 %v6426_v3 }
  0xe3   :  { %v5489_v19 = vpop.f32.mrb[0].mxu0 }
  0xe4   :  { %v130_v20 = vpop.f32.mrb[1].mxu0  ;;  %v6535_v23 = vadd.f32 %v5489_v19, %v5178_v21 }
  0xe5   :  { %v6538_v27 = vadd.f32 %v5178_v21, %v130_v20 }
  0xeb   :  { %v209_v22 = vpop.f32.mrb[2].mxu0 }
  0xec   :  { %v214_v24 = vrot.slane %v209_v22, 1  ;;  %v5500_v25 = vpop.f32.mrb[3].mxu0  ;;  %v217_v28 = vadd.f32 %v209_v22, %v6538_v27 }
  0xee   :  { %v218_v26 = vadd.f32 %v214_v24, %v6535_v23  ;;  %v5181_v32 = vmul.f32 -1.442695, %v217_v28 }
  0xf0   :  { %6026 = vtanh.f32 %v218_v26  ;;  %v5182_v31 = vmul.f32 -1.442695, %v218_v26 }
  0xf1   :  { %6028 = vtanh.f32 %v217_v28 }
  0xf2   :  { %6030 = vpow2.f32 %v5182_v31 }
  0xf3   :  { %6032 = vpow2.f32 %v5181_v32 }
  0xfa   :  { %v6027_v29 = vpop.eup %6026 }
  0xfb   :  { %239 = vrot.lane.b32.xlu0 %v6027_v29, %s6429_s22  ;;  %v6029_v30 = vpop.eup %6028 }
  0xfc   :  { %v6031_v33 = vpop.eup %6030 }
  0xfd   :  { %v226_v34 = vadd.f32 1.0, %v6031_v33  ;;  %v6033_v35 = vpop.eup %6032 }
  0xfe   :  { %v225_v36 = vadd.f32 1.0, %v6033_v35 }
  0xff   :  { %237 = vrot.lane.b32.xlu0 %v6029_v30, %s6429_s22  ;;  %6034 = vrcp.f32 %v226_v34 }
 0x100   :  { %6036 = vrcp.f32 %v225_v36 }
 0x109   :  { %v6035_v37 = vpop.eup %6034 }
 0x10a   :  { %v6037_v40 = vpop.eup %6036  ;;  %v234_v43 = vmul.f32 0.0, %v6035_v37 }
 0x10b   :  { %v233_v46 = vmul.f32 0.0, %v6037_v40 }
 0x16d   :  { %v240_v38 = vpop.permute.xlu0 %239 }
 0x16e   :  { %v244_v39 = vmul.f32 %v6035_v37, %v240_v38 }
 0x170   :  { %249 = vrot.lane.b32.xlu1 %v244_v39, %s6430_s23 }
 0x171   :  { %v238_v41 = vpop.permute.xlu0 %237 }
 0x172   :  { %v243_v42 = vmul.f32 %v6037_v40, %v238_v41 }
 0x174   :  { %247 = vrot.lane.b32.xlu1 %v243_v42, %s6430_s23 }
 0x1e2   :  { %v250_v44 = vpop.permute.xlu1 %249 }
 0x1e3   :  { %v254_v45 = vadd.f32 %v250_v44, %v234_v43 }
 0x1e5   :  { %6038 = vtanh.f32 %v254_v45 }
 0x1e6   :  { %v248_v47 = vpop.permute.xlu1 %247 }
 0x1e7   :  { %v253_v48 = vadd.f32 %v248_v47, %v233_v46 }
 0x1e9   :  { %6040 = vtanh.f32 %v253_v48 }
 0x1ef   :  { %v6039_v49 = vpop.eup %6038 }
 0x1f0   :  { %261 = vrot.lane.b32.xlu0 %v6039_v49, %s6429_s22 }
 0x1f3   :  { %v6041_v50 = vpop.eup %6040 }
 0x1f4   :  { %259 = vrot.lane.b32.xlu1 %v6041_v50, %s6429_s22 }
 0x262   :  { %v262_v51 = vpop.permute.xlu0 %261 }
 0x263   :  { %v266_v52 = vmul.f32 %v6035_v37, %v262_v51 }
 0x265   :  { %271 = vrot.lane.b32.xlu0 %v266_v52, %s6430_s23 }
 0x266   :  { %v260_v53 = vpop.permute.xlu1 %259 }
 0x267   :  { %v265_v54 = vmul.f32 %v6037_v40, %v260_v53 }
 0x269   :  { %285 = vrot.lane.b32.xlu0 %v253_v48, %s6431_s24  ;;  %269 = vrot.lane.b32.xlu1 %v265_v54, %s6430_s23 }
 0x26d   :  { %287 = vrot.lane.b32.xlu1 %v254_v45, %s6431_s24 }
 0x2d7   :  { %v272_v60 = vpop.permute.xlu0 %271 }
 0x2d8   :  { %v276_v61 = vmul.f32 %v272_v60, %v6554_v55 }
 0x2da   :  { %v6569_v62 = vadd.f32 %v280_v58, %v276_v61  ;;  %v1509_v1 = vrot.slane %v276_v61, 7 }
 0x2db   :  { %v270_v0 = vpop.permute.xlu1 %269  ;;  %v286_v16 = vpop.permute.xlu0 %285 }
 0x2dc   :  { %v275_v2 = vmul.f32 %v270_v0, %v6562_v57  ;;  %v297_v5 = vrot.slane %v6569_v62, 7  ;;  %v291_v19 = vmul.f32 %v286_v16, %v6562_v57 }
 0x2de   :  { %v6574_v6 = vadd.f32 %v279_v63, %v275_v2  ;;  %v6577_v7 = vsel %vm298_vm2, %v1509_v1, %v275_v2  ;;  %v6597_v22 = vadd.f32 %v291_v19, %v279_v63  ;;  %v450_v1 = vmul.f32 %v297_v5, %v6557_v56 }
 0x2df   :  { %v288_v15 = vpop.permute.xlu1 %287 }
 0x2e0   :  { %v299_v8 = vsel %vm298_vm2, %v297_v5, %v6574_v6  ;;  %v292_v18 = vmul.f32 %v288_v15, %v6554_v55  ;;  %v394_v26 = vrot.slane %v6597_v22, 7  ;;  %v446_v54 = vrot.slane %v6574_v6, 7 }
 0x2e1   :  { %5510 = vmatmul.mubr.msk.f32.vlgmr.msra.gmra.mrb[0].mxu1 %vm139_vm3, %v299_v8 }
 0x2e2   :  { %5772 = vmatpush3.bf16.msra.mxu1 %v6500_v13  ;;  %5531 = vmatprep.mubr.msk.f32.mxu1 %vm6427_vm1, %v8345_v4  ;;  %v6594_v20 = vadd.f32 %v292_v18, %v280_v58  ;;  %v449_v63 = vmul.f32 %v446_v54, %v6566_v59 }
 0x2e3   :  { %5773 = vmatprep.subr.bf16.mxu1 %v6426_v3 }
 0x2e4   :  { %v395_v25 = vrot.slane %v6594_v20, 7 }
 0x2e6   :  { %5775 = vmatpush3.bf16.msra.mxu1 %v6510_v17 }
 0x2e7   :  { %5782 = vmatprep.subr.bf16.mxu1 %v6426_v3 }
 0x3b4   :  { %v368_v9 = vpop.f32.mrb[0].mxu1 }
 0x3b5   :  { %v373_v10 = vrot.slane %v368_v9, 7  ;;  %v377_v11 = vadd.f32 %v368_v9, %v6535_v23  ;;  %v5511_v12 = vpop.f32.mrb[1].mxu1 }
 0x3b7   :  { %v376_v14 = vadd.f32 %v373_v10, %v6538_v27  ;;  %6042 = vtanh.f32 %v377_v11  ;;  %v5185_v28 = vmul.f32 -1.442695, %v377_v11 }
 0x3b9   :  { %6044 = vtanh.f32 %v376_v14  ;;  %v5184_v29 = vmul.f32 -1.442695, %v376_v14 }
 0x3ba   :  { %6046 = vpow2.f32 %v5185_v28  ;;  %v465_v28 = vmul.f32 %v394_v26, %v6566_v59 }
 0x3bb   :  { %6048 = vpow2.f32 %v5184_v29  ;;  %v466_v29 = vmul.f32 %v395_v25, %v6557_v56 }
 0x3c1   :  { %v6043_v21 = vpop.eup %6042 }
 0x3c2   :  { %408 = vrot.lane.b32.xlu1 %v6043_v21, %s6429_s22 }
 0x3c3   :  { %v6045_v24 = vpop.eup %6044 }
 0x3c4   :  { %406 = vrot.lane.b32.xlu0 %v6045_v24, %s6429_s22  ;;  %v6047_v30 = vpop.eup %6046 }
 0x3c5   :  { %v6049_v31 = vpop.eup %6048  ;;  %v385_v32 = vadd.f32 1.0, %v6047_v30 }
 0x3c6   :  { %398 = vrot.lane.b32.xlu1 %v395_v25, %s6430_s23  ;;  %v384_v33 = vadd.f32 1.0, %v6049_v31 }
 0x3c7   :  { %6050 = vrcp.f32 %v385_v32 }
 0x3c8   :  { %396 = vrot.lane.b32.xlu0 %v394_v26, %s6430_s23  ;;  %6052 = vrcp.f32 %v384_v33 }
 0x3d1   :  { %v6051_v34 = vpop.eup %6050 }
 0x3d2   :  { %v6053_v37 = vpop.eup %6052 }
 0x434   :  { %v409_v35 = vpop.permute.xlu1 %408 }
 0x435   :  { %v413_v36 = vmul.f32 %v6051_v34, %v409_v35 }
 0x436   :  { %v407_v38 = vpop.permute.xlu0 %406 }
 0x437   :  { %418 = vrot.lane.b32.xlu1 %v413_v36, %s6430_s23  ;;  %v412_v39 = vmul.f32 %v6053_v37, %v407_v38 }
 0x438   :  { %v399_v40 = vpop.permute.xlu1 %398 }
 0x439   :  { %416 = vrot.lane.b32.xlu0 %v412_v39, %s6430_s23  ;;  %v403_v41 = vmul.f32 %v6051_v34, %v399_v40 }
 0x43a   :  { %v397_v42 = vpop.permute.xlu0 %396 }
 0x43b   :  { %v402_v45 = vmul.f32 %v6053_v37, %v397_v42 }
 0x4a9   :  { %v419_v43 = vpop.permute.xlu1 %418 }
 0x4aa   :  { %v423_v44 = vadd.f32 %v419_v43, %v403_v41 }
 0x4ab   :  { %v417_v46 = vpop.permute.xlu0 %416 }
 0x4ac   :  { %6054 = vtanh.f32 %v423_v44  ;;  %v422_v47 = vadd.f32 %v417_v46, %v402_v45 }
 0x4ae   :  { %6056 = vtanh.f32 %v422_v47 }
 0x4b6   :  { %v6055_v48 = vpop.eup %6054 }
 0x4b7   :  { %430 = vrot.lane.b32.xlu1 %v6055_v48, %s6429_s22 }
 0x4b8   :  { %v6057_v49 = vpop.eup %6056 }
 0x4b9   :  { %428 = vrot.lane.b32.xlu0 %v6057_v49, %s6429_s22 }
 0x529   :  { %v431_v50 = vpop.permute.xlu1 %430 }
 0x52a   :  { %v435_v51 = vmul.f32 %v6051_v34, %v431_v50 }
 0x52b   :  { %v429_v52 = vpop.permute.xlu0 %428 }
 0x52c   :  { %440 = vrot.lane.b32.xlu1 %v435_v51, %s6430_s23  ;;  %v434_v53 = vmul.f32 %v6053_v37, %v429_v52 }
 0x52e   :  { %438 = vrot.lane.b32.xlu0 %v434_v53, %s6430_s23 }
 0x530   :  { %457 = vrot.lane.b32.xlu1 %v423_v44, %s6431_s24 }
 0x532   :  { %455 = vrot.lane.b32.xlu0 %v422_v47, %s6431_s24 }
 0x59e   :  { %v441_v58 = vpop.permute.xlu1 %440 }
 0x59f   :  { %v445_v61 = vmul.f32 %v441_v58, %v6554_v55 }
 0x5a0   :  { %v439_v60 = vpop.permute.xlu0 %438 }
 0x5a1   :  { %v444_v0 = vmul.f32 %v439_v60, %v6562_v57  ;;  %v6625_v9 = vadd.f32 %v450_v1, %v445_v61 }
 0x5a2   :  { %v458_v19 = vpop.permute.xlu1 %457 }
 0x5a3   :  { %v6623_v2 = vadd.f32 %v449_v63, %v444_v0  ;;  %v1559_v8 = vrot.slane %v444_v0, 1  ;;  %v462_v24 = vmul.f32 %v458_v19, %v6554_v55  ;;  %v621_v0 = vrot.slane %v6625_v9, 7 }
 0x5a4   :  { %v456_v18 = vpop.permute.xlu0 %455 }
 0x5a5   :  { %v471_v10 = vrot.slane %v6623_v2, 1  ;;  %v6629_v6 = vsel %vm298_vm2, %v445_v61, %v1559_v8  ;;  %v461_v21 = vmul.f32 %v456_v18, %v6562_v57  ;;  %v6652_v32 = vadd.f32 %v466_v29, %v462_v24 }
 0x5a6   :  { %v620_v63 = vrot.slane %v6623_v2, 7 }
 0x5a7   :  { %v472_v11 = vsel %vm298_vm2, %v6625_v9, %v471_v10  ;;  %v6650_v30 = vadd.f32 %v465_v28, %v461_v21  ;;  %v569_v35 = vrot.slane %v6652_v32, 7 }
 0x5a8   :  { %5521 = vmatmul.mubr.msk.f32.vlgmr.msra.gmra.mrb[4].mxu0 %vm139_vm3, %v472_v11  ;;  %v624_v8 = vmul.f32 %v620_v63, %v6566_v59 }
 0x5a9   :  { %5778 = vmatpush3.bf16.msra.mxu0 %v6500_v13  ;;  %5542 = vmatprep.mubr.msk.f32.mxu0 %vm6427_vm1, %v8345_v4  ;;  %v568_v34 = vrot.slane %v6650_v30, 7 }
 0x5aa   :  { %5779 = vmatprep.subr.bf16.mxu0 %v6426_v3 }
 0x5ad   :  { %5781 = vmatpush3.bf16.msra.mxu0 %v6510_v17 }
 0x5ae   :  { %5788 = vmatprep.subr.bf16.mxu0 %v6426_v3 }
 0x67b   :  { %v541_v62 = vpop.f32.mrb[4].mxu0 }
 0x67c   :  { %v546_v5 = vrot.slane %v541_v62, 6  ;;  %v547_v12 = vrot.slane %v541_v62, 7  ;;  %v5522_v14 = vpop.f32.mrb[5].mxu0  ;;  %v625_v62 = vmul.f32 %v621_v0, %v6557_v56 }
 0x67e   :  { %v550_v15 = vadd.f32 %v546_v5, %v6538_v27  ;;  %v551_v16 = vadd.f32 %v547_v12, %v6535_v23 }
 0x680   :  { %6058 = vtanh.f32 %v550_v15  ;;  %v5187_v20 = vmul.f32 -1.442695, %v550_v15  ;;  %v5188_v22 = vmul.f32 -1.442695, %v551_v16 }
 0x681   :  { %6060 = vtanh.f32 %v551_v16 }
 0x682   :  { %6062 = vpow2.f32 %v5187_v20 }
 0x683   :  { %6064 = vpow2.f32 %v5188_v22 }
 0x68a   :  { %v6059_v31 = vpop.eup %6058 }
 0x68b   :  { %v6061_v33 = vpop.eup %6060  ;;  %580 = vrot.lane.b32.xlu0 %v6059_v31, %s6429_s22 }
 0x68c   :  { %582 = vrot.lane.b32.xlu1 %v6061_v33, %s6429_s22  ;;  %v6063_v25 = vpop.eup %6062 }
 0x68d   :  { %v6065_v26 = vpop.eup %6064  ;;  %v558_v36 = vadd.f32 1.0, %v6063_v25 }
 0x68e   :  { %v559_v37 = vadd.f32 1.0, %v6065_v26 }
 0x68f   :  { %570 = vrot.lane.b32.xlu0 %v568_v34, %s6430_s23  ;;  %6066 = vrcp.f32 %v558_v36  ;;  %v640_v36 = vmul.f32 %v568_v34, %v6566_v59 }
 0x690   :  { %572 = vrot.lane.b32.xlu1 %v569_v35, %s6430_s23  ;;  %6068 = vrcp.f32 %v559_v37  ;;  %v641_v37 = vmul.f32 %v569_v35, %v6557_v56 }
 0x699   :  { %v6067_v38 = vpop.eup %6066 }
 0x69a   :  { %v6069_v40 = vpop.eup %6068 }
 0x6fd   :  { %v581_v39 = vpop.permute.xlu0 %580 }
 0x6fe   :  { %v586_v41 = vmul.f32 %v6067_v38, %v581_v39  ;;  %v583_v42 = vpop.permute.xlu1 %582 }
 0x6ff   :  { %v587_v43 = vmul.f32 %v6069_v40, %v583_v42 }
 0x700   :  { %590 = vrot.lane.b32.xlu0 %v586_v41, %s6430_s23 }
 0x701   :  { %592 = vrot.lane.b32.xlu1 %v587_v43, %s6430_s23  ;;  %v571_v44 = vpop.permute.xlu0 %570 }
 0x702   :  { %v573_v45 = vpop.permute.xlu1 %572  ;;  %v576_v46 = vmul.f32 %v6067_v38, %v571_v44 }
 0x703   :  { %v577_v47 = vmul.f32 %v6069_v40, %v573_v45 }
 0x772   :  { %v591_v48 = vpop.permute.xlu0 %590 }
 0x773   :  { %v596_v49 = vadd.f32 %v591_v48, %v576_v46  ;;  %v593_v50 = vpop.permute.xlu1 %592 }
 0x774   :  { %v597_v51 = vadd.f32 %v593_v50, %v577_v47 }
 0x775   :  { %6070 = vtanh.f32 %v596_v49 }
 0x776   :  { %6072 = vtanh.f32 %v597_v51 }
 0x77f   :  { %v6071_v52 = vpop.eup %6070 }
 0x780   :  { %v6073_v53 = vpop.eup %6072  ;;  %602 = vrot.lane.b32.xlu0 %v6071_v52, %s6429_s22 }
 0x781   :  { %604 = vrot.lane.b32.xlu1 %v6073_v53, %s6429_s22 }
 0x7f2   :  { %v603_v54 = vpop.permute.xlu0 %602 }
 0x7f3   :  { %v608_v58 = vmul.f32 %v6067_v38, %v603_v54  ;;  %v605_v60 = vpop.permute.xlu1 %604 }
 0x7f4   :  { %v609_v61 = vmul.f32 %v6069_v40, %v605_v60 }
 0x7f5   :  { %612 = vrot.lane.b32.xlu0 %v608_v58, %s6430_s23 }
 0x7f6   :  { %614 = vrot.lane.b32.xlu1 %v609_v61, %s6430_s23 }
 0x7f9   :  { %630 = vrot.lane.b32.xlu0 %v596_v49, %s6431_s24 }
 0x7fa   :  { %632 = vrot.lane.b32.xlu1 %v597_v51, %s6431_s24 }
 0x867   :  { %v613_v1 = vpop.permute.xlu0 %612 }
 0x868   :  { %v618_v10 = vmul.f32 %v613_v1, %v6562_v57  ;;  %v615_v11 = vpop.permute.xlu1 %614 }
 0x869   :  { %v619_v5 = vmul.f32 %v615_v11, %v6554_v55 }
 0x86a   :  { %v6678_v12 = vadd.f32 %v624_v8, %v618_v10  ;;  %v1609_v14 = vrot.slane %v618_v10, 2 }
 0x86b   :  { %v6680_v15 = vadd.f32 %v625_v62, %v619_v5  ;;  %v1610_v16 = vrot.slane %v619_v5, 1  ;;  %v631_v20 = vpop.permute.xlu0 %630 }
 0x86c   :  { %v646_v2 = vrot.slane %v6678_v12, 2  ;;  %v633_v22 = vpop.permute.xlu1 %632  ;;  %v636_v25 = vmul.f32 %v631_v20, %v6562_v57 }
 0x86d   :  { %v647_v9 = vrot.slane %v6680_v15, 1  ;;  %v6685_v18 = vsel %vm298_vm2, %v1610_v16, %v1609_v14  ;;  %v637_v26 = vmul.f32 %v633_v22, %v6554_v55  ;;  %v796_v14 = vrot.slane %v6678_v12, 7 }
 0x86e   :  { %v6705_v38 = vadd.f32 %v640_v36, %v636_v25  ;;  %v797_v16 = vrot.slane %v6680_v15, 7 }
 0x86f   :  { %v648_v19 = vsel %vm298_vm2, %v647_v9, %v646_v2  ;;  %v6707_v40 = vadd.f32 %v641_v37, %v637_v26  ;;  %v800_v9 = vmul.f32 %v796_v14, %v6566_v59 }
 0x870   :  { %5532 = vmatmul.mubr.msk.f32.vlgmr.msra.gmra.mrb[2].mxu1 %vm139_vm3, %v648_v19  ;;  %v744_v42 = vrot.slane %v6705_v38, 7 }
 0x871   :  { %5784 = vmatpush3.bf16.msra.mxu1 %v6500_v13  ;;  %5553 = vmatprep.mubr.msk.f32.mxu1 %vm6427_vm1, %v8345_v4  ;;  %v745_v43 = vrot.slane %v6707_v40, 7 }
 0x872   :  { %5785 = vmatprep.subr.bf16.mxu1 %v6426_v3 }
 0x875   :  { %5787 = vmatpush3.bf16.msra.mxu1 %v6510_v17 }
 0x876   :  { %5794 = vmatprep.subr.bf16.mxu1 %v6426_v3 }
 0x943   :  { %v717_v21 = vpop.f32.mrb[2].mxu1 }
 0x944   :  { %v722_v24 = vrot.slane %v717_v21, 5  ;;  %v723_v28 = vrot.slane %v717_v21, 6  ;;  %v5533_v29 = vpop.f32.mrb[3].mxu1 }
 0x946   :  { %v726_v31 = vadd.f32 %v722_v24, %v6538_v27  ;;  %v727_v33 = vadd.f32 %v723_v28, %v6535_v23  ;;  %v801_v24 = vmul.f32 %v797_v16, %v6557_v56 }
 0x948   :  { %6074 = vtanh.f32 %v726_v31  ;;  %v5190_v30 = vmul.f32 -1.442695, %v726_v31  ;;  %v5191_v32 = vmul.f32 -1.442695, %v727_v33 }
 0x949   :  { %6076 = vtanh.f32 %v727_v33 }
 0x94a   :  { %6078 = vpow2.f32 %v5190_v30 }
 0x94b   :  { %6080 = vpow2.f32 %v5191_v32 }
 0x952   :  { %v6075_v39 = vpop.eup %6074 }
 0x953   :  { %v6077_v41 = vpop.eup %6076  ;;  %756 = vrot.lane.b32.xlu0 %v6075_v39, %s6429_s22 }
 0x954   :  { %758 = vrot.lane.b32.xlu1 %v6077_v41, %s6429_s22  ;;  %v6079_v34 = vpop.eup %6078 }
 0x955   :  { %v6081_v35 = vpop.eup %6080  ;;  %v734_v44 = vadd.f32 1.0, %v6079_v34 }
 0x956   :  { %v735_v45 = vadd.f32 1.0, %v6081_v35 }
 0x957   :  { %746 = vrot.lane.b32.xlu0 %v744_v42, %s6430_s23  ;;  %6082 = vrcp.f32 %v734_v44 }
 0x958   :  { %748 = vrot.lane.b32.xlu1 %v745_v43, %s6430_s23  ;;  %6084 = vrcp.f32 %v735_v45  ;;  %v816_v45 = vmul.f32 %v744_v42, %v6566_v59 }
 0x961   :  { %v6083_v46 = vpop.eup %6082 }
 0x962   :  { %v6085_v48 = vpop.eup %6084 }
 0x9c5   :  { %v757_v47 = vpop.permute.xlu0 %756 }
 0x9c6   :  { %v762_v49 = vmul.f32 %v6083_v46, %v757_v47  ;;  %v759_v50 = vpop.permute.xlu1 %758 }
 0x9c7   :  { %v763_v51 = vmul.f32 %v6085_v48, %v759_v50 }
 0x9c8   :  { %766 = vrot.lane.b32.xlu0 %v762_v49, %s6430_s23 }
 0x9c9   :  { %768 = vrot.lane.b32.xlu1 %v763_v51, %s6430_s23  ;;  %v747_v52 = vpop.permute.xlu0 %746 }
 0x9ca   :  { %v749_v53 = vpop.permute.xlu1 %748  ;;  %v752_v54 = vmul.f32 %v6083_v46, %v747_v52 }
 0x9cb   :  { %v753_v58 = vmul.f32 %v6085_v48, %v749_v53 }
 0xa3a   :  { %v767_v60 = vpop.permute.xlu0 %766 }
 0xa3b   :  { %v772_v61 = vadd.f32 %v767_v60, %v752_v54  ;;  %v769_v63 = vpop.permute.xlu1 %768 }
 0xa3c   :  { %v773_v0 = vadd.f32 %v769_v63, %v753_v58 }
 0xa3d   :  { %6086 = vtanh.f32 %v772_v61 }
 0xa3e   :  { %6088 = vtanh.f32 %v773_v0 }
 0xa47   :  { %v6087_v1 = vpop.eup %6086 }
 0xa48   :  { %v6089_v8 = vpop.eup %6088  ;;  %778 = vrot.lane.b32.xlu0 %v6087_v1, %s6429_s22 }
 0xa49   :  { %780 = vrot.lane.b32.xlu1 %v6089_v8, %s6429_s22 }
 0xaba   :  { %v779_v10 = vpop.permute.xlu0 %778 }
 0xabb   :  { %v784_v11 = vmul.f32 %v6083_v46, %v779_v10  ;;  %v781_v62 = vpop.permute.xlu1 %780  ;;  %v817_v46 = vmul.f32 %v745_v43, %v6557_v56 }
 0xabc   :  { %v785_v5 = vmul.f32 %v6085_v48, %v781_v62 }
 0xabd   :  { %788 = vrot.lane.b32.xlu0 %v784_v11, %s6430_s23 }
 0xabe   :  { %790 = vrot.lane.b32.xlu1 %v785_v5, %s6430_s23 }
 0xac1   :  { %806 = vrot.lane.b32.xlu0 %v772_v61, %s6431_s24 }
 0xac2   :  { %808 = vrot.lane.b32.xlu1 %v773_v0, %s6431_s24 }
 0xb2f   :  { %v789_v2 = vpop.permute.xlu0 %788 }
 0xb30   :  { %v794_v19 = vmul.f32 %v789_v2, %v6562_v57  ;;  %v791_v21 = vpop.permute.xlu1 %790 }
 0xb31   :  { %v795_v28 = vmul.f32 %v791_v21, %v6554_v55 }
 0xb32   :  { %v6733_v29 = vadd.f32 %v800_v9, %v794_v19  ;;  %v1660_v31 = vrot.slane %v794_v19, 3 }
 0xb33   :  { %v6735_v33 = vadd.f32 %v801_v24, %v795_v28  ;;  %v1661_v20 = vrot.slane %v795_v28, 2  ;;  %v807_v32 = vpop.permute.xlu0 %806 }
 0xb34   :  { %v822_v12 = vrot.slane %v6733_v29, 3  ;;  %v809_v34 = vpop.permute.xlu1 %808  ;;  %v812_v35 = vmul.f32 %v807_v32, %v6562_v57 }
 0xb35   :  { %v823_v15 = vrot.slane %v6735_v33, 2  ;;  %v6740_v22 = vsel %vm298_vm2, %v1661_v20, %v1660_v31  ;;  %v813_v44 = vmul.f32 %v809_v34, %v6554_v55  ;;  %v1500_v20 = vlaneseq }
 0xb36   :  { %v6759_v47 = vadd.f32 %v816_v45, %v812_v35 }
 0xb37   :  { %v824_v25 = vsel %vm298_vm2, %v823_v15, %v822_v12  ;;  %v6761_v49 = vadd.f32 %v817_v46, %v813_v44  ;;  %v972_v12 = vrot.slane %v6733_v29, 7  ;;  %v973_v15 = vrot.slane %v6735_v33, 7 }
 0xb38   :  { %5543 = vmatmul.mubr.msk.f32.vlgmr.msra.gmra.mrb[6].mxu0 %vm139_vm3, %v824_v25  ;;  %v920_v51 = vrot.slane %v6759_v47, 7 }
 0xb39   :  { %5790 = vmatpush3.bf16.msra.mxu0 %v6500_v13  ;;  %5564 = vmatprep.mubr.msk.f32.mxu0 %vm6427_vm1, %v8345_v4  ;;  %v921_v52 = vrot.slane %v6761_v49, 7 }
 0xb3a   :  { %5791 = vmatprep.subr.bf16.mxu0 %v6426_v3 }
 0xb3d   :  { %5793 = vmatpush3.bf16.msra.mxu0 %v6510_v17 }
 0xc0b   :  { %v893_v26 = vpop.f32.mrb[6].mxu0 }
 0xc0c   :  { %v898_v36 = vrot.slane %v893_v26, 4  ;;  %v899_v37 = vrot.slane %v893_v26, 5  ;;  %v5544_v39 = vpop.f32.mrb[7].mxu0  ;;  %v6784_v26 = vand.u32 127, %v1500_v20 }
 0xc0e   :  { %v902_v41 = vadd.f32 %v898_v36, %v6538_v27  ;;  %v903_v30 = vadd.f32 %v899_v37, %v6535_v23  ;;  %8433 = vst [vmem:[#allocation2_spill] sm:$0xff] %v6784_v26  ;;  %v976_v36 = vmul.f32 %v972_v12, %v6566_v59  ;;  %vm1502_vm4 = vcmp.lt.s32.totalorder %v6784_v26, 16 }
 0xc10   :  { %6090 = vtanh.f32 %v902_v41  ;;  %v5193_v38 = vmul.f32 -1.442695, %v902_v41  ;;  %v5194_v40 = vmul.f32 -1.442695, %v903_v30  ;;  %v977_v41 = vmul.f32 %v973_v15, %v6557_v56 }
 0xc11   :  { %6092 = vtanh.f32 %v903_v30 }
 0xc12   :  { %6094 = vpow2.f32 %v5193_v38 }
 0xc13   :  { %6096 = vpow2.f32 %v5194_v40 }
 0xc1a   :  { %v6091_v48 = vpop.eup %6090 }
 0xc1b   :  { %v6093_v50 = vpop.eup %6092  ;;  %932 = vrot.lane.b32.xlu0 %v6091_v48, %s6429_s22 }
 0xc1c   :  { %934 = vrot.lane.b32.xlu1 %v6093_v50, %s6429_s22  ;;  %v6095_v42 = vpop.eup %6094 }
 0xc1d   :  { %v6097_v43 = vpop.eup %6096  ;;  %v910_v53 = vadd.f32 1.0, %v6095_v42 }
 0xc1e   :  { %v911_v54 = vadd.f32 1.0, %v6097_v43 }
 0xc1f   :  { %922 = vrot.lane.b32.xlu0 %v920_v51, %s6430_s23  ;;  %6098 = vrcp.f32 %v910_v53 }
 0xc20   :  { %924 = vrot.lane.b32.xlu1 %v921_v52, %s6430_s23  ;;  %6100 = vrcp.f32 %v911_v54 }
 0xc29   :  { %v6099_v58 = vpop.eup %6098 }
 0xc2a   :  { %v6101_v61 = vpop.eup %6100 }
 0xc8d   :  { %v933_v60 = vpop.permute.xlu0 %932 }
 0xc8e   :  { %v938_v63 = vmul.f32 %v6099_v58, %v933_v60  ;;  %v935_v0 = vpop.permute.xlu1 %934  ;;  %v993_v60 = vmul.f32 %v921_v52, %v6557_v56 }
 0xc8f   :  { %v939_v1 = vmul.f32 %v6101_v61, %v935_v0 }
 0xc90   :  { %942 = vrot.lane.b32.xlu0 %v938_v63, %s6430_s23 }
 0xc91   :  { %944 = vrot.lane.b32.xlu1 %v939_v1, %s6430_s23  ;;  %v923_v8 = vpop.permute.xlu0 %922 }
 0xc92   :  { %v925_v10 = vpop.permute.xlu1 %924  ;;  %v928_v11 = vmul.f32 %v6099_v58, %v923_v8 }
 0xc93   :  { %v929_v62 = vmul.f32 %v6101_v61, %v925_v10 }
 0xd02   :  { %v943_v5 = vpop.permute.xlu0 %942 }
 0xd03   :  { %v948_v14 = vadd.f32 %v943_v5, %v928_v11  ;;  %v945_v16 = vpop.permute.xlu1 %944 }
 0xd04   :  { %v949_v2 = vadd.f32 %v945_v16, %v929_v62 }
 0xd05   :  { %6102 = vtanh.f32 %v948_v14 }
 0xd06   :  { %6104 = vtanh.f32 %v949_v2 }
 0xd0f   :  { %v6103_v9 = vpop.eup %6102 }
 0xd10   :  { %v6105_v19 = vpop.eup %6104  ;;  %954 = vrot.lane.b32.xlu0 %v6103_v9, %s6429_s22 }
 0xd11   :  { %956 = vrot.lane.b32.xlu1 %v6105_v19, %s6429_s22 }
 0xd82   :  { %v955_v21 = vpop.permute.xlu0 %954 }
 0xd83   :  { %v960_v24 = vmul.f32 %v6099_v58, %v955_v21  ;;  %v957_v28 = vpop.permute.xlu1 %956 }
 0xd84   :  { %v961_v31 = vmul.f32 %v6101_v61, %v957_v28 }
 0xd85   :  { %964 = vrot.lane.b32.xlu0 %v960_v24, %s6430_s23 }
 0xd86   :  { %966 = vrot.lane.b32.xlu1 %v961_v31, %s6430_s23 }
 0xd89   :  { %982 = vrot.lane.b32.xlu0 %v948_v14, %s6431_s24 }
 0xd8a   :  { %984 = vrot.lane.b32.xlu1 %v949_v2, %s6431_s24 }
 0xdf7   :  { %v965_v25 = vpop.permute.xlu0 %964 }
 0xdf8   :  { %v970_v37 = vmul.f32 %v965_v25, %v6562_v57  ;;  %v967_v39 = vpop.permute.xlu1 %966 }
 0xdf9   :  { %v971_v30 = vmul.f32 %v967_v39, %v6554_v55 }
 0xdfa   :  { %v6790_v32 = vadd.f32 %v976_v36, %v970_v37  ;;  %v1666_v34 = vrot.slane %v970_v37, 4 }
 0xdfb   :  { %v6793_v29 = vadd.f32 %v977_v41, %v971_v30  ;;  %v1667_v33 = vrot.slane %v971_v30, 3  ;;  %v983_v54 = vpop.permute.xlu0 %982 }
 0xdfc   :  { %v998_v35 = vrot.slane %v6790_v32, 4  ;;  %v985_v58 = vpop.permute.xlu1 %984 }
 0xdfd   :  { %v999_v44 = vrot.slane %v6793_v29, 3  ;;  %v1668_v45 = vsel %vm298_vm2, %v1667_v33, %v1666_v34 }
 0xdfe   :  { %v6801_v46 = vsel %vm1502_vm4, %v6740_v22, %v1668_v45  ;;  %v6806_v48 = vsel %vm1502_vm4, %v1668_v45, %v6740_v22 }
 0xdff   :  { %v1000_v50 = vsel %vm298_vm2, %v999_v44, %v998_v35  ;;  %v1148_v35 = vrot.slane %v6790_v32, 7  ;;  %v1149_v44 = vrot.slane %v6793_v29, 7 }
 0xe00   :  { %5554 = vmatmul.mubr.msk.f32.vlgmr.msra.gmra.mrb[4].mxu1 %vm139_vm3, %v1000_v50 }
 0xe01   :  { %5796 = vmatpush3.bf16.msra.mxu1 %v6500_v13  ;;  %5575 = vmatprep.mubr.msk.f32.mxu1 %vm6427_vm1, %v8345_v4  ;;  %v988_v13 = vmul.f32 %v983_v54, %v6562_v57  ;;  %v1152_v50 = vmul.f32 %v1148_v35, %v6566_v59 }
 0xe02   :  { %5797 = vmatprep.subr.bf16.mxu1 %v6426_v3  ;;  %v989_v3 = vmul.f32 %v985_v58, %v6554_v55 }
 0xe04   :  { %v6827_v0 = vadd.f32 %v993_v60, %v989_v3 }
 0xe05   :  { %5799 = vmatpush3.bf16.msra.mxu1 %v6510_v17  ;;  %v992_v17 = vmul.f32 %v920_v51, %v6566_v59 }
 0xe06   :  { %v1097_v10 = vrot.slane %v6827_v0, 7 }
 0xe07   :  { %v6825_v61 = vadd.f32 %v992_v17, %v988_v13 }
 0xe09   :  { %v1096_v8 = vrot.slane %v6825_v61, 7 }
 0xed3   :  { %v1069_v38 = vpop.f32.mrb[4].mxu1 }
 0xed4   :  { %v1074_v40 = vrot.slane %v1069_v38, 3  ;;  %v1075_v42 = vrot.slane %v1069_v38, 4  ;;  %v5555_v43 = vpop.f32.mrb[5].mxu1 }
 0xed6   :  { %v1078_v22 = vadd.f32 %v1074_v40, %v6538_v27  ;;  %v1079_v53 = vadd.f32 %v1075_v42, %v6535_v23  ;;  %v1153_v42 = vmul.f32 %v1149_v44, %v6557_v56 }
 0xed8   :  { %6106 = vtanh.f32 %v1078_v22  ;;  %v5196_v47 = vmul.f32 -1.442695, %v1078_v22  ;;  %v5197_v49 = vmul.f32 -1.442695, %v1079_v53 }
 0xed9   :  { %6108 = vtanh.f32 %v1079_v53 }
 0xeda   :  { %6110 = vpow2.f32 %v5196_v47 }
 0xedb   :  { %6112 = vpow2.f32 %v5197_v49 }
 0xee2   :  { %v6107_v63 = vpop.eup %6106 }
 0xee3   :  { %v6109_v1 = vpop.eup %6108  ;;  %1108 = vrot.lane.b32.xlu0 %v6107_v63, %s6429_s22 }
 0xee4   :  { %1110 = vrot.lane.b32.xlu1 %v6109_v1, %s6429_s22  ;;  %v6111_v51 = vpop.eup %6110 }
 0xee5   :  { %v6113_v52 = vpop.eup %6112  ;;  %v1086_v11 = vadd.f32 1.0, %v6111_v51 }
 0xee6   :  { %v1087_v62 = vadd.f32 1.0, %v6113_v52 }
 0xee7   :  { %1098 = vrot.lane.b32.xlu0 %v1096_v8, %s6430_s23  ;;  %6114 = vrcp.f32 %v1086_v11 }
 0xee8   :  { %1100 = vrot.lane.b32.xlu1 %v1097_v10, %s6430_s23  ;;  %6116 = vrcp.f32 %v1087_v62 }
 0xef1   :  { %v6115_v5 = vpop.eup %6114 }
 0xef2   :  { %v6117_v16 = vpop.eup %6116 }
 0xf55   :  { %v1109_v14 = vpop.permute.xlu0 %1108 }
 0xf56   :  { %v1114_v2 = vmul.f32 %v6115_v5, %v1109_v14  ;;  %v1111_v9 = vpop.permute.xlu1 %1110  ;;  %v1168_v14 = vmul.f32 %v1096_v8, %v6566_v59 }
 0xf57   :  { %v1115_v19 = vmul.f32 %v6117_v16, %v1111_v9 }
 0xf58   :  { %1118 = vrot.lane.b32.xlu0 %v1114_v2, %s6430_s23 }
 0xf59   :  { %1120 = vrot.lane.b32.xlu1 %v1115_v19, %s6430_s23  ;;  %v1099_v21 = vpop.permute.xlu0 %1098 }
 0xf5a   :  { %v1101_v24 = vpop.permute.xlu1 %1100  ;;  %v1104_v28 = vmul.f32 %v6115_v5, %v1099_v21 }
 0xf5b   :  { %v1105_v31 = vmul.f32 %v6117_v16, %v1101_v24 }
 0xfca   :  { %v1119_v12 = vpop.permute.xlu0 %1118 }
 0xfcb   :  { %v1124_v15 = vadd.f32 %v1119_v12, %v1104_v28  ;;  %v1121_v25 = vpop.permute.xlu1 %1120 }
 0xfcc   :  { %v1125_v36 = vadd.f32 %v1121_v25, %v1105_v31 }
 0xfcd   :  { %6118 = vtanh.f32 %v1124_v15 }
 0xfce   :  { %6120 = vtanh.f32 %v1125_v36 }
 0xfd7   :  { %v6119_v37 = vpop.eup %6118 }
 0xfd8   :  { %v6121_v39 = vpop.eup %6120  ;;  %1130 = vrot.lane.b32.xlu0 %v6119_v37, %s6429_s22 }
 0xfd9   :  { %1132 = vrot.lane.b32.xlu1 %v6121_v39, %s6429_s22 }
0x104a   :  { %v1131_v41 = vpop.permute.xlu0 %1130 }
0x104b   :  { %v1136_v30 = vmul.f32 %v6115_v5, %v1131_v41  ;;  %v1133_v34 = vpop.permute.xlu1 %1132 }
0x104c   :  { %v1137_v33 = vmul.f32 %v6117_v16, %v1133_v34  ;;  %v1169_v16 = vmul.f32 %v1097_v10, %v6557_v56 }
0x104d   :  { %1140 = vrot.lane.b32.xlu0 %v1136_v30, %s6430_s23 }
0x104e   :  { %1142 = vrot.lane.b32.xlu1 %v1137_v33, %s6430_s23 }
0x1051   :  { %1158 = vrot.lane.b32.xlu0 %v1124_v15, %s6431_s24 }
0x1052   :  { %1160 = vrot.lane.b32.xlu1 %v1125_v36, %s6431_s24 }
0x10bf   :  { %v1141_v45 = vpop.permute.xlu0 %1140 }
0x10c0   :  { %v1146_v38 = vmul.f32 %v1141_v45, %v6562_v57  ;;  %v1143_v40 = vpop.permute.xlu1 %1142 }
0x10c1   :  { %v1147_v43 = vmul.f32 %v1143_v40, %v6554_v55 }
0x10c2   :  { %v6853_v22 = vadd.f32 %v1152_v50, %v1146_v38  ;;  %v1615_v53 = vrot.slane %v1146_v38, 5 }
0x10c3   :  { %v6855_v54 = vadd.f32 %v1153_v42, %v1147_v43  ;;  %v1616_v58 = vrot.slane %v1147_v43, 4  ;;  %v1159_v11 = vpop.permute.xlu0 %1158 }
0x10c4   :  { %v1174_v32 = vrot.slane %v6853_v22, 5  ;;  %v1161_v62 = vpop.permute.xlu1 %1160  ;;  %v1164_v5 = vmul.f32 %v1159_v11, %v6562_v57 }
0x10c5   :  { %v1175_v29 = vrot.slane %v6855_v54, 4  ;;  %v1617_v13 = vsel %vm298_vm2, %v1616_v58, %v1615_v53  ;;  %v1324_v58 = vrot.slane %v6853_v22, 7 }
0x10c6   :  { %v6863_v3 = vsel %vm1502_vm4, %v6685_v18, %v1617_v13  ;;  %v6868_v17 = vsel %vm1502_vm4, %v1617_v13, %v6685_v18  ;;  %v1165_v18 = vmul.f32 %v1161_v62, %v6554_v55  ;;  %v6882_v2 = vadd.f32 %v1168_v14, %v1164_v5 }
0x10c7   :  { %v1176_v60 = vsel %vm298_vm2, %v1175_v29, %v1174_v32  ;;  %v1325_v32 = vrot.slane %v6855_v54, 7  ;;  %v1328_v13 = vmul.f32 %v1324_v58, %v6566_v59 }
0x10c8   :  { %5565 = vmatmul.mubr.msk.f32.vlgmr.msra.gmra.mrb[8].mxu0 %vm139_vm3, %v1176_v60  ;;  %v6884_v19 = vadd.f32 %v1169_v16, %v1165_v18  ;;  %v1272_v55 = vrot.slane %v6882_v2, 7  ;;  %v6910_v60 = vld [vmem:[%s8340_s1] sm:$0xff] }
0x10ca   :  { %v1273_v57 = vrot.slane %v6884_v19, 7 }
0x119b   :  { %v1245_v63 = vpop.f32.mrb[8].mxu0 }
0x119c   :  { %v1250_v1 = vrot.slane %v1245_v63, 2  ;;  %v1251_v47 = vrot.slane %v1245_v63, 3  ;;  %v5566_v49 = vpop.f32.mrb[9].mxu0 }
0x119d   :  { %v6917_v49 = vld [vmem:[%s8340_s1 + $0x8] sm:$0xff] }
0x119e   :  { %v1254_v51 = vadd.f32 %v1250_v1, %v6538_v27  ;;  %v1255_v52 = vadd.f32 %v1251_v47, %v6535_v23  ;;  %v1329_v47 = vmul.f32 %v1325_v32, %v6557_v56 }
0x11a0   :  { %6122 = vtanh.f32 %v1254_v51  ;;  %v5199_v61 = vmul.f32 -1.442695, %v1254_v51  ;;  %v5200_v0 = vmul.f32 -1.442695, %v1255_v52 }
0x11a1   :  { %6124 = vtanh.f32 %v1255_v52 }
0x11a2   :  { %6126 = vpow2.f32 %v5199_v61 }
0x11a3   :  { %6128 = vpow2.f32 %v5200_v0 }
0x11aa   :  { %v6123_v9 = vpop.eup %6122 }
0x11ab   :  { %v6125_v21 = vpop.eup %6124  ;;  %1284 = vrot.lane.b32.xlu0 %v6123_v9, %s6429_s22 }
0x11ac   :  { %1286 = vrot.lane.b32.xlu1 %v6125_v21, %s6429_s22  ;;  %v6127_v8 = vpop.eup %6126 }
0x11ad   :  { %v6129_v10 = vpop.eup %6128  ;;  %v1262_v24 = vadd.f32 1.0, %v6127_v8 }
0x11ae   :  { %v1263_v28 = vadd.f32 1.0, %v6129_v10 }
0x11af   :  { %1274 = vrot.lane.b32.xlu0 %v1272_v55, %s6430_s23  ;;  %6130 = vrcp.f32 %v1262_v24 }
0x11b0   :  { %1276 = vrot.lane.b32.xlu1 %v1273_v57, %s6430_s23  ;;  %6132 = vrcp.f32 %v1263_v28 }
0x11b9   :  { %v6131_v31 = vpop.eup %6130 }
0x11ba   :  { %v6133_v15 = vpop.eup %6132 }
0x121d   :  { %v1285_v12 = vpop.permute.xlu0 %1284 }
0x121e   :  { %v1290_v25 = vmul.f32 %v6131_v31, %v1285_v12  ;;  %v1287_v36 = vpop.permute.xlu1 %1286 }
0x121f   :  { %v1291_v37 = vmul.f32 %v6133_v15, %v1287_v36 }
0x1220   :  { %1294 = vrot.lane.b32.xlu0 %v1290_v25, %s6430_s23  ;;  %v1345_v25 = vmul.f32 %v1273_v57, %v6557_v56 }
0x1221   :  { %1296 = vrot.lane.b32.xlu1 %v1291_v37, %s6430_s23  ;;  %v1275_v39 = vpop.permute.xlu0 %1274 }
0x1222   :  { %v1277_v41 = vpop.permute.xlu1 %1276  ;;  %v1280_v30 = vmul.f32 %v6131_v31, %v1275_v39 }
0x1223   :  { %v1281_v34 = vmul.f32 %v6133_v15, %v1277_v41 }
0x1292   :  { %v1295_v33 = vpop.permute.xlu0 %1294 }
0x1293   :  { %v1300_v35 = vadd.f32 %v1295_v33, %v1280_v30  ;;  %v1297_v44 = vpop.permute.xlu1 %1296 }
0x1294   :  { %v1301_v45 = vadd.f32 %v1297_v44, %v1281_v34 }
0x1295   :  { %6134 = vtanh.f32 %v1300_v35 }
0x1296   :  { %6136 = vtanh.f32 %v1301_v45 }
0x129f   :  { %v6135_v50 = vpop.eup %6134 }
0x12a0   :  { %v6137_v38 = vpop.eup %6136  ;;  %1306 = vrot.lane.b32.xlu0 %v6135_v50, %s6429_s22 }
0x12a1   :  { %1308 = vrot.lane.b32.xlu1 %v6137_v38, %s6429_s22 }
0x1312   :  { %v1307_v40 = vpop.permute.xlu0 %1306 }
0x1313   :  { %v1312_v42 = vmul.f32 %v6131_v31, %v1307_v40  ;;  %v1309_v43 = vpop.permute.xlu1 %1308 }
0x1314   :  { %v1313_v53 = vmul.f32 %v6133_v15, %v1309_v43  ;;  %v1344_v15 = vmul.f32 %v1272_v55, %v6566_v59 }
0x1315   :  { %1316 = vrot.lane.b32.xlu0 %v1312_v42, %s6430_s23 }
0x1316   :  { %1318 = vrot.lane.b32.xlu1 %v1313_v53, %s6430_s23 }
0x1319   :  { %1334 = vrot.lane.b32.xlu0 %v1300_v35, %s6431_s24 }
0x131a   :  { %1336 = vrot.lane.b32.xlu1 %v1301_v45, %s6431_s24 }
0x1387   :  { %v1317_v29 = vpop.permute.xlu0 %1316 }
0x1388   :  { %v1322_v63 = vmul.f32 %v6910_v60, %v1317_v29  ;;  %v1319_v1 = vpop.permute.xlu1 %1318 }
0x1389   :  { %v1323_v22 = vmul.f32 %v6917_v49, %v1319_v1 }
0x138a   :  { %v1330_v54 = vadd.f32 %v1328_v13, %v1322_v63  ;;  %v1564_v51 = vrot.slane %v1322_v63, 6 }
0x138b   :  { %v1331_v52 = vadd.f32 %v1329_v47, %v1323_v22  ;;  %v1565_v11 = vrot.slane %v1323_v22, 5  ;;  %v1335_v28 = vpop.permute.xlu0 %1334 }
0x138c   :  { %v1350_v62 = vrot.slane %v1330_v54, 6  ;;  %v1337_v31 = vpop.permute.xlu1 %1336  ;;  %v1340_v12 = vmul.f32 %v6910_v60, %v1335_v28  ;;  %v1978_v54 = vld [vmem:[%s8338_s3 + $0x80] sm:$0xff] }
0x138d   :  { %v1351_v5 = vrot.slane %v1331_v52, 5  ;;  %v1566_v18 = vsel %vm298_vm2, %v1565_v11, %v1564_v51  ;;  %v1979_v51 = vld [vmem:[%s8338_s3 + $0x88] sm:$0xff]  ;;  %v1866_v11 = vld [vmem:[%s8338_s3 + $0x58] sm:$0xff] }
0x138e   :  { %v6924_v14 = vsel %vm1502_vm4, %v6629_v6, %v1566_v18  ;;  %v6929_v16 = vsel %vm1502_vm4, %v1566_v18, %v6629_v6  ;;  %v1341_v6 = vmul.f32 %v6917_v49, %v1337_v31  ;;  %v1346_v36 = vadd.f32 %v1344_v15, %v1340_v12  ;;  %v1980_v18 = vld [vmem:[%s8338_s3 + $0x90] sm:$0xff] }
0x138f   :  { %v1352_v9 = vsel %vm298_vm2, %v1351_v5, %v1350_v62  ;;  %v6959_v52 = vpack.c.bf16 %v1979_v51, %v1978_v54  ;;  %v1867_v62 = vld [vmem:[%s8338_s3 + $0x60] sm:$0xff]  ;;  %v6432_v31 = vmov 1966171168  }
0x1390   :  { %5576 = vmatmul.mubr.msk.f32.vlgmr.msra.gmra.mrb[6].mxu1 %vm139_vm3, %v1352_v9  ;;  %v1347_v37 = vadd.f32 %v1345_v25, %v1341_v6  ;;  %v1448_v39 = vrot.slane %v1346_v36, 7  ;;  %v6967_v5 = vpack.c.bf16 %v1867_v62, %v1866_v11  ;;  %v1981_v9 = vld [vmem:[%s8338_s3 + $0x98] sm:$0xff]  ;;  %v1522_v12 = vunpack.c.l.s4 %v6432_v31 }
0x1391   :  { %5809 = vmatprep.subr.bf16.mxu1 %v6959_v52  ;;  %v7003_v6 = vshrl.u32 %v1500_v20, 7 }
0x1392   :  { %v1449_v41 = vrot.slane %v1347_v37, 7  ;;  %5801 = vmatprep.subr.bf16.mxu0 %v6967_v5  ;;  %5811 = vmatpush3.bf16.msra.mxu1 %v6959_v52  ;;  %v1523_v15 = vunpack.c.0.s8 %v1522_v12 }
0x1393   :  { %5803 = vmatpush3.bf16.msra.mxu0 %v6967_v5  ;;  %vm1671_vm5 = vcmp.eq.s32.totalorder %v7003_v6, 3  ;;  %vm1710_vm6 = vcmp.eq.s32.totalorder %v7003_v6, 4  ;;  %vm1620_vm7 = vcmp.eq.s32.totalorder %v7003_v6, 2  ;;  %vm1519_vm8 = vcmp.eq.s32.totalorder %v7003_v6, 0 }
0x1394   :  { %v7006_v25 = vsub.s32 %v1523_v15, %v7003_v6  ;;  %vm1569_vm9 = vcmp.eq.s32.totalorder %v7003_v6, 1  ;;  %vm1749_vm10 = vcmp.eq.s32.totalorder %v7003_v6, 5  ;;  %vm1788_vm11 = vcmp.eq.s32.totalorder %v7003_v6, 6 }
0x1395   :  { %vm1827_vm12 = vcmp.eq.s32.totalorder %v7003_v6, 7 }
0x1396   :  { %8435 = vst [vmem:[#allocation4_spill] sm:$0xff] %v7006_v25  ;;  %v1679_v36 = vrot.slane %v6801_v46, %v7006_v25  ;;  %v7019_v46 = vsub.s32 0, %v7003_v6 }
0x1463   :  { %v1421_v21 = vpop.f32.mrb[6].mxu1 }
0x1464   :  { %v1426_v61 = vrot.slane %v1421_v21, 1  ;;  %v1427_v0 = vrot.slane %v1421_v21, 2  ;;  %v5577_v8 = vpop.f32.mrb[7].mxu1  ;;  %v6979_v21 = vpack.c.bf16 %v1981_v9, %v1980_v18 }
0x1466   :  { %v1430_v10 = vadd.f32 %v1426_v61, %v6538_v27  ;;  %v1431_v24 = vadd.f32 %v1427_v0, %v6535_v23  ;;  %v1868_v61 = vld [vmem:[%s8338_s3 + $0x68] sm:$0xff]  ;;  %v1869_v0 = vld [vmem:[%s8338_s3 + $0x70] sm:$0xff]  ;;  %5813 = vmatprep.subr.bf16.mxu1 %v6979_v21 }
0x1467   :  { %v6987_v8 = vpack.c.bf16 %v1869_v0, %v1868_v61  ;;  %5815 = vmatpush3.bf16.msra.mxu1 %v6979_v21 }
0x1468   :  { %6138 = vtanh.f32 %v1430_v10  ;;  %v5202_v2 = vmul.f32 -1.442695, %v1430_v10  ;;  %v5203_v59 = vmul.f32 -1.442695, %v1431_v24  ;;  %v2883_v10 = vld [vmem:[%s8341_s4 + $0x8] sm:$0xff] }
0x1469   :  { %6140 = vtanh.f32 %v1431_v24  ;;  %5805 = vmatprep.subr.bf16.mxu0 %v6987_v8  ;;  %v2885_v24 = vld [vmem:[%s8341_s4 + $0x18] sm:$0xff] }
0x146a   :  { %6142 = vpow2.f32 %v5202_v2  ;;  %5807 = vmatpush3.bf16.msra.mxu0 %v6987_v8  ;;  %v6999_v28 = vpack.c.bf16 %v2885_v24, %v2883_v10  ;;  %v1718_v2 = vrot.slane %v6806_v48, %v7006_v25  ;;  %v1757_v48 = vrot.slane %v6868_v17, %v7006_v25 }
0x146b   :  { %6144 = vpow2.f32 %v5203_v59 }
0x146c   :  { %8434 = vst [vmem:[#allocation3_spill] sm:$0xff] %v6999_v28  ;;  %5825 = vmatprep.subr.bf16.mxu1 %v6999_v28 }
0x1472   :  { %v6139_v27 = vpop.eup %6138 }
0x1473   :  { %v6141_v23 = vpop.eup %6140  ;;  %1460 = vrot.lane.b32.xlu0 %v6139_v27, %s6429_s22  ;;  %v1577_v27 = vrot.slane %v6924_v14, %v7006_v25  ;;  %v1687_v14 = vrot.slane %v1679_v36, %v7006_v25 }
0x1474   :  { %1462 = vrot.lane.b32.xlu1 %v6141_v23, %s6429_s22  ;;  %v6143_v19 = vpop.eup %6142  ;;  %v1628_v23 = vrot.slane %v6863_v3, %v7006_v25 }
0x1475   :  { %v6145_v56 = vpop.eup %6144  ;;  %v1438_v55 = vadd.f32 1.0, %v6143_v19  ;;  %v1680_v19 = vcombine.high %v1679_v36, %v1679_v36  ;;  %v1585_v3 = vrot.slane %v1577_v27, %v7006_v25 }
0x1476   :  { %v1439_v57 = vadd.f32 1.0, %v6145_v56  ;;  %v1578_v56 = vcombine.high %v1577_v27, %v1577_v27 }
0x1477   :  { %1450 = vrot.lane.b32.xlu0 %v1448_v39, %s6430_s23  ;;  %6146 = vrcp.f32 %v1438_v55 }
0x1478   :  { %1452 = vrot.lane.b32.xlu1 %v1449_v41, %s6430_s23  ;;  %6148 = vrcp.f32 %v1439_v57  ;;  %v1629_v57 = vcombine.high %v1628_v23, %v1628_v23 }
0x147a   :  { %v1643_v17 = vrot.slane %v1629_v57, %v7006_v25 }
0x1481   :  { %v6147_v30 = vpop.eup %6146 }
0x1482   :  { %v6149_v33 = vpop.eup %6148 }
0x14e5   :  { %v1461_v34 = vpop.permute.xlu0 %1460 }
0x14e6   :  { %v1466_v35 = vmul.f32 %v6147_v30, %v1461_v34  ;;  %v1463_v44 = vpop.permute.xlu1 %1462 }
0x14e7   :  { %v1467_v45 = vmul.f32 %v6149_v33, %v1463_v44  ;;  %v1592_v44 = vrot.slane %v1578_v56, %v7006_v25 }
0x14e8   :  { %1470 = vrot.lane.b32.xlu0 %v1466_v35, %s6430_s23  ;;  %v1726_v35 = vrot.slane %v1718_v2, %v7006_v25 }
0x14e9   :  { %1472 = vrot.lane.b32.xlu1 %v1467_v45, %s6430_s23  ;;  %v1451_v50 = vpop.permute.xlu0 %1450 }
0x14ea   :  { %v1453_v38 = vpop.permute.xlu1 %1452  ;;  %v1456_v40 = vmul.f32 %v6147_v30, %v1451_v50  ;;  %v1698_v50 = vrot.slane %v1687_v14, %v7019_v46 }
0x14eb   :  { %v1457_v42 = vmul.f32 %v6149_v33, %v1453_v38 }
0x14ec   :  { %v1705_v15 = vsel %vm1671_vm5, %v1698_v50, 0.0 }
0x155a   :  { %v1471_v43 = vpop.permute.xlu0 %1470 }
0x155b   :  { %v1476_v53 = vadd.f32 %v1471_v43, %v1456_v40  ;;  %v1473_v58 = vpop.permute.xlu1 %1472  ;;  %v1596_v40 = vrot.slane %v1585_v3, %v7019_v46 }
0x155c   :  { %v1477_v32 = vadd.f32 %v1473_v58, %v1457_v42  ;;  %v1796_v42 = vrot.slane %v6929_v16, %v7006_v25 }
0x155d   :  { %6150 = vtanh.f32 %v1476_v53  ;;  %v1603_v51 = vsel %vm1569_vm9, %v1596_v40, 0.0  ;;  %v2882_v40 = vld [vmem:[%s8341_s4] sm:$0xff] }
0x155e   :  { %6152 = vtanh.f32 %v1477_v32  ;;  %v1758_v32 = vcombine.high %v1757_v48, %v1757_v48  ;;  %v1797_v54 = vcombine.high %v1796_v42, %v1796_v42  ;;  %v1804_v10 = vrot.slane %v1796_v42, %v7006_v25  ;;  %v2884_v42 = vld [vmem:[%s8341_s4 + $0x10] sm:$0xff] }
0x1560   :  { %v1772_v61 = vrot.slane %v1758_v32, %v7006_v25  ;;  %v1815_v14 = vrot.slane %v1804_v10, %v7019_v46  ;;  %v2889_v32 = vld [vmem:[%s8341_s4 + $0x38] sm:$0xff]  ;;  %v5207_v10 = vld [vmem:[%s8338_s3 + $0xa0] ss:$0 sm:$0xff] }
0x1567   :  { %v6151_v29 = vpop.eup %6150 }
0x1568   :  { %v6153_v13 = vpop.eup %6152  ;;  %1482 = vrot.lane.b32.xlu0 %v6151_v29, %s6429_s22  ;;  %v1600_v29 = vrot.slane %v1592_v44, %v7019_v46 }
0x1569   :  { %1484 = vrot.lane.b32.xlu1 %v6153_v13, %s6429_s22 }
0x156a   :  { %v1604_v24 = vsel %vm1569_vm9, %v1600_v29, 0.0 }
0x15da   :  { %v1483_v63 = vpop.permute.xlu0 %1482 }
0x15db   :  { %v1488_v1 = vmul.f32 %v6147_v30, %v1483_v63  ;;  %v1485_v47 = vpop.permute.xlu1 %1484  ;;  %v1636_v30 = vrot.slane %v1628_v23, %v7006_v25 }
0x15dc   :  { %v1489_v22 = vmul.f32 %v6149_v33, %v1485_v47  ;;  %v1694_v33 = vrot.slane %v1680_v19, %v7006_v25  ;;  %v1651_v47 = vrot.slane %v1643_v17, %v7019_v46 }
0x15dd   :  { %1492 = vrot.lane.b32.xlu0 %v1488_v1, %s6430_s23  ;;  %v1647_v58 = vrot.slane %v1636_v30, %v7019_v46  ;;  %v1737_v1 = vrot.slane %v1726_v35, %v7019_v46 }
0x15de   :  { %1494 = vrot.lane.b32.xlu1 %v1489_v22, %s6430_s23  ;;  %v1765_v22 = vrot.slane %v1757_v48, %v7006_v25  ;;  %v1702_v18 = vrot.slane %v1694_v33, %v7019_v46  ;;  %v1655_v23 = vsel %vm1620_vm7, %v1651_v47, 0.0  ;;  %v2886_v47 = vld [vmem:[%s8341_s4 + $0x20] sm:$0xff] }
0x15df   :  { %v1654_v9 = vsel %vm1620_vm7, %v1647_v58, 0.0  ;;  %v2887_v58 = vld [vmem:[%s8341_s4 + $0x28] sm:$0xff] }
0x15e0   :  { %v1706_v56 = vsel %vm1671_vm5, %v1702_v18, 0.0 }
0x164f   :  { %v1493_v37 = vpop.permute.xlu0 %1492 }
0x1650   :  { %v1498_v39 = vmul.f32 %v6910_v60, %v1493_v37  ;;  %v1495_v41 = vpop.permute.xlu1 %1494 }
0x1651   :  { %v1499_v20 = vmul.f32 %v6917_v49, %v1495_v41  ;;  %v1719_v49 = vcombine.high %v1718_v2, %v1718_v2  ;;  %v1811_v41 = vrot.slane %v1797_v54, %v7006_v25  ;;  %v1744_v2 = vsel %vm1710_vm6, %v1737_v1, 0.0 }
0x1652   :  { %v1514_v59 = vrot.slane %v1498_v39, 7  ;;  %v1776_v39 = vrot.slane %v1765_v22, %v7019_v46  ;;  %v7128_v1 = vpack.c.bf16 %v2889_v32, %v2887_v58  ;;  %v2888_v22 = vld [vmem:[%s8341_s4 + $0x30] sm:$0xff]  ;;  %v35_v58 = vld [vmem:[%s8342_s2 + $0x58] sm:$0xff] }
0x1653   :  { %v1515_v55 = vrot.slane %v1499_v20, 6  ;;  %v1733_v16 = vrot.slane %v1719_v49, %v7006_v25  ;;  %v1819_v48 = vrot.slane %v1811_v41, %v7019_v46  ;;  %v7141_v54 = vpack.c.bf16 %v2888_v22, %v2886_v47  ;;  %v37_v47 = vld [vmem:[%s8342_s2 + $0x68] sm:$0xff] }
0x1654   :  { %v1783_v30 = vsel %vm1749_vm10, %v1776_v39, 0.0  ;;  %8437 = vst [vmem:[#allocation6_spill] sm:$0xff] %v7128_v1  ;;  %v27_v39 = vld [vmem:[%s8342_s2 + $0x18] sm:$0xff]  ;;  %vm2685_vm9 = vcmp.lt.f32.partialorder %v35_v58, 0.5 }
0x1655   :  { %v1516_v60 = vsel %vm298_vm2, %v1515_v55, %v1514_v59  ;;  %v1741_v36 = vrot.slane %v1733_v16, %v7019_v46  ;;  %v1780_v55 = vrot.slane %v1772_v61, %v7019_v46  ;;  %8438 = vst [vmem:[#allocation7_spill] sm:$0xff] %v7141_v54  ;;  %v2283_v61 = vld [vmem:[%s8338_s3 + $0xc0] sm:$0xff]  ;;  %vm2677_vm14 = vcmp.lt.f32.partialorder %v27_v39, 0.5 }
0x1656   :  { %v1518_v34 = vsel %vm1502_vm4, %v6577_v7, %v1516_v60  ;;  %v1826_v38 = vsel %vm1502_vm4, %v1516_v60, %v6577_v7 }
0x1657   :  { %v1527_v45 = vrot.slane %v1518_v34, %v7006_v25  ;;  %v1835_v63 = vrot.slane %v1826_v38, %v7006_v25  ;;  %v1745_v49 = vsel %vm1710_vm6, %v1741_v36, 0.0  ;;  %v1784_v44 = vsel %vm1749_vm10, %v1780_v55, 0.0 }
0x1658   :  { %vm1865_vm6 = vcmp.lt.s32.totalorder %v6784_v26, 5 }
0x1659   :  { %v1528_v43 = vcombine.high %v1527_v45, %v1527_v45  ;;  %v1535_v53 = vrot.slane %v1527_v45, %v7006_v25  ;;  %v1836_v12 = vcombine.high %v1835_v63, %v1835_v63  ;;  %v1843_v20 = vrot.slane %v1835_v63, %v7006_v25 }
0x165a   :  { %v1822_v45 = vsel %vm1788_vm11, %v1815_v14, 0.0  ;;  %v7120_v63 = vpack.c.bf16 %v2884_v42, %v2882_v40 }
0x165b   :  { %v1542_v13 = vrot.slane %v1528_v43, %v7006_v25  ;;  %v1546_v7 = vrot.slane %v1535_v53, %v7019_v46  ;;  %v1850_v57 = vrot.slane %v1836_v12, %v7006_v25  ;;  %v1854_v34 = vrot.slane %v1843_v20, %v7019_v46  ;;  %v26_v20 = vld [vmem:[%s8342_s2 + $0x10] sm:$0xff] }
0x165c   :  { %v1823_v43 = vsel %vm1788_vm11, %v1819_v48, 0.0  ;;  %8436 = vst [vmem:[#allocation5_spill] sm:$0xff] %v7120_v63  ;;  %vm2676_vm0 = vcmp.lt.f32.partialorder %v26_v20, 0.5 }
0x165d   :  { %v1550_v11 = vrot.slane %v1542_v13, %v7019_v46  ;;  %v1553_v62 = vsel %vm1519_vm8, %v1546_v7, 0.0  ;;  %v1858_v50 = vrot.slane %v1850_v57, %v7019_v46  ;;  %v1861_v53 = vsel %vm1827_vm12, %v1854_v34, 0.0 }
0x165e   :  { %v1605_v0 = vadd.f32 %v1603_v51, %v1553_v62  ;;  %v8347_v51 = vmov 0   ;;  %v2281_v62 = vld [vmem:[%s8338_s3 + $0xb0] sm:$0xff] }
0x165f   :  { %v1554_v31 = vsel %vm1519_vm8, %v1550_v11, 0.0  ;;  %v1862_v7 = vsel %vm1827_vm12, %v1858_v50, 0.0  ;;  %6025 = vset.pattern.permute.xlu1 %v8347_v51  ;;  %6024 = vset.pattern.permute.xlu0 %v8347_v51  ;;  %v2280_v11 = vld [vmem:[%s8338_s3 + $0xa8] sm:$0xff]  ;;  %v2693_v14 = vsel %vm2677_vm14, 1, %v8347_v51 }
0x1660   :  { %v1606_v27 = vadd.f32 %v1604_v24, %v1554_v31  ;;  %v1656_v37 = vadd.f32 %v1654_v9, %v1605_v0  ;;  %v7164_v18 = vpack.c.bf16 %v2281_v62, %v2280_v11  ;;  %v2282_v9 = vld [vmem:[%s8338_s3 + $0xb8] sm:$0xff]  ;;  %v38_v62 = vld [vmem:[%s8342_s2 + $0x70] sm:$0xff] }
0x1661   :  { %v7174_v0 = vpack.c.bf16 %v2283_v61, %v2282_v9  ;;  %vm2688_vm14 = vcmp.lt.f32.partialorder %v38_v62, 0.5 }
0x1662   :  { %v1657_v59 = vadd.f32 %v1655_v23, %v1606_v27  ;;  %v1707_v19 = vadd.f32 %v1705_v15, %v1656_v37  ;;  %8439 = vst [vmem:[#allocation8_spill] sm:$0xff] %v7164_v18  ;;  %5817 = vmatprep.subr.bf16.mxu0 %v7164_v18  ;;  %v25_v37 = vld [vmem:[%s8342_s2 + $0x8] sm:$0xff]  ;;  %v24_v23 = vld [vmem:[%s8342_s2] sm:$0xff] }
0x1663   :  { %8440 = vst [vmem:[#allocation9_spill] sm:$0xff] %v7174_v0  ;;  %vm2674_vm13 = vcmp.lt.f32.partialorder %v24_v23, 0.5  ;;  %vm2675_vm15 = vcmp.lt.f32.partialorder %v25_v37, 0.5 }
0x1664   :  { %v1708_v3 = vadd.f32 %v1706_v56, %v1657_v59  ;;  %v1746_v60 = vadd.f32 %v1744_v2, %v1707_v19  ;;  %v28_v59 = vld [vmem:[%s8342_s2 + $0x20] sm:$0xff]  ;;  %v2690_v56 = vsel %vm2674_vm13, 1, %v8347_v51  ;;  %v2691_v57 = vsel %vm2675_vm15, 1, %v8347_v51 }
0x1665   :  { %vm2678_vm4 = vcmp.lt.f32.partialorder %v28_v59, 0.5  ;;  %vm2687_vm13 = vcmp.lt.f32.partialorder %v37_v47, 0.5 }
0x1666   :  { %v1785_v33 = vadd.f32 %v1783_v30, %v1746_v60  ;;  %v1747_v35 = vadd.f32 %v1745_v49, %v1708_v3  ;;  %v29_v3 = vld [vmem:[%s8342_s2 + $0x28] sm:$0xff]  ;;  %v32_v60 = vld [vmem:[%s8342_s2 + $0x40] sm:$0xff]  ;;  %v2692_v49 = vsel %vm2676_vm0, 1, %v8347_v51  ;;  %v2694_v34 = vsel %vm2678_vm4, 1, %v8347_v51 }
0x1667   :  { %v33_v30 = vld [vmem:[%s8342_s2 + $0x48] sm:$0xff]  ;;  %vm2682_vm1 = vcmp.lt.f32.partialorder %v32_v60, 0.5  ;;  %vm2679_vm5 = vcmp.lt.f32.partialorder %v29_v3, 0.5 }
0x1668   :  { %v1824_v17 = vadd.f32 %v1822_v45, %v1785_v33  ;;  %v1786_v38 = vadd.f32 %v1784_v44, %v1747_v35  ;;  %v2698_v48 = vsel %vm2682_vm1, 1, %v8347_v51  ;;  %v30_v33 = vld [vmem:[%s8342_s2 + $0x30] sm:$0xff]  ;;  %v2695_v44 = vsel %vm2679_vm5, 1, %v8347_v51  ;;  %v5204_v45 = vld [vmem:[%s8338_s3 + $0x78] ss:$0 sm:$0xff] }
0x1669   :  { %v34_v35 = vld [vmem:[%s8342_s2 + $0x50] sm:$0xff]  ;;  %vm2683_vm10 = vcmp.lt.f32.partialorder %v33_v30, 0.5  ;;  %vm2680_vm12 = vcmp.lt.f32.partialorder %v30_v33, 0.5 }
0x166a   :  { %v7116_v29 = vadd.f32 %v1861_v53, %v1824_v17  ;;  %v1825_v13 = vadd.f32 %v1823_v43, %v1786_v38  ;;  %vm2684_vm7 = vcmp.lt.f32.partialorder %v34_v35, 0.5  ;;  %v31_v43 = vld [vmem:[%s8342_s2 + $0x38] sm:$0xff]  ;;  %v36_v53 = vld [vmem:[%s8342_s2 + $0x60] sm:$0xff]  ;;  %v2696_v9 = vsel %vm2680_vm12, 1, %v8347_v51 }
0x166b   :  { %v2700_v42 = vsel %vm2684_vm7, 1, %v8347_v51  ;;  %vm2681_vm8 = vcmp.lt.f32.partialorder %v31_v43, 0.5  ;;  %vm2686_vm11 = vcmp.lt.f32.partialorder %v36_v53, 0.5 }
0x166c   :  { %5586 = vmatprep.mubr.msk.f32.mxu0 %vm139_vm3, %v7116_v29  ;;  %5597 = vmatprep.mubr.msk.f32.mxu1 %vm139_vm3, %v7116_v29  ;;  %v7126_v16 = vadd.f32 %v1862_v7, %v1825_v13  ;;  %v2697_v32 = vsel %vm2681_vm8, 1, %v8347_v51  ;;  %v2701_v13 = vsel %vm2685_vm9, 1, %v8347_v51  ;;  %v2699_v7 = vsel %vm2683_vm10, 1, %v8347_v51 }
0x166d   :  { %v2702_v22 = vsel %vm2686_vm11, 1, %v8347_v51 }
0x166e   :  { %5587 = vmatmul.mubr.msk.f32.vlgmr.msra.gmra.mrb[10].mxu0 %vm139_vm3, %v7126_v16  ;;  %5598 = vmatmul.mubr.msk.f32.vlgmr.msra.gmra.mrb[8].mxu1 %vm139_vm3, %v7126_v16 }
0x166f   :  { %5827 = vmatpush1.bf16.msra.mxu1 %v7120_v63  ;;  %2967 = vmatprep.mubr.f32.mxu1 %v8345_v4 }
0x1670   :  { %5829 = vmatprep.subr.bf16.mxu1 %v7128_v1  ;;  %5819 = vmatpush3.bf16.msra.mxu0 %v7164_v18 }
0x1671   :  { %5821 = vmatprep.subr.bf16.mxu0 %v7174_v0 }
0x1673   :  { %5831 = vmatpush1.bf16.msra.mxu1 %v7141_v54 }
0x1674   :  { %5897 = vmatprep.subr.bf16.mxu1 %v6967_v5  ;;  %5823 = vmatpush3.bf16.msra.mxu0 %v7174_v0 }
0x1676   :  { %5244 = vmatmul.mubr.msk.f32.vlgmr.msra.gmra.mrb[10].mxu1 %vm139_vm3, %v7116_v29 }
0x1677   :  { %2973 = vmatprep.mubr.f32.mxu1 %v8345_v4  ;;  %5899 = vmatpush3.bf16.msra.mxu1 %v6967_v5 }
0x1678   :  { %5901 = vmatprep.subr.bf16.mxu1 %v6987_v8 }
0x167a   :  { %5245 = vmatmul.mubr.msk.f32.gmra.mrb[12].mxu1 %vm139_vm3, %v7126_v16 }
0x167b   :  { %5903 = vmatpush3.bf16.msra.mxu1 %v6987_v8 }
0x167c   :  { %5905 = vmatprep.subr.bf16.mxu1 %v6959_v52 }
0x1741   :  { %v5588_v24 = vpop.f32.mrb[10].mxu0  ;;  %v5599_v31 = vpop.f32.mrb[8].mxu1 }
0x1742   :  { %v7181_v12 = vadd.f32 %v5599_v31, %v5207_v10  ;;  %v1947_v15 = vpop.f32.mrb[11].mxu0  ;;  %v2053_v36 = vpop.f32.mrb[9].mxu1  ;;  %v1953_v50 = vadd.f32 %v5588_v24, %v5204_v45  ;;  %v2703_v31 = vsel %vm2687_vm13, 1, %v8347_v51 }
0x1743   :  { %v7183_v27 = vadd.f32 %v5207_v10, %v2053_v36  ;;  %v1948_v38 = vadd.f32 %v5204_v45, %v1947_v15 }
0x1744   :  { %2244 = vrot.lane.b32.xlu1 %v7181_v12, %s6431_s24  ;;  %v7240_v17 = vsel %vm1865_vm6, %v1953_v50, -1e+30 }
0x1745   :  { %2242 = vrot.lane.b32.xlu0 %v7183_v27, %s6431_s24  ;;  %v7245_v40 = vsel %vm1865_vm6, %v1948_v38, -1e+30  ;;  %v2071_v11 = vrot.slane %v7183_v27, %v7006_v25  ;;  %v2064_v61 = vcombine.high %v7183_v27, %v7183_v27 }
0x1747   :  { %v2079_v10 = vcombine.high %v2071_v11, %v2071_v11  ;;  %v2087_v24 = vrot.slane %v2071_v11, %v7006_v25  ;;  %v2078_v15 = vrot.slane %v2064_v61, %v7006_v25 }
0x1748   :  { %2585 = vperm.xlu1 %6025, %v25_v37  }
0x1749   :  { %v7198_v41 = vpop.f32.mrb[10].mxu1  ;;  %2580 = vperm.xlu0 %6024, %v24_v23   ;;  %v2101_v36 = vrot.slane %v2079_v10, %v7006_v25  ;;  %v2109_v37 = vcombine.high %v2087_v24, %v2087_v24  ;;  %v2704_v23 = vsel %vm2688_vm14, 1, %v8347_v51  ;;  %v2094_v27 = vrot.slane %v2078_v15, %v7006_v25  ;;  %v3055_v51 = vld [vmem:[%s8341_s4 + $0x178] sm:$0xff] }
0x174a   :  { %v7203_v2 = vpop.f32.mrb[11].mxu1 }
0x174b   :  { %v2181_v45 = vrot.slane %v2094_v27, %v7019_v46 }
0x174c   :  { %2590 = vperm.xlu1 %6025, %v26_v20   ;;  %v2111_v20 = vcombine.high %v2101_v36, %v2101_v36 }
0x174d   :  { %v7208_v19 = vpop.f32.mrb[12].mxu1  ;;  %2600 = vperm.xlu0 %6024, %v28_v59   ;;  %v2165_v59 = vrot.slane %v2087_v24, %v7019_v46 }
0x174e   :  { %v7211_v55 = vpop.f32.mrb[13].mxu1 }
0x1750   :  { %2707 = vperm.xlu1 %6025, %v2690_v56   ;;  %v2169_v56 = vrot.slane %v2101_v36, %v7019_v46  ;;  %v3021_v36 = vld [vmem:[%s8341_s4 + $0x68] sm:$0xff] }
0x1751   :  { %2716 = vperm.xlu0 %6024, %v2693_v14   ;;  %v2173_v14 = vrot.slane %v2109_v37, %v7019_v46  ;;  %v3018_v37 = vld [vmem:[%s8341_s4 + $0x50] sm:$0xff] }
0x1754   :  { %2710 = vperm.xlu1 %6025, %v2691_v57  }
0x1755   :  { %2605 = vperm.xlu0 %6024, %v29_v3  }
0x1758   :  { %2595 = vperm.xlu1 %6025, %v27_v39   ;;  %v2080_v39 = vcombine.high %v2078_v15, %v2078_v15  ;;  %v3019_v15 = vld [vmem:[%s8341_s4 + $0x58] sm:$0xff] }
0x1759   :  { %2620 = vperm.xlu0 %6024, %v32_v60  }
0x175c   :  { %2713 = vperm.xlu1 %6025, %v2692_v49  }
0x175d   :  { %2625 = vperm.xlu0 %6024, %v33_v30   ;;  %v2120_v30 = vrot.slane %v7181_v12, %v7006_v25 }
0x1760   :  { %2731 = vperm.xlu1 %6025, %v2698_v48   ;;  %v2108_v48 = vrot.slane %v2080_v39, %v7006_v25 }
0x1761   :  { %2719 = vperm.xlu0 %6024, %v2694_v34   ;;  %v2177_v34 = vrot.slane %v2111_v20, %v7019_v46  ;;  %v7310_v20 = vpack.c.bf16 %v3021_v36, %v3019_v15 }
0x1763   :  { %8441 = vst [vmem:[#allocation10_spill] sm:$0xff] %v7310_v20  ;;  %5833 = vmatprep.subr.bf16.mxu0 %v7310_v20 }
0x1765   :  { %2610 = vperm.xlu0 %6024, %v30_v33   ;;  %v2110_v33 = vcombine.high %v2094_v27, %v2094_v27  ;;  %v3020_v27 = vld [vmem:[%s8341_s4 + $0x60] sm:$0xff] }
0x1769   :  { %2630 = vperm.xlu0 %6024, %v34_v35  }
0x176d   :  { %2722 = vperm.xlu0 %6024, %v2695_v44  }
0x1784   :  { %1962 = vmax.xlane.f32.xlu1 %v7240_v17 }
0x178c   :  { %1960 = vmax.xlane.f32.xlu0 %v7245_v40 }
0x1795   :  { %2737 = vperm.xlu1 %6025, %v2700_v42  }
0x1799   :  { %2640 = vperm.xlu1 %6025, %v36_v53   ;;  %v2128_v53 = vcombine.high %v2120_v30, %v2120_v30 }
0x179d   :  { %2728 = vperm.xlu1 %6025, %v2697_v32   ;;  %v2112_v32 = vcombine.high %v2108_v48, %v2108_v48 }
0x179f   :  { %v2193_v10 = vrot.slane %v2112_v32, %v7019_v46 }
0x17a1   :  { %2740 = vperm.xlu1 %6025, %v2701_v13   ;;  %v2136_v13 = vrot.slane %v2120_v30, %v7006_v25 }
0x17a2   :  { %2734 = vperm.xlu0 %6024, %v2699_v7   ;;  %v2189_v7 = vrot.slane %v2110_v33, %v7019_v46 }
0x17a3   :  { %v2158_v24 = vcombine.high %v2136_v13, %v2136_v13 }
0x17a5   :  { %2645 = vperm.xlu1 %6025, %v37_v47   ;;  %v2205_v30 = vrot.slane %v2158_v24, %v7019_v46 }
0x17a6   :  { %2615 = vperm.xlu0 %6024, %v31_v43   ;;  %v2113_v43 = vcombine.high %v7181_v12, %v7181_v12  ;;  %v2150_v12 = vrot.slane %v2128_v53, %v7006_v25 }
0x17a9   :  { %2743 = vperm.xlu1 %6025, %v2702_v22  }
0x17aa   :  { %2635 = vperm.xlu0 %6024, %v35_v58   ;;  %v2185_v58 = vrot.slane %v2108_v48, %v7019_v46 }
0x17ad   :  { %2650 = vperm.xlu1 %6025, %v38_v62  }
0x17ae   :  { %2725 = vperm.xlu0 %6024, %v2696_v9   ;;  %v2127_v9 = vrot.slane %v2113_v43, %v7006_v25 }
0x17b1   :  { %2746 = vperm.xlu1 %6025, %v2703_v31   ;;  %v2197_v31 = vrot.slane %v2136_v13, %v7019_v46 }
0x17b5   :  { %2749 = vperm.xlu1 %6025, %v2704_v23  }
0x17b6   :  { %v2245_v61 = vpop.permute.xlu1 %2244 }
0x17b7   :  { %v2243_v57 = vpop.permute.xlu0 %2242 }
0x17b8   :  { %v2248_v3 = vadd.f32 %v2243_v57, %v2165_v59  ;;  %v2249_v60 = vadd.f32 %v2243_v57, %v2169_v56  ;;  %v2250_v49 = vadd.f32 %v2243_v57, %v2173_v14  ;;  %v2251_v50 = vadd.f32 %v2243_v57, %v2177_v34 }
0x17b9   :  { %v2252_v42 = vadd.f32 %v2243_v57, %v2181_v45  ;;  %v2253_v22 = vadd.f32 %v2243_v57, %v2185_v58  ;;  %v2254_v62 = vadd.f32 %v2243_v57, %v2189_v7  ;;  %v2255_v39 = vadd.f32 %v2243_v57, %v2193_v10 }
0x17ba   :  { %v2264_v35 = vmax.f32 %v2248_v3, 0.0  ;;  %v2265_v44 = vmax.f32 %v2249_v60, 0.0  ;;  %v2266_v38 = vmax.f32 %v2250_v49, 0.0  ;;  %v2267_v47 = vmax.f32 %v2251_v50, 0.0 }
0x17bb   :  { %v2268_v11 = vmax.f32 %v2252_v42, 0.0  ;;  %v2269_v23 = vmax.f32 %v2253_v22, 0.0  ;;  %v2270_v59 = vmax.f32 %v2254_v62, 0.0  ;;  %v2256_v56 = vadd.f32 %v2245_v61, %v2197_v31 }
0x17bc   :  { %5608 = vmatprep.mubr.msk.f32.mxu0 %vm139_vm3, %v2264_v35  ;;  %v7315_v14 = vpack.c.bf16 %v3020_v27, %v3018_v37  ;;  %v2129_v3 = vcombine.high %v2127_v9, %v2127_v9  ;;  %v2160_v60 = vcombine.high %v2150_v12, %v2150_v12  ;;  %v2201_v49 = vrot.slane %v2150_v12, %v7019_v46 }
0x17bd   :  { %5609 = vmatmul.mubr.msk.f32.vlgmr.msra.gmra.mrb[12].mxu0 %vm139_vm3, %v2265_v44  ;;  %v2143_v57 = vrot.slane %v2127_v9, %v7006_v25  ;;  %v2271_v48 = vmax.f32 %v2255_v39, 0.0  ;;  %v2272_v33 = vmax.f32 %v2256_v56, 0.0  ;;  %v2258_v35 = vadd.f32 %v2245_v61, %v2205_v30 }
0x17be   :  { %5611 = vmatprep.mubr.msk.f32.mxu0 %vm139_vm3, %v2266_v38  ;;  %8442 = vst [vmem:[#allocation11_spill] sm:$0xff] %v7315_v14  ;;  %5835 = vmatpush1.bf16.msra.mxu0 %v7315_v14  ;;  %v2257_v34 = vadd.f32 %v2245_v61, %v2201_v49  ;;  %v2157_v44 = vrot.slane %v2129_v3, %v7006_v25 }
0x17bf   :  { %v2209_v45 = vrot.slane %v2160_v60, %v7019_v46  ;;  %v2159_v50 = vcombine.high %v2143_v57, %v2143_v57  ;;  %v2213_v38 = vrot.slane %v2143_v57, %v7019_v46  ;;  %v2274_v53 = vmax.f32 %v2258_v35, 0.0 }
0x17c0   :  { %v2273_v42 = vmax.f32 %v2257_v34, 0.0  ;;  %v2217_v32 = vrot.slane %v2157_v44, %v7019_v46  ;;  %v2161_v13 = vcombine.high %v2157_v44, %v2157_v44  ;;  %v3023_v44 = vld [vmem:[%s8341_s4 + $0x78] sm:$0xff] }
0x17c1   :  { %5612 = vmatmul.mubr.msk.f32.gmra.mrb[14].mxu0 %vm139_vm3, %v2267_v47  ;;  %v2259_v43 = vadd.f32 %v2245_v61, %v2209_v45  ;;  %v2260_v58 = vadd.f32 %v2245_v61, %v2213_v38  ;;  %v2221_v7 = vrot.slane %v2159_v50, %v7019_v46  ;;  %v3025_v45 = vld [vmem:[%s8341_s4 + $0x88] sm:$0xff] }
0x17c2   :  { %5614 = vmatprep.mubr.msk.f32.mxu0 %vm139_vm3, %v2268_v11  ;;  %v2261_v22 = vadd.f32 %v2245_v61, %v2217_v32  ;;  %v2225_v9 = vrot.slane %v2161_v13, %v7019_v46  ;;  %v7378_v38 = vpack.c.bf16 %v3025_v45, %v3023_v44  ;;  %v3029_v32 = vld [vmem:[%s8341_s4 + $0xa8] sm:$0xff] }
0x17c3   :  { %v2275_v47 = vmax.f32 %v2259_v43, 0.0  ;;  %v2276_v11 = vmax.f32 %v2260_v58, 0.0  ;;  %v2262_v62 = vadd.f32 %v2245_v61, %v2221_v7  ;;  %v3024_v43 = vld [vmem:[%s8341_s4 + $0x80] sm:$0xff]  ;;  %v3027_v58 = vld [vmem:[%s8341_s4 + $0x98] sm:$0xff]  ;;  %v3026_v7 = vld [vmem:[%s8341_s4 + $0x90] sm:$0xff] }
0x17c4   :  { %v2277_v12 = vmax.f32 %v2261_v22, 0.0  ;;  %v2263_v10 = vadd.f32 %v2245_v61, %v2225_v9  ;;  %8458 = vst [vmem:[#allocation27_spill] sm:$0xff] %v7378_v38  ;;  %5837 = vmatprep.subr.bf16.mxu0 %v7378_v38  ;;  %v7398_v13 = vpack.c.bf16 %v3029_v32, %v3027_v58  ;;  %v3031_v9 = vld [vmem:[%s8341_s4 + $0xb8] sm:$0xff]  ;;  %v3037_v44 = vld [vmem:[%s8341_s4 + $0xe8] sm:$0xff] }
0x17c5   :  { %5615 = vmatmul.mubr.msk.f32.gmra.mrb[16].mxu0 %vm139_vm3, %v2269_v23  ;;  %v2278_v24 = vmax.f32 %v2262_v62, 0.0  ;;  %v3039_v32 = vld [vmem:[%s8341_s4 + $0xf8] sm:$0xff] }
0x17c6   :  { %5617 = vmatprep.mubr.msk.f32.mxu0 %vm139_vm3, %v2270_v59  ;;  %v2279_v31 = vmax.f32 %v2263_v10, 0.0  ;;  %8460 = vst [vmem:[#allocation29_spill] sm:$0xff] %v7398_v13 }
0x17c7   :  { %v7343_v37 = vpop.permute.xlu1 %2585 }
0x17c8   :  { %v7339_v15 = vpop.permute.xlu0 %2580  ;;  %8445 = vst [vmem:[#allocation14_spill] sm:$0xff] %v7343_v37 }
0x17c9   :  { %5618 = vmatmul.mubr.msk.f32.gmra.mrb[18].mxu0 %vm139_vm3, %v2271_v48  ;;  %8443 = vst [vmem:[#allocation12_spill] sm:$0xff] %v7339_v15 }
0x17ca   :  { %5620 = vmatprep.mubr.msk.f32.mxu0 %vm139_vm3, %v2272_v33 }
0x17cb   :  { %v7347_v39 = vpop.permute.xlu1 %2590 }
0x17cc   :  { %v7341_v36 = vpop.permute.xlu0 %2600  ;;  %8447 = vst [vmem:[#allocation16_spill] sm:$0xff] %v7347_v39 }
0x17cd   :  { %5621 = vmatmul.mubr.msk.f32.gmra.mrb[20].mxu0 %vm139_vm3, %v2273_v42  ;;  %8444 = vst [vmem:[#allocation13_spill] sm:$0xff] %v7341_v36  ;;  %v3022_v42 = vld [vmem:[%s8341_s4 + $0x70] sm:$0xff] }
0x17ce   :  { %5623 = vmatprep.mubr.msk.f32.mxu0 %vm139_vm3, %v2274_v53  ;;  %v7388_v53 = vpack.c.bf16 %v3024_v43, %v3022_v42  ;;  %v3034_v42 = vld [vmem:[%s8341_s4 + $0xd0] sm:$0xff]  ;;  %v3036_v43 = vld [vmem:[%s8341_s4 + $0xe0] sm:$0xff] }
0x17cf   :  { %v7351_v61 = vpop.permute.xlu1 %2707  ;;  %v7446_v58 = vpack.c.bf16 %v3036_v43, %v3034_v42  ;;  %v3047_v43 = vld [vmem:[%s8341_s4 + $0x138] sm:$0xff] }
0x17d0   :  { %v7345_v23 = vpop.permute.xlu0 %2716  ;;  %8449 = vst [vmem:[#allocation18_spill] sm:$0xff] %v7351_v61  ;;  %8459 = vst [vmem:[#allocation28_spill] sm:$0xff] %v7388_v53  ;;  %5839 = vmatpush1.bf16.msra.mxu0 %v7388_v53  ;;  %vm2754_vm0 = vcmp.eq.s32.totalorder %v7351_v61, 1 }
0x17d1   :  { %5624 = vmatmul.mubr.msk.f32.gmra.mrb[22].mxu0 %vm139_vm3, %v2275_v47  ;;  %8446 = vst [vmem:[#allocation15_spill] sm:$0xff] %v7345_v23  ;;  %v3028_v47 = vld [vmem:[%s8341_s4 + $0xa0] sm:$0xff]  ;;  %5841 = vmatprep.subr.bf16.mxu0 %v7398_v13  ;;  %8465 = vst [vmem:[#allocation34_spill] sm:$0xff] %v7446_v58  ;;  %vm8428_vm1 = vcmp.eq.s32.totalorder %v7345_v23, 1 }
0x17d2   :  { %5626 = vmatprep.mubr.msk.f32.mxu0 %vm139_vm3, %v2276_v11  ;;  %v7406_v11 = vpack.c.bf16 %v3028_v47, %v3026_v7  ;;  %v3041_v7 = vld [vmem:[%s8341_s4 + $0x108] sm:$0xff] }
0x17d3   :  { %v7355_v56 = vpop.permute.xlu1 %2710  ;;  %v7456_v47 = vpack.c.bf16 %v3041_v7, %v3039_v32  ;;  %v3049_v32 = vld [vmem:[%s8341_s4 + $0x148] sm:$0xff] }
0x17d4   :  { %v7349_v27 = vpop.permute.xlu0 %2605  ;;  %8451 = vst [vmem:[#allocation20_spill] sm:$0xff] %v7355_v56  ;;  %8461 = vst [vmem:[#allocation30_spill] sm:$0xff] %v7406_v11  ;;  %5843 = vmatpush1.bf16.msra.mxu0 %v7406_v11  ;;  %v7495_v7 = vpack.c.bf16 %v3049_v32, %v3047_v43  ;;  %v3050_v43 = vld [vmem:[%s8341_s4 + $0x150] sm:$0xff]  ;;  %v3052_v32 = vld [vmem:[%s8341_s4 + $0x160] sm:$0xff]  ;;  %vm2755_vm4 = vcmp.eq.s32.totalorder %v7355_v56, 1 }
0x17d5   :  { %5627 = vmatmul.mubr.msk.f32.gmra.mrb[24].mxu0 %vm139_vm3, %v2277_v12  ;;  %8448 = vst [vmem:[#allocation17_spill] sm:$0xff] %v7349_v27  ;;  %v3033_v12 = vld [vmem:[%s8341_s4 + $0xc8] sm:$0xff]  ;;  %8466 = vst [vmem:[#allocation35_spill] sm:$0xff] %v7456_v47  ;;  %v7525_v4 = vpack.c.bf16 %v3052_v32, %v3050_v43  ;;  %v8474_v32 = vmov 0  }
0x17d6   :  { %5629 = vmatprep.mubr.msk.f32.mxu0 %vm139_vm3, %v2278_v24  ;;  %v7417_v24 = vpack.c.bf16 %v3033_v12, %v3031_v9  ;;  %v3043_v12 = vld [vmem:[%s8341_s4 + $0x118] sm:$0xff]  ;;  %8470 = vst [vmem:[#allocation39_spill] sm:$0xff] %v7495_v7  ;;  %v3057_v43 = vld [vmem:[%s8341_s4 + $0x188] sm:$0xff] }
0x17d7   :  { %v7359_v60 = vpop.permute.xlu1 %2595  ;;  %8473 = vst [vmem:[#allocation42_spill] sm:$0xff] %v7525_v4 }
0x17d8   :  { %v7353_v59 = vpop.permute.xlu0 %2620  ;;  %8453 = vst [vmem:[#allocation22_spill] sm:$0xff] %v7359_v60  ;;  %8462 = vst [vmem:[#allocation31_spill] sm:$0xff] %v7417_v24  ;;  %5845 = vmatprep.subr.bf16.mxu0 %v7417_v24 }
0x17d9   :  { %5630 = vmatmul.mubr.msk.f32.gmra.mrb[26].mxu0 %vm139_vm3, %v2279_v31  ;;  %8450 = vst [vmem:[#allocation19_spill] sm:$0xff] %v7353_v59  ;;  %v3030_v31 = vld [vmem:[%s8341_s4 + $0xb0] sm:$0xff] }
0x17db   :  { %v7363_v57 = vpop.permute.xlu1 %2713 }
0x17dc   :  { %v7357_v3 = vpop.permute.xlu0 %2625  ;;  %8454 = vst [vmem:[#allocation23_spill] sm:$0xff] %v7363_v57  ;;  %vm8418_vm5 = vcmp.eq.s32.totalorder %v7363_v57, 1 }
0x17dd   :  { %8452 = vst [vmem:[#allocation21_spill] sm:$0xff] %v7357_v3 }
0x17df   :  { %v7367_v48 = vpop.permute.xlu1 %2731 }
0x17e0   :  { %v7361_v49 = vpop.permute.xlu0 %2719  ;;  %8456 = vst [vmem:[#allocation25_spill] sm:$0xff] %v7367_v48  ;;  %vm8427_vm12 = vcmp.eq.s32.totalorder %v7367_v48, 1 }
0x17e1   :  { %vm8412_vm7 = vcmp.eq.s32.totalorder %v7361_v49, 1 }
0x17e4   :  { %v7365_v30 = vpop.permute.xlu0 %2610 }
0x17e5   :  { %8455 = vst [vmem:[#allocation24_spill] sm:$0xff] %v7365_v30 }
0x17e8   :  { %v7369_v34 = vpop.permute.xlu0 %2630 }
0x17e9   :  { %8457 = vst [vmem:[#allocation26_spill] sm:$0xff] %v7369_v34 }
0x1811   :  { %v1963_v33 = vpop.xlane.xlu1 %1962 }
0x1812   :  { %v1965_v35 = vsub.f32 %v7240_v17, %v1963_v33  ;;  %v7386_v17 = vpop.permute.xlu0 %2722 }
0x1813   :  { %vm8408_vm8 = vcmp.eq.s32.totalorder %v7386_v17, 1 }
0x1814   :  { %v1968_v50 = vmul.f32 1.442695, %v1965_v35  ;;  %v3035_v35 = vld [vmem:[%s8341_s4 + $0xd8] sm:$0xff] }
0x1816   :  { %6154 = vpow2.f32 %v1968_v50  ;;  %v7437_v50 = vpack.c.bf16 %v3037_v44, %v3035_v35  ;;  %v3042_v35 = vld [vmem:[%s8341_s4 + $0x110] sm:$0xff]  ;;  %v3044_v44 = vld [vmem:[%s8341_s4 + $0x120] sm:$0xff] }
0x1817   :  { %v7485_v42 = vpack.c.bf16 %v3044_v44, %v3042_v35  ;;  %v3053_v35 = vld [vmem:[%s8341_s4 + $0x168] sm:$0xff] }
0x1818   :  { %8464 = vst [vmem:[#allocation33_spill] sm:$0xff] %v7437_v50 }
0x1819   :  { %v1961_v22 = vpop.xlane.xlu0 %1960  ;;  %8469 = vst [vmem:[#allocation38_spill] sm:$0xff] %v7485_v42 }
0x181a   :  { %v1964_v62 = vsub.f32 %v7245_v40, %v1961_v22  ;;  %v3032_v40 = vld [vmem:[%s8341_s4 + $0xc0] sm:$0xff]  ;;  %v3038_v22 = vld [vmem:[%s8341_s4 + $0xf0] sm:$0xff] }
0x181b   :  { %v7425_v33 = vpack.c.bf16 %v3032_v40, %v3030_v31 }
0x181c   :  { %v1966_v10 = vmul.f32 1.442695, %v1964_v62  ;;  %v3040_v62 = vld [vmem:[%s8341_s4 + $0x100] sm:$0xff] }
0x181d   :  { %8463 = vst [vmem:[#allocation32_spill] sm:$0xff] %v7425_v33  ;;  %5847 = vmatpush1.bf16.msra.mxu0 %v7425_v33  ;;  %v7464_v9 = vpack.c.bf16 %v3040_v62, %v3038_v22  ;;  %v3046_v22 = vld [vmem:[%s8341_s4 + $0x130] sm:$0xff]  ;;  %v3048_v62 = vld [vmem:[%s8341_s4 + $0x140] sm:$0xff] }
0x181e   :  { %6156 = vpow2.f32 %v1966_v10  ;;  %5849 = vmatprep.subr.bf16.mxu0 %v7437_v50  ;;  %v3045_v10 = vld [vmem:[%s8341_s4 + $0x128] sm:$0xff] }
0x181f   :  { %8467 = vst [vmem:[#allocation36_spill] sm:$0xff] %v7464_v9  ;;  %v7476_v40 = vpack.c.bf16 %v3045_v10, %v3043_v12  ;;  %v7503_v12 = vpack.c.bf16 %v3048_v62, %v3046_v22  ;;  %v3051_v10 = vld [vmem:[%s8341_s4 + $0x158] sm:$0xff]  ;;  %v8351_v22 = vsub.s32 1, %v7003_v6 }
0x1820   :  { %v7435_v45 = vpop.eup %6154  ;;  %v7513_v44 = vpack.c.bf16 %v3053_v35, %v3051_v10  ;;  %v39_v62 = vld [vmem:[%s8342_s2 + $0x78] sm:$0xff]  ;;  %v5243_v10 = vld [vmem:[%s8341_s4 + $0x40] ss:$8 sm:$0x3] }
0x1821   :  { %1972 = vadd.xlane.f32.xlu0 %v7435_v45  ;;  %5851 = vmatpush1.bf16.msra.mxu0 %v7446_v58  ;;  %8468 = vst [vmem:[#allocation37_spill] sm:$0xff] %v7476_v40  ;;  %8471 = vst [vmem:[#allocation40_spill] sm:$0xff] %v7503_v12  ;;  %vm2689_vm15 = vcmp.lt.f32.partialorder %v39_v62, 0.5  ;;  %v7534_v35 = vrot.slane %v5243_v10, %v8351_v22  ;;  %v3056_v22 = vld [vmem:[%s8341_s4 + $0x180] sm:$0xff] }
0x1822   :  { %5853 = vmatprep.subr.bf16.mxu0 %v7456_v47  ;;  %8472 = vst [vmem:[#allocation41_spill] sm:$0xff] %v7513_v44 }
0x1825   :  { %5855 = vmatpush1.bf16.msra.mxu0 %v7464_v9 }
0x1826   :  { %5857 = vmatprep.subr.bf16.mxu0 %v7476_v40 }
0x1828   :  { %v7474_v31 = vpop.eup %6156 }
0x1829   :  { %1970 = vadd.xlane.f32.xlu1 %v7474_v31  ;;  %5859 = vmatpush1.bf16.msra.mxu0 %v7485_v42 }
0x182a   :  { %5861 = vmatprep.subr.bf16.mxu0 %v7495_v7  ;;  %v7543_v7 = vpack.c.bf16 %v3057_v43, %v3055_v51  ;;  %v3059_v51 = vld [vmem:[%s8341_s4 + $0x198] sm:$0xff] }
0x182c   :  { %8475 = vst [vmem:[#allocation43_spill] sm:$0xff] %v7543_v7 }
0x182d   :  { %5863 = vmatpush1.bf16.msra.mxu0 %v7503_v12  ;;  %v2705_v12 = vsel %vm2689_vm15, 1, %v8474_v32  ;;  %v3063_v32 = vld [vmem:[%s8341_s4 + $0x1b8] sm:$0xff] }
0x182e   :  { %5865 = vmatprep.subr.bf16.mxu0 %v7513_v44  ;;  %v7552_v44 = vrot.slane %v5243_v10, %v7019_v46  ;;  %v3061_v10 = vld [vmem:[%s8341_s4 + $0x1a8] sm:$0xff] }
0x1830   :  { %8476 = vst [vmem:[#allocation44_spill] sm:$0xff] %v7552_v44 }
0x1831   :  { %5867 = vmatpush1.bf16.msra.mxu0 %v7525_v4  ;;  %v3054_v4 = vld [vmem:[%s8341_s4 + $0x170] sm:$0xff] }
0x1832   :  { %v7554_v42 = vpack.c.bf16 %v3056_v22, %v3054_v4  ;;  %5869 = vmatprep.subr.bf16.mxu0 %v7543_v7  ;;  %v7570_v4 = vpack.c.bf16 %v3061_v10, %v3059_v51  ;;  %v7580_v22 = vadd.f32 %v7198_v41, %v7552_v44  ;;  %v3065_v51 = vld [vmem:[%s8341_s4 + $0x1c8] sm:$0xff]  ;;  %v3062_v41 = vld [vmem:[%s8341_s4 + $0x1b0] sm:$0xff] }
0x1833   :  { %v7594_v10 = vpack.c.bf16 %v3065_v51, %v3063_v32  ;;  %v3067_v32 = vld [vmem:[%s8341_s4 + $0x1d8] sm:$0xff]  ;;  %v3069_v51 = vld [vmem:[%s8341_s4 + $0x1e8] sm:$0xff] }
0x1834   :  { %8477 = vst [vmem:[#allocation45_spill] sm:$0xff] %v7554_v42  ;;  %8478 = vst [vmem:[#allocation46_spill] sm:$0xff] %v7570_v4 }
0x1835   :  { %5871 = vmatpush1.bf16.msra.mxu0 %v7554_v42  ;;  %8480 = vst [vmem:[#allocation48_spill] sm:$0xff] %v7594_v10 }
0x1836   :  { %5873 = vmatprep.subr.bf16.mxu0 %v7570_v4  ;;  %v7618_v4 = vpack.c.bf16 %v3069_v51, %v3067_v32  ;;  %v3073_v32 = vld [vmem:[%s8341_s4 + $0x208] sm:$0xff] }
0x1837   :  { %2655 = vperm.xlu0 %6024, %v39_v62   ;;  %v7558_v62 = vadd.f32 %v7203_v2, %v7534_v35  ;;  %v3058_v2 = vld [vmem:[%s8341_s4 + $0x190] sm:$0xff] }
0x1838   :  { %8482 = vst [vmem:[#allocation50_spill] sm:$0xff] %v7618_v4 }
0x183a   :  { %2752 = vperm.xlu1 %6025, %v2705_v12   ;;  %v3060_v12 = vld [vmem:[%s8341_s4 + $0x1a0] sm:$0xff] }
0x183b   :  { %3246 = vrot.lane.b32.xlu0 %v7558_v62, %s6429_s22  ;;  %v7582_v43 = vpack.c.bf16 %v3060_v12, %v3058_v2  ;;  %v3064_v2 = vld [vmem:[%s8341_s4 + $0x1c0] sm:$0xff]  ;;  %v7604_v12 = vadd.f32 %v7208_v19, %v7552_v44  ;;  %v3066_v19 = vld [vmem:[%s8341_s4 + $0x1d0] sm:$0xff]  ;;  %v3071_v44 = vld [vmem:[%s8341_s4 + $0x1f8] sm:$0xff] }
0x183c   :  { %v7636_v51 = vpack.c.bf16 %v3073_v32, %v3071_v44  ;;  %v3077_v44 = vld [vmem:[%s8341_s4 + $0x228] sm:$0xff] }
0x183d   :  { %8479 = vst [vmem:[#allocation47_spill] sm:$0xff] %v7582_v43  ;;  %5875 = vmatpush1.bf16.msra.mxu0 %v7582_v43  ;;  %v7606_v43 = vpack.c.bf16 %v3064_v2, %v3062_v41  ;;  %v3068_v41 = vld [vmem:[%s8341_s4 + $0x1e0] sm:$0xff] }
0x183e   :  { %3188 = vrot.lane.b32.xlu1 %v7580_v22, %s6429_s22  ;;  %5877 = vmatprep.subr.bf16.mxu0 %v7594_v10  ;;  %v7626_v2 = vpack.c.bf16 %v3068_v41, %v3066_v19  ;;  %8484 = vst [vmem:[#allocation52_spill] sm:$0xff] %v7636_v51  ;;  %v3072_v19 = vld [vmem:[%s8341_s4 + $0x200] sm:$0xff] }
0x183f   :  { %8481 = vst [vmem:[#allocation49_spill] sm:$0xff] %v7606_v43 }
0x1840   :  { %8483 = vst [vmem:[#allocation51_spill] sm:$0xff] %v7626_v2 }
0x1841   :  { %5879 = vmatpush1.bf16.msra.mxu0 %v7606_v43  ;;  %v3070_v43 = vld [vmem:[%s8341_s4 + $0x1f0] sm:$0xff] }
0x1842   :  { %3190 = vrot.lane.b32.xlu1 %v7604_v12, %s6429_s22  ;;  %5881 = vmatprep.subr.bf16.mxu0 %v7618_v4  ;;  %v7644_v41 = vpack.c.bf16 %v3072_v19, %v3070_v43  ;;  %v3074_v4 = vld [vmem:[%s8341_s4 + $0x210] sm:$0xff]  ;;  %v3076_v43 = vld [vmem:[%s8341_s4 + $0x220] sm:$0xff] }
0x1843   :  { %v7662_v19 = vpack.c.bf16 %v3076_v43, %v3074_v4  ;;  %v3080_v4 = vld [vmem:[%s8341_s4 + $0x240] sm:$0xff] }
0x1844   :  { %8485 = vst [vmem:[#allocation53_spill] sm:$0xff] %v7644_v41 }
0x1845   :  { %5883 = vmatpush1.bf16.msra.mxu0 %v7626_v2  ;;  %v3075_v2 = vld [vmem:[%s8341_s4 + $0x218] sm:$0xff]  ;;  %8487 = vst [vmem:[#allocation55_spill] sm:$0xff] %v7662_v19 }
0x1846   :  { %5885 = vmatprep.subr.bf16.mxu0 %v7636_v51  ;;  %v7654_v32 = vpack.c.bf16 %v3077_v44, %v3075_v2  ;;  %v3081_v2 = vld [vmem:[%s8341_s4 + $0x248] sm:$0xff]  ;;  %v3078_v51 = vld [vmem:[%s8341_s4 + $0x230] sm:$0xff] }
0x1847   :  { %v7680_v43 = vpack.c.bf16 %v3080_v4, %v3078_v51 }
0x1848   :  { %8486 = vst [vmem:[#allocation54_spill] sm:$0xff] %v7654_v32 }
0x1849   :  { %5887 = vmatpush1.bf16.msra.mxu0 %v7644_v41  ;;  %v3079_v41 = vld [vmem:[%s8341_s4 + $0x238] sm:$0xff]  ;;  %8489 = vst [vmem:[#allocation57_spill] sm:$0xff] %v7680_v43 }
0x184a   :  { %5889 = vmatprep.subr.bf16.mxu0 %v7654_v32  ;;  %v7672_v44 = vpack.c.bf16 %v3081_v2, %v3079_v41  ;;  %v7692_v2 = vld [vmem:[%s8338_s3 + $0xc8] ss:$0 sm:$0xff] }
0x184c   :  { %8488 = vst [vmem:[#allocation56_spill] sm:$0xff] %v7672_v44 }
0x184d   :  { %5891 = vmatpush1.bf16.msra.mxu0 %v7662_v19  ;;  %v7685_v19 = vpop.permute.xlu1 %2737 }
0x184e   :  { %5893 = vmatprep.subr.bf16.mxu0 %v7672_v44  ;;  %vm2764_vm14 = vcmp.eq.s32.totalorder %v7685_v19, 1 }
0x1851   :  { %5895 = vmatpush1.bf16.msra.mxu0 %v7680_v43  ;;  %v7687_v41 = vpop.permute.xlu1 %2640 }
0x1852   :  { %5993 = vmatprep.subr.bf16.mxu0 %v6967_v5 }
0x1855   :  { %v7694_v32 = vpop.permute.xlu1 %2728 }
0x1856   :  { %8490 = vst [vmem:[#allocation58_spill] sm:$0xff] %v7694_v32  ;;  %vm8407_vm9 = vcmp.eq.s32.totalorder %v7694_v32, 1 }
0x1859   :  { %v7699_v47 = vpop.permute.xlu1 %2740 }
0x185a   :  { %8491 = vst [vmem:[#allocation59_spill] sm:$0xff] %v7699_v47  ;;  %vm8426_vm13 = vcmp.eq.s32.totalorder %v7699_v47, 1 }
0x1890   :  { %v5610_v10 = vpop.f32.mrb[12].mxu0 }
0x1891   :  { %v2409_v51 = vadd.f32 %v5610_v10, %v7692_v2  ;;  %v2403_v4 = vpop.f32.mrb[13].mxu0 }
0x1892   :  { %v2404_v44 = vadd.f32 %v7692_v2, %v2403_v4 }
0x1893   :  { %v5228_v43 = vmul.f32 -1.442695, %v2409_v51 }
0x1894   :  { %v5227_v42 = vmul.f32 -1.442695, %v2404_v44  ;;  %v5613_v7 = vpop.f32.mrb[14].mxu0 }
0x1895   :  { %6158 = vpow2.f32 %v5228_v43  ;;  %v2419_v40 = vadd.f32 %v5613_v7, %v7692_v2  ;;  %v2413_v9 = vpop.f32.mrb[15].mxu0  ;;  %v7704_v43 = vpop.permute.xlu1 %2645 }
0x1896   :  { %6160 = vpow2.f32 %v5227_v42  ;;  %v2414_v58 = vadd.f32 %v7692_v2, %v2413_v9 }
0x1897   :  { %v5230_v50 = vmul.f32 -1.442695, %v2419_v40 }
0x1898   :  { %v5229_v33 = vmul.f32 -1.442695, %v2414_v58  ;;  %v5616_v24 = vpop.f32.mrb[16].mxu0 }
0x1899   :  { %6162 = vpow2.f32 %v5230_v50  ;;  %v2429_v10 = vadd.f32 %v5616_v24, %v7692_v2  ;;  %v2423_v11 = vpop.f32.mrb[17].mxu0  ;;  %v7708_v50 = vpop.permute.xlu0 %2734 }
0x189a   :  { %6164 = vpow2.f32 %v5229_v33  ;;  %v2424_v44 = vadd.f32 %v7692_v2, %v2423_v11  ;;  %8492 = vst [vmem:[#allocation60_spill] sm:$0xff] %v7708_v50  ;;  %vm8410_vm11 = vcmp.eq.s32.totalorder %v7708_v50, 1 }
0x189b   :  { %v5232_v51 = vmul.f32 -1.442695, %v2429_v10 }
0x189c   :  { %v5231_v7 = vmul.f32 -1.442695, %v2424_v44  ;;  %v5619_v4 = vpop.f32.mrb[18].mxu0 }
0x189d   :  { %6166 = vpow2.f32 %v5232_v51  ;;  %v2439_v42 = vadd.f32 %v5619_v4, %v7692_v2  ;;  %v2433_v13 = vpop.f32.mrb[19].mxu0  ;;  %v7711_v51 = vpop.permute.xlu1 %2743 }
0x189e   :  { %6168 = vpow2.f32 %v5231_v7  ;;  %v2434_v58 = vadd.f32 %v7692_v2, %v2433_v13 }
0x189f   :  { %v6159_v9 = vpop.eup %6158  ;;  %v5234_v24 = vmul.f32 -1.442695, %v2439_v42 }
0x18a0   :  { %v6161_v40 = vpop.eup %6160  ;;  %v2531_v33 = vadd.f32 1.0, %v6159_v9  ;;  %v5233_v53 = vmul.f32 -1.442695, %v2434_v58  ;;  %v5622_v11 = vpop.f32.mrb[20].mxu0 }
0x18a1   :  { %v2530_v10 = vadd.f32 1.0, %v6161_v40  ;;  %6170 = vpow2.f32 %v5234_v24  ;;  %v2449_v44 = vadd.f32 %v5622_v11, %v7692_v2  ;;  %v2443_v38 = vpop.f32.mrb[21].mxu0  ;;  %v7714_v58 = vpop.permute.xlu0 %2615 }
0x18a2   :  { %6172 = vrcp.f32 %v2531_v33  ;;  %v2444_v7 = vadd.f32 %v7692_v2, %v2443_v38  ;;  %8493 = vst [vmem:[#allocation61_spill] sm:$0xff] %v7714_v58 }
0x18a3   :  { %v6163_v4 = vpop.eup %6162  ;;  %6174 = vrcp.f32 %v2530_v10  ;;  %v5236_v13 = vmul.f32 -1.442695, %v2449_v44  ;;  %v7718_v44 = vpop.permute.xlu1 %2650 }
0x18a4   :  { %v6165_v14 = vpop.eup %6164  ;;  %v2533_v20 = vadd.f32 1.0, %v6163_v4  ;;  %6176 = vpow2.f32 %v5233_v53  ;;  %v5235_v42 = vmul.f32 -1.442695, %v2444_v7  ;;  %v5625_v9 = vpop.f32.mrb[22].mxu0 }
0x18a5   :  { %v2532_v40 = vadd.f32 1.0, %v6165_v14  ;;  %6178 = vpow2.f32 %v5236_v13  ;;  %v2459_v24 = vadd.f32 %v5625_v9, %v7692_v2  ;;  %v2453_v11 = vpop.f32.mrb[23].mxu0 }
0x18a6   :  { %6180 = vrcp.f32 %v2533_v20  ;;  %v2454_v33 = vadd.f32 %v7692_v2, %v2453_v11  ;;  %v7722_v11 = vpop.permute.xlu0 %2635 }
0x18a7   :  { %v6167_v54 = vpop.eup %6166  ;;  %6182 = vrcp.f32 %v2532_v40  ;;  %v5238_v38 = vmul.f32 -1.442695, %v2459_v24  ;;  %8494 = vst [vmem:[#allocation62_spill] sm:$0xff] %v7722_v11 }
0x18a8   :  { %v6169_v10 = vpop.eup %6168  ;;  %v2535_v4 = vadd.f32 1.0, %v6167_v54  ;;  %6184 = vpow2.f32 %v5235_v42  ;;  %v5237_v53 = vmul.f32 -1.442695, %v2454_v33  ;;  %v5628_v7 = vpop.f32.mrb[24].mxu0 }
0x18a9   :  { %v2534_v1 = vadd.f32 1.0, %v6169_v10  ;;  %6186 = vpow2.f32 %v5238_v38  ;;  %v2469_v14 = vadd.f32 %v5628_v7, %v7692_v2  ;;  %v2463_v13 = vpop.f32.mrb[25].mxu0 }
0x18aa   :  { %6188 = vrcp.f32 %v2535_v4  ;;  %v2464_v20 = vadd.f32 %v7692_v2, %v2463_v13 }
0x18ab   :  { %v6171_v9 = vpop.eup %6170  ;;  %6190 = vrcp.f32 %v2534_v1  ;;  %v5240_v40 = vmul.f32 -1.442695, %v2469_v14  ;;  %v7729_v1 = vpop.permute.xlu1 %2746 }
0x18ac   :  { %v6173_v24 = vpop.eup %6172  ;;  %v2537_v54 = vadd.f32 1.0, %v6171_v9  ;;  %6192 = vpow2.f32 %v5237_v53  ;;  %v5239_v42 = vmul.f32 -1.442695, %v2464_v20  ;;  %v5631_v33 = vpop.f32.mrb[26].mxu0  ;;  %vm2767_vm15 = vcmp.eq.s32.totalorder %v7729_v1, 1 }
0x18ad   :  { %v6175_v10 = vpop.eup %6174  ;;  %v2659_v38 = vmul.f32 %v6173_v24, %v7343_v37  ;;  %6194 = vpow2.f32 %v5240_v40  ;;  %v2479_v4 = vadd.f32 %v5631_v33, %v7692_v2  ;;  %v2473_v7 = vpop.f32.mrb[27].mxu0 }
0x18ae   :  { %v6177_v13 = vpop.eup %6176  ;;  %v2658_v14 = vmul.f32 %v6175_v10, %v7339_v15  ;;  %6196 = vrcp.f32 %v2537_v54  ;;  %v2474_v53 = vadd.f32 %v7692_v2, %v2473_v7  ;;  %v7739_v54 = vpop.permute.xlu0 %2725 }
0x18af   :  { %v6179_v20 = vpop.eup %6178  ;;  %v2771_v9 = vsel %vm2755_vm4, -1e+11, %v2659_v38  ;;  %v2536_v63 = vadd.f32 1.0, %v6177_v13  ;;  %6198 = vpow2.f32 %v5239_v42  ;;  %v5242_v40 = vmul.f32 -1.442695, %v2479_v4  ;;  %8495 = vst [vmem:[#allocation63_spill] sm:$0xff] %v7739_v54 }
0x18b0   :  { %v6181_v24 = vpop.eup %6180  ;;  %v2792_v33 = vrot.slane %v2771_v9, 4  ;;  %v2770_v37 = vsel %vm2754_vm0, -1e+11, %v2658_v14  ;;  %v2539_v25 = vadd.f32 1.0, %v6179_v20  ;;  %v5241_v7 = vmul.f32 -1.442695, %v2474_v53 }
0x18b1   :  { %v6183_v26 = vpop.eup %6182  ;;  %v2786_v2 = vrot.slane %v2770_v37, 4  ;;  %v2661_v10 = vmul.f32 %v6181_v24, %v7359_v60  ;;  %6200 = vrcp.f32 %v2536_v63  ;;  %v7747_v24 = vpop.permute.xlu1 %2749  ;;  %vm8409_vm10 = vcmp.eq.s32.totalorder %v7739_v54, 1 }
0x18b2   :  { %v6185_v38 = vpop.eup %6184  ;;  %v2793_v42 = vmax.f32 %v2771_v9, %v2792_v33  ;;  %v2660_v4 = vmul.f32 %v6183_v26, %v7347_v39  ;;  %6202 = vrcp.f32 %v2539_v25 }
0x18b3   :  { %v6187_v13 = vpop.eup %6186  ;;  %v2787_v14 = vmax.f32 %v2770_v37, %v2786_v2  ;;  %v2773_v20 = vsel %vm8428_vm1, -1e+11, %v2661_v10  ;;  %v2538_v61 = vadd.f32 1.0, %v6185_v38  ;;  %6204 = vpow2.f32 %v5242_v40  ;;  %v1973_v37 = vpop.xlane.xlu0 %1972 }
0x18b4   :  { %v6189_v56 = vpop.eup %6188  ;;  %v2794_v63 = vrot.slane %v2793_v42, 2  ;;  %v2804_v60 = vrot.slane %v2773_v20, 4  ;;  %v2772_v15 = vsel %vm8418_vm5, -1e+11, %v2660_v4  ;;  %v2541_v9 = vadd.f32 1.0, %v6187_v13 }
0x18b5   :  { %v6191_v33 = vpop.eup %6190  ;;  %v2788_v26 = vrot.slane %v2787_v14, 2  ;;  %v2798_v25 = vrot.slane %v2772_v15, 4  ;;  %6206 = vrcp.f32 %v2538_v61  ;;  %v2663_v2 = vmul.f32 %v6189_v56, %v7349_v27 }
0x18b6   :  { %v6193_v53 = vpop.eup %6192  ;;  %v2795_v40 = vmax.f32 %v2793_v42, %v2794_v63  ;;  %v2662_v10 = vmul.f32 %v6191_v33, %v7341_v36  ;;  %6208 = vrcp.f32 %v2541_v9  ;;  %v2805_v39 = vmax.f32 %v2773_v20, %v2804_v60  ;;  %v1971_v0 = vpop.xlane.xlu1 %1970 }
0x18b7   :  { %v6195_v38 = vpop.eup %6194  ;;  %v2789_v57 = vmax.f32 %v2787_v14, %v2788_v26  ;;  %v2799_v4 = vmax.f32 %v2772_v15, %v2798_v25  ;;  %v2540_v13 = vadd.f32 1.0, %v6193_v53  ;;  %6210 = vpow2.f32 %v5241_v7 }
0x18b8   :  { %v6197_v23 = vpop.eup %6196  ;;  %v2774_v61 = vsel %vm8412_vm7, -1e+11, %v2662_v10  ;;  %v2543_v28 = vadd.f32 1.0, %v6195_v38  ;;  %6212 = vrcp.f32 %v1973_v37  ;;  %v2796_v60 = vrot.slane %v2795_v40, 1 }
0x18b9   :  { %v6199_v18 = vpop.eup %6198  ;;  %v2800_v56 = vrot.slane %v2799_v4, 2  ;;  %v2810_v42 = vrot.slane %v2774_v61, 4  ;;  %6214 = vrcp.f32 %v2540_v13  ;;  %v2665_v63 = vmul.f32 %v6197_v23, %v7714_v58 }
0x18ba   :  { %6216 = vrcp.f32 %v2543_v28  ;;  %v2542_v15 = vadd.f32 1.0, %v6199_v18  ;;  %v2790_v7 = vrot.slane %v2789_v57, 1  ;;  %v2775_v20 = vsel %vm8408_vm8, -1e+11, %v2663_v2 }
0x18bb   :  { %v6201_v14 = vpop.eup %6200  ;;  %6218 = vrcp.f32 %v1971_v0  ;;  %v7764_v9 = vsel %vm8407_vm9, -1e+11, %v2665_v63  ;;  %v2801_v33 = vmax.f32 %v2799_v4, %v2800_v56  ;;  %v7769_v28 = vmax.f32 %v2795_v40, %v2796_v60 }
0x18bc   :  { %v6203_v26 = vpop.eup %6202  ;;  %6220 = vrcp.f32 %v2542_v15  ;;  %v2664_v23 = vmul.f32 %v6201_v14, %v7365_v30  ;;  %v7767_v25 = vmax.f32 %v2789_v57, %v2790_v7  ;;  %v2806_v53 = vrot.slane %v2805_v39, 2 }
0x18bd   :  { %v6205_v18 = vpop.eup %6204  ;;  %v2667_v0 = vmul.f32 %v6203_v26, %v7357_v3  ;;  %v2802_v37 = vrot.slane %v2801_v33, 1  ;;  %v2811_v2 = vmax.f32 %v2774_v61, %v2810_v42  ;;  %v2816_v4 = vrot.slane %v2775_v20, 4 }
0x18be   :  { %v2545_v10 = vadd.f32 1.0, %v6205_v18  ;;  %v2776_v38 = vsel %vm8409_vm10, -1e+11, %v2664_v23  ;;  %v2828_v13 = vrot.slane %v7764_v9, 4  ;;  %v2807_v63 = vmax.f32 %v2805_v39, %v2806_v53  ;;  %v7784_v23 = vpop.permute.xlu1 %2752 }
0x18bf   :  { %v6207_v56 = vpop.eup %6206  ;;  %v2779_v57 = vsel %vm8410_vm11, -1e+11, %v2667_v0  ;;  %v7779_v40 = vmax.f32 %v2801_v33, %v2802_v37  ;;  %v2812_v15 = vrot.slane %v2811_v2, 2  ;;  %vm2997_vm9 = vcmask 1042434  }
0x18c0   :  { %v6209_v7 = vpop.eup %6208  ;;  %vm2766_vm8 = vcmp.eq.s32.totalorder %v7711_v51, 1  ;;  %v2840_v61 = vrot.slane %v2779_v57, 4  ;;  %v2666_v42 = vmul.f32 %v6207_v56, %v7353_v59  ;;  %6222 = vrcp.f32 %v2545_v10 }
0x18c1   :  { %v2817_v60 = vmax.f32 %v2775_v20, %v2816_v4  ;;  %vm2999_vm10 = vcmask 1043459   ;;  %v6211_v14 = vpop.eup %6210  ;;  %v2669_v26 = vmul.f32 %v6209_v7, %v7722_v11  ;;  %v2808_v18 = vrot.slane %v2807_v63, 1 }
0x18c2   :  { %v2813_v33 = vmax.f32 %v2811_v2, %v2812_v15  ;;  %v2822_v0 = vrot.slane %v2776_v38, 4  ;;  %vm3001_vm11 = vcmask 1044484   ;;  %v7786_v39 = vpop.eup %6212  ;;  %v2841_v37 = vmax.f32 %v2779_v57, %v2840_v61 }
0x18c3   :  { %v2778_v53 = vsel %vm8427_vm12, -1e+11, %v2666_v42  ;;  %v2544_v50 = vadd.f32 1.0, %v6211_v14  ;;  %v2818_v56 = vrot.slane %v2817_v60, 2  ;;  %vm3003_vm7 = vcmask 1045509   ;;  %v6215_v20 = vpop.eup %6214 }
0x18c4   :  { %v2834_v10 = vrot.slane %v2778_v53, 4  ;;  %v2781_v4 = vsel %vm8426_vm13, -1e+11, %v2669_v26  ;;  %v2809_v7 = vmax.f32 %v2807_v63, %v2808_v18  ;;  %v2814_v11 = vrot.slane %v2813_v33, 1  ;;  %v6217_v59 = vpop.eup %6216 }
0x18c5   :  { %v2842_v2 = vrot.slane %v2841_v37, 2  ;;  %v2852_v15 = vrot.slane %v2781_v4, 4  ;;  %v2668_v54 = vmul.f32 %v6215_v20, %v7369_v34  ;;  %6224 = vrcp.f32 %v2544_v50  ;;  %v6219_v57 = vpop.eup %6218 }
0x18c6   :  { %vm2769_vm5 = vcmp.eq.s32.totalorder %v7784_v23, 1  ;;  %v2835_v61 = vmax.f32 %v2778_v53, %v2834_v10  ;;  %v2671_v42 = vmul.f32 %v6217_v59, %v7704_v43  ;;  %v2815_v14 = vmax.f32 %v2813_v33, %v2814_v11  ;;  %v6221_v3 = vpop.eup %6220  ;;  %v7810_v10 = vpop.permute.xlu0 %2655 }
0x18c7   :  { %v2819_v48 = vmax.f32 %v2817_v60, %v2818_v56  ;;  %v2843_v32 = vmax.f32 %v2841_v37, %v2842_v2  ;;  %v2853_v47 = vmax.f32 %v2781_v4, %v2852_v15  ;;  %v2780_v63 = vsel %vm2764_vm14, -1e+11, %v2668_v54 }
0x18c8   :  { %v7798_v26 = vmul.f32 %v6219_v57, %v7474_v31  ;;  %v2836_v18 = vrot.slane %v2835_v61, 2  ;;  %v2846_v20 = vrot.slane %v2780_v63, 4  ;;  %v2670_v50 = vmul.f32 %v6221_v3, %v7687_v41 }
0x18c9   :  { %v2820_v34 = vrot.slane %v2819_v48, 1  ;;  %vm3005_vm13 = vcmask 1046534   ;;  %vm2768_vm12 = vcmp.eq.s32.totalorder %v7747_v24, 1  ;;  %v2823_v59 = vmax.f32 %v2776_v38, %v2822_v0 }
0x18ca   :  { %v2829_v11 = vmax.f32 %v7764_v9, %v2828_v13  ;;  %v2996_v60 = vsel %vm298_vm2, %v7769_v28, %v7767_v25  ;;  %vm3007_vm1 = vcmask 1047559   ;;  %v2783_v31 = vsel %vm2767_vm15, -1e+11, %v2671_v42  ;;  %v6223_v53 = vpop.eup %6222 }
0x18cb   :  { %v2837_v54 = vmax.f32 %v2835_v61, %v2836_v18  ;;  %v2847_v33 = vmax.f32 %v2780_v63, %v2846_v20  ;;  %v2782_v3 = vsel %vm2766_vm8, -1e+11, %v2670_v50  ;;  %v2821_v37 = vmax.f32 %v2819_v48, %v2820_v34 }
0x18cc   :  { %v2858_v56 = vrot.slane %v2782_v3, 4  ;;  %v2824_v38 = vrot.slane %v2823_v59, 2  ;;  %v2830_v9 = vrot.slane %v2829_v11, 2  ;;  %v2998_v13 = vsel %vm2997_vm9, %v7779_v40, %v2996_v60 }
0x18cd   :  { %v2848_v25 = vrot.slane %v2847_v33, 2  ;;  %v2673_v28 = vmul.f32 %v6223_v53, %v7810_v10  ;;  %v3000_v0 = vsel %vm2999_vm10, %v2809_v7, %v2998_v13  ;;  %v2838_v4 = vrot.slane %v2837_v54, 1 }
0x18ce   :  { %v2825_v2 = vmax.f32 %v2823_v59, %v2824_v38  ;;  %v2831_v15 = vmax.f32 %v2829_v11, %v2830_v9  ;;  %v3002_v57 = vsel %vm3001_vm11, %v2815_v14, %v3000_v0  ;;  %v2844_v48 = vrot.slane %v2843_v32, 1 }
0x18cf   :  { %v2785_v34 = vsel %vm2769_vm5, -1e+11, %v2673_v28  ;;  %v3004_v61 = vsel %vm3003_vm7, %v2821_v37, %v3002_v57  ;;  %v2839_v42 = vmax.f32 %v2837_v54, %v2838_v4  ;;  %v2849_v63 = vmax.f32 %v2847_v33, %v2848_v25  ;;  %v6225_v18 = vpop.eup %6224 }
0x18d0   :  { %v2876_v40 = vrot.slane %v2785_v34, 4  ;;  %v2826_v20 = vrot.slane %v2825_v2, 1  ;;  %v2832_v50 = vrot.slane %v2831_v15, 1  ;;  %v2845_v60 = vmax.f32 %v2843_v32, %v2844_v48 }
0x18d1   :  { %v2672_v7 = vmul.f32 %v6225_v18, %v7718_v44  ;;  %v2850_v53 = vrot.slane %v2849_v63, 1  ;;  %v2854_v59 = vrot.slane %v2853_v47, 2  ;;  %v2859_v11 = vmax.f32 %v2782_v3, %v2858_v56 }
0x18d2   :  { %v2877_v38 = vmax.f32 %v2785_v34, %v2876_v40  ;;  %v2827_v14 = vmax.f32 %v2825_v2, %v2826_v20  ;;  %v2833_v9 = vmax.f32 %v2831_v15, %v2832_v50  ;;  %v2864_v13 = vrot.slane %v2783_v31, 4 }
0x18d3   :  { %v2784_v28 = vsel %vm2768_vm12, -1e+11, %v2672_v7  ;;  %v2851_v37 = vmax.f32 %v2849_v63, %v2850_v53  ;;  %v2855_v54 = vmax.f32 %v2853_v47, %v2854_v59  ;;  %v2860_v33 = vrot.slane %v2859_v11, 2 }
0x18d4   :  { %v2878_v25 = vrot.slane %v2877_v38, 2  ;;  %v3006_v0 = vsel %vm3005_vm13, %v2827_v14, %v3004_v61  ;;  %v2865_v4 = vmax.f32 %v2783_v31, %v2864_v13  ;;  %v2870_v32 = vrot.slane %v2784_v28, 4  ;;  %v5246_v13 = vld [vmem:[%s8341_s4 + $0x250] ss:$8 sm:$0x3] }
0x18d5   :  { %v3008_v57 = vsel %vm3007_vm1, %v2833_v9, %v3006_v0  ;;  %v2856_v48 = vrot.slane %v2855_v54, 1  ;;  %v2861_v18 = vmax.f32 %v2859_v11, %v2860_v33  ;;  %v3009_v3 = vsel %vm298_vm2, %v2845_v60, %v2839_v42 }
0x18d6   :  { %3159 = vmatprep.mubr.f32.mxu0 %v3008_v57  ;;  %v2866_v56 = vrot.slane %v2865_v4, 2  ;;  %v2871_v2 = vmax.f32 %v2784_v28, %v2870_v32  ;;  %v3010_v15 = vsel %vm2997_vm9, %v2851_v37, %v3009_v3  ;;  %v2879_v34 = vmax.f32 %v2877_v38, %v2878_v25 }
0x18d7   :  { %3160 = vmatmul.mubr.f32.vlgmr.msra.gmra.mrb[28].mxu0 %v7798_v26  ;;  %v2857_v47 = vmax.f32 %v2855_v54, %v2856_v48  ;;  %v2862_v63 = vrot.slane %v2861_v18, 1  ;;  %v1977_v9 = vmul.f32 %v7786_v39, %v7435_v45  ;;  %v7842_v28 = vrot.slane %v5246_v13, %v7019_v46 }
0x18d8   :  { %v2867_v40 = vmax.f32 %v2865_v4, %v2866_v56  ;;  %v2872_v61 = vrot.slane %v2871_v2, 2  ;;  %5995 = vmatpush3.bf16.msra.mxu0 %v6967_v5  ;;  %v2880_v60 = vrot.slane %v2879_v34, 1  ;;  %v3247_v56 = vpop.permute.xlu0 %3246 }
0x18d9   :  { %v2863_v31 = vmax.f32 %v2861_v18, %v2862_v63  ;;  %v3011_v20 = vsel %vm2999_vm10, %v2857_v47, %v3010_v15  ;;  %5997 = vmatprep.subr.bf16.mxu0 %v6987_v8 }
0x18da   :  { %v2868_v42 = vrot.slane %v2867_v40, 1  ;;  %v2873_v50 = vmax.f32 %v2871_v2, %v2872_v61  ;;  %v2881_v38 = vmax.f32 %v2879_v34, %v2880_v60  ;;  %v3189_v2 = vpop.permute.xlu1 %3188 }
0x18db   :  { %v3012_v7 = vsel %vm3001_vm11, %v2863_v31, %v3011_v20 }
0x18dc   :  { %v2869_v53 = vmax.f32 %v2867_v40, %v2868_v42  ;;  %v2874_v59 = vrot.slane %v2873_v50, 1  ;;  %5999 = vmatpush3.bf16.msra.mxu0 %v6987_v8  ;;  %v2978_v40 = vadd.f32 %v7211_v55, %v7534_v35  ;;  %v8496_v55 = vsub.s32 1, %v7003_v6 }
0x18de   :  { %v2875_v26 = vmax.f32 %v2873_v50, %v2874_v59  ;;  %v3013_v11 = vsel %vm3003_vm7, %v2869_v53, %v3012_v7  ;;  %v3191_v63 = vpop.permute.xlu1 %3190  ;;  %v7863_v59 = vrot.slane %v5246_v13, %v8496_v55 }
0x18e0   :  { %v3014_v5 = vsel %vm3005_vm13, %v2875_v26, %v3013_v11 }
0x18e1   :  { %v3015_v14 = vsel %vm3007_vm1, %v2881_v38, %v3014_v5 }
0x18e2   :  { %3165 = vmatprep.mubr.f32.mxu0 %v3015_v14 }
0x18e3   :  { %3166 = vmatmul.mubr.f32.gmra.mrb[30].mxu0 %v1977_v9 }
0x19aa   :  { %v3161_v8 = vpop.f32.mrb[28].mxu0 }
0x19ab   :  { %v3162_v37 = vadd.f32 %v3161_v8, %v7842_v28  ;;  %v3163_v54 = vpop.f32.mrb[29].mxu0 }
0x19ac   :  { %v3164_v11 = vadd.f32 %v3163_v54, %v7863_v59 }
0x19ad   :  { %v3172_v33 = vadd.f32 %v3162_v37, %v7580_v22 }
0x19af   :  { %v5247_v25 = vmul.f32 -1.442695, %v3172_v33 }
0x19b1   :  { %6226 = vpow2.f32 %v5247_v25 }
0x19b6   :  { %v3167_v0 = vpop.f32.mrb[30].mxu0 }
0x19b7   :  { %v3168_v45 = vadd.f32 %v3167_v0, %v7842_v28  ;;  %v3169_v39 = vpop.f32.mrb[31].mxu0 }
0x19b8   :  { %v3170_v5 = vadd.f32 %v3169_v39, %v7863_v59 }
0x19b9   :  { %v3173_v4 = vadd.f32 %v3168_v45, %v7604_v12 }
0x19bb   :  { %v6227_v32 = vpop.eup %6226  ;;  %v5248_v57 = vmul.f32 -1.442695, %v3173_v4 }
0x19bc   :  { %v3180_v48 = vadd.f32 1.0, %v6227_v32 }
0x19bd   :  { %6228 = vpow2.f32 %v5248_v57 }
0x19be   :  { %6230 = vrcp.f32 %v3180_v48 }
0x19c7   :  { %v6229_v18 = vpop.eup %6228 }
0x19c8   :  { %v6231_v3 = vpop.eup %6230  ;;  %v3181_v15 = vadd.f32 1.0, %v6229_v18  ;;  %v3230_v18 = vadd.f32 %v3164_v11, %v7558_v62 }
0x19c9   :  { %v3194_v34 = vmul.f32 %v6231_v3, %v3189_v2  ;;  %v3252_v22 = vmul.f32 %v6231_v3, %v3247_v56  ;;  %v3231_v56 = vadd.f32 %v3170_v5, %v2978_v40 }
0x19ca   :  { %6232 = vrcp.f32 %v3181_v15 }
0x19cb   :  { %3198 = vrot.lane.b32.xlu1 %v3194_v34, %s6429_s22  ;;  %3256 = vrot.lane.b32.xlu0 %v3252_v22, %s6429_s22  ;;  %v5250_v2 = vmul.f32 -1.442695, %v3231_v56 }
0x19d4   :  { %v6233_v47 = vpop.eup %6232 }
0x19d5   :  { %v3195_v12 = vmul.f32 %v6233_v47, %v3191_v63 }
0x19d7   :  { %3200 = vrot.lane.b32.xlu1 %v3195_v12, %s6429_s22 }
0x19db   :  { %3248 = vrot.lane.b32.xlu1 %v2978_v40, %s6429_s22 }
0x1a3d   :  { %v3199_v61 = vpop.permute.xlu1 %3198  ;;  %v3257_v26 = vpop.permute.xlu0 %3256 }
0x1a3e   :  { %v3204_v31 = vadd.f32 %v3199_v61, %v3162_v37  ;;  %v3262_v38 = vadd.f32 %v3257_v26, %v3164_v11  ;;  %v3208_v37 = vsub.f32 1.0, %v6231_v3 }
0x1a40   :  { %6234 = vtanh.f32 %v3204_v31 }
0x1a49   :  { %v3201_v20 = vpop.permute.xlu1 %3200 }
0x1a4a   :  { %v6235_v42 = vpop.eup %6234  ;;  %v3205_v50 = vadd.f32 %v3201_v20, %v3168_v45  ;;  %v3209_v45 = vsub.f32 1.0, %v6233_v47 }
0x1a4b   :  { %3212 = vrot.lane.b32.xlu0 %v6235_v42, %s6431_s24 }
0x1a4c   :  { %6236 = vtanh.f32 %v3205_v50 }
0x1a4d   :  { %v3249_v60 = vpop.permute.xlu1 %3248  ;;  %6238 = vtanh.f32 %v3262_v38 }
0x1a4e   :  { %v3253_v7 = vmul.f32 %v6233_v47, %v3249_v60 }
0x1a50   :  { %3258 = vrot.lane.b32.xlu1 %v3253_v7, %s6429_s22 }
0x1a54   :  { %3220 = vrot.lane.b32.xlu1 %v7116_v29, %s6430_s23 }
0x1a56   :  { %v6237_v53 = vpop.eup %6236 }
0x1a57   :  { %3214 = vrot.lane.b32.xlu0 %v6237_v53, %s6431_s24  ;;  %v6239_v48 = vpop.eup %6238 }
0x1a58   :  { %3222 = vrot.lane.b32.xlu1 %v7126_v16, %s6430_s23 }
0x1abd   :  { %v3213_v9 = vpop.permute.xlu0 %3212 }
0x1abe   :  { %v3218_v25 = vmul.f32 %v3213_v9, %v3208_v37  ;;  %v8499_v9 = vld [vmem:[#allocation3_spill] sm:$0xff] }
0x1ac2   :  { %v3259_v14 = vpop.permute.xlu1 %3258 }
0x1ac3   :  { %v3263_v8 = vadd.f32 %v3259_v14, %v3170_v5  ;;  %v8497_v5 = vld [vmem:[#allocation8_spill] sm:$0xff] }
0x1ac5   :  { %6240 = vtanh.f32 %v3263_v8 }
0x1ac6   :  { %v3221_v33 = vpop.permute.xlu1 %3220 }
0x1ac7   :  { %v3226_v0 = vmul.f32 %v6231_v3, %v3221_v33  ;;  %v5249_v3 = vmul.f32 -1.442695, %v3230_v18  ;;  %v6420_v33 = vld [vmem:[%s8338_s3 + $0xa0] ss:$0 sm:$0xff] }
0x1ac9   :  { %v3228_v4 = vadd.f32 %v3226_v0, %v3218_v25  ;;  %v3215_v6 = vpop.permute.xlu0 %3214  ;;  %6242 = vpow2.f32 %v5249_v3 }
0x1aca   :  { %v3219_v13 = vmul.f32 %v3215_v6, %v3209_v45  ;;  %v3223_v32 = vpop.permute.xlu1 %3222  ;;  %6244 = vpow2.f32 %v5250_v2  ;;  %v6421_v45 = vld [vmem:[%s8338_s3 + $0x78] ss:$0 sm:$0xff] }
0x1acb   :  { %v3227_v57 = vmul.f32 %v6233_v47, %v3223_v32  ;;  %3286 = vrot.lane.b32.xlu0 %v3228_v4, %s6431_s24 }
0x1acd   :  { %v3229_v54 = vadd.f32 %v3227_v57, %v3219_v13 }
0x1acf   :  { %3270 = vrot.lane.b32.xlu0 %v6239_v48, %s6431_s24  ;;  %3288 = vrot.lane.b32.xlu1 %v3229_v54, %s6431_s24  ;;  %v6241_v39 = vpop.eup %6240  ;;  %v8501_v54 = vld [vmem:[#allocation4_spill] sm:$0xff] }
0x1ad3   :  { %3272 = vrot.lane.b32.xlu1 %v6241_v39, %s6431_s24  ;;  %v6243_v15 = vpop.eup %6242 }
0x1ad4   :  { %v3238_v34 = vadd.f32 1.0, %v6243_v15  ;;  %v6245_v22 = vpop.eup %6244 }
0x1ad5   :  { %v3239_v47 = vadd.f32 1.0, %v6245_v22 }
0x1ad6   :  { %6246 = vrcp.f32 %v3238_v34 }
0x1ad7   :  { %6248 = vrcp.f32 %v3239_v47 }
0x1ae0   :  { %v6247_v63 = vpop.eup %6246 }
0x1ae1   :  { %v3266_v61 = vsub.f32 1.0, %v6247_v63  ;;  %v6249_v31 = vpop.eup %6248  ;;  %v3278_v62 = vmul.f32 %v6247_v63, %v7116_v29 }
0x1ae2   :  { %v3267_v60 = vsub.f32 1.0, %v6249_v31  ;;  %v3279_v55 = vmul.f32 %v6249_v31, %v7126_v16 }
0x1b3d   :  { %v3287_v12 = vpop.permute.xlu0 %3286 }
0x1b3e   :  { %5640 = vmatprep.mubr.msk.f32.mxu1 %vm139_vm3, %v3287_v12 }
0x1b41   :  { %v3289_v20 = vpop.permute.xlu1 %3288  ;;  %v3271_v42 = vpop.permute.xlu0 %3270 }
0x1b42   :  { %v3276_v40 = vmul.f32 %v3271_v42, %v3266_v61  ;;  %5641 = vmatmul.mubr.msk.f32.vlgmr.msra.gmra.mrb[14].mxu1 %vm139_vm3, %v3289_v20 }
0x1b43   :  { %5907 = vmatpush3.bf16.msra.mxu1 %v6959_v52 }
0x1b44   :  { %v3280_v50 = vadd.f32 %v3278_v62, %v3276_v40  ;;  %5909 = vmatprep.subr.bf16.mxu1 %v6979_v21 }
0x1b45   :  { %v3273_v7 = vpop.permute.xlu1 %3272 }
0x1b46   :  { %v3282_v53 = vadd.f32 %v3280_v50, %v7116_v29  ;;  %v3277_v26 = vmul.f32 %v3273_v7, %v3267_v60  ;;  %5651 = vmatprep.mubr.msk.f32.mxu1 %vm139_vm3, %v3280_v50  ;;  %v8498_v29 = vld [vmem:[#allocation9_spill] sm:$0xff] }
0x1b47   :  { %5911 = vmatpush3.bf16.msra.mxu1 %v6979_v21 }
0x1b48   :  { %v7881_v11 = vadd.f32 %v3287_v12, %v3282_v53  ;;  %v3281_v38 = vadd.f32 %v3279_v55, %v3277_v26  ;;  %5913 = vmatprep.subr.bf16.mxu1 %v8497_v5 }
0x1b4a   :  { %v3283_v52 = vadd.f32 %v3281_v38, %v7126_v16  ;;  %5652 = vmatmul.mubr.msk.f32.vlgmr.msra.gmra.mrb[16].mxu1 %vm139_vm3, %v3281_v38 }
0x1b4b   :  { %5915 = vmatpush3.bf16.msra.mxu1 %v8497_v5 }
0x1b4c   :  { %v7887_v14 = vadd.f32 %v3289_v20, %v3283_v52  ;;  %5917 = vmatprep.subr.bf16.mxu1 %v8498_v29 }
0x1b4f   :  { %5919 = vmatpush3.bf16.msra.mxu1 %v8498_v29 }
0x1b50   :  { %5921 = vmatprep.subr.bf16.mxu1 %v8499_v9 }
0x1c15   :  { %v5642_v21 = vpop.f32.mrb[14].mxu1 }
0x1c16   :  { %v3364_v8 = vpop.f32.mrb[15].mxu1  ;;  %v3370_v6 = vadd.f32 %v6421_v45, %v5642_v21 }
0x1c17   :  { %v3365_v4 = vadd.f32 %v6421_v45, %v3364_v8 }
0x1c18   :  { %v7907_v57 = vsel %vm1865_vm6, %v3370_v6, -1e+30 }
0x1c19   :  { %v7902_v32 = vsel %vm1865_vm6, %v3365_v4, -1e+30  ;;  %v8503_v4 = vld [vmem:[#allocation6_spill] sm:$0xff] }
0x1c1d   :  { %v5653_v37 = vpop.f32.mrb[16].mxu1 }
0x1c1e   :  { %v3471_v16 = vadd.f32 %v6420_v33, %v5653_v37  ;;  %v3465_v25 = vpop.f32.mrb[17].mxu1 }
0x1c1f   :  { %v3466_v0 = vadd.f32 %v6420_v33, %v3465_v25  ;;  %v8502_v25 = vld [vmem:[#allocation5_spill] sm:$0xff] }
0x1c20   :  { %3656 = vrot.lane.b32.xlu1 %v3471_v16, %s6431_s24  ;;  %v3532_v40 = vrot.slane %v3471_v16, %v8501_v54  ;;  %v3525_v29 = vcombine.high %v3471_v16, %v3471_v16 }
0x1c21   :  { %3654 = vrot.lane.b32.xlu0 %v3466_v0, %s6431_s24  ;;  %v3483_v48 = vrot.slane %v3466_v0, %v8501_v54  ;;  %v3476_v39 = vcombine.high %v3466_v0, %v3466_v0 }
0x1c22   :  { %v3540_v9 = vcombine.high %v3532_v40, %v3532_v40  ;;  %v3548_v37 = vrot.slane %v3532_v40, %v8501_v54 }
0x1c23   :  { %v3491_v18 = vcombine.high %v3483_v48, %v3483_v48  ;;  %v3499_v3 = vrot.slane %v3483_v48, %v8501_v54  ;;  %v3490_v56 = vrot.slane %v3476_v39, %v8501_v54  ;;  %v3539_v48 = vrot.slane %v3525_v29, %v8501_v54 }
0x1c24   :  { %v3562_v39 = vrot.slane %v3540_v9, %v8501_v54 }
0x1c25   :  { %v3513_v2 = vrot.slane %v3491_v18, %v8501_v54  ;;  %v3521_v15 = vcombine.high %v3499_v3, %v3499_v3  ;;  %v3492_v34 = vcombine.high %v3490_v56, %v3490_v56  ;;  %v3506_v47 = vrot.slane %v3490_v56, %v8501_v54 }
0x1c26   :  { %v3577_v63 = vrot.slane %v3499_v3, %v7019_v46  ;;  %v3570_v56 = vcombine.high %v3548_v37, %v3548_v37 }
0x1c27   :  { %v3523_v22 = vcombine.high %v3513_v2, %v3513_v2  ;;  %v3581_v12 = vrot.slane %v3513_v2, %v7019_v46  ;;  %v3585_v61 = vrot.slane %v3521_v15, %v7019_v46  ;;  %v3520_v50 = vrot.slane %v3492_v34, %v8501_v54  ;;  %v8504_v15 = vld [vmem:[#allocation7_spill] sm:$0xff] }
0x1c28   :  { %v3522_v7 = vcombine.high %v3506_v47, %v3506_v47  ;;  %v3593_v26 = vrot.slane %v3506_v47, %v7019_v46  ;;  %v3609_v2 = vrot.slane %v3548_v37, %v7019_v46  ;;  %v8505_v47 = vld [vmem:[#allocation10_spill] sm:$0xff]  ;;  %v3617_v40 = vrot.slane %v3570_v56, %v7019_v46  ;;  %v8507_v56 = vld [vmem:[#allocation11_spill] sm:$0xff] }
0x1c29   :  { %v3589_v60 = vrot.slane %v3523_v22, %v7019_v46  ;;  %v3597_v21 = vrot.slane %v3520_v50, %v7019_v46  ;;  %v3524_v8 = vcombine.high %v3520_v50, %v3520_v50 }
0x1c2a   :  { %v3601_v33 = vrot.slane %v3522_v7, %v7019_v46 }
0x1c2b   :  { %v3605_v3 = vrot.slane %v3524_v8, %v7019_v46 }
0x1c40   :  { %3375 = vmax.xlane.f32.xlu0 %v7902_v32 }
0x1c44   :  { %3377 = vmax.xlane.f32.xlu1 %v7907_v57 }
0x1c92   :  { %v3657_v18 = vpop.permute.xlu1 %3656 }
0x1c93   :  { %v3655_v31 = vpop.permute.xlu0 %3654 }
0x1c94   :  { %v3660_v20 = vadd.f32 %v3655_v31, %v3577_v63  ;;  %v3661_v42 = vadd.f32 %v3655_v31, %v3581_v12  ;;  %v3662_v62 = vadd.f32 %v3655_v31, %v3585_v61  ;;  %v3663_v38 = vadd.f32 %v3655_v31, %v3589_v60 }
0x1c95   :  { %v3664_v52 = vadd.f32 %v3655_v31, %v3593_v26  ;;  %v3665_v45 = vadd.f32 %v3655_v31, %v3597_v21  ;;  %v3666_v16 = vadd.f32 %v3655_v31, %v3601_v33  ;;  %v3667_v22 = vadd.f32 %v3655_v31, %v3605_v3 }
0x1c96   :  { %v3676_v53 = vmax.f32 %v3660_v20, 0.0  ;;  %v3677_v55 = vmax.f32 %v3661_v42, 0.0  ;;  %v3678_v5 = vmax.f32 %v3662_v62, 0.0  ;;  %v3679_v0 = vmax.f32 %v3663_v38, 0.0 }
0x1c97   :  { %v3680_v6 = vmax.f32 %v3664_v52, 0.0  ;;  %v3681_v34 = vmax.f32 %v3665_v45, 0.0  ;;  %v3682_v63 = vmax.f32 %v3666_v16, 0.0  ;;  %v3668_v12 = vadd.f32 %v3657_v18, %v3609_v2  ;;  %v8508_v2 = vld [vmem:[#allocation27_spill] sm:$0xff] }
0x1c98   :  { %5662 = vmatprep.mubr.msk.f32.mxu1 %vm139_vm3, %v3676_v53  ;;  %v3541_v61 = vcombine.high %v3539_v48, %v3539_v48  ;;  %v3572_v20 = vcombine.high %v3562_v39, %v3562_v39  ;;  %v3613_v42 = vrot.slane %v3562_v39, %v7019_v46  ;;  %v3555_v62 = vrot.slane %v3539_v48, %v8501_v54 }
0x1c99   :  { %5663 = vmatmul.mubr.msk.f32.vlgmr.msra.gmra.mrb[18].mxu1 %vm139_vm3, %v3677_v55  ;;  %v3683_v50 = vmax.f32 %v3667_v22, 0.0  ;;  %v3684_v7 = vmax.f32 %v3668_v12, 0.0  ;;  %v3670_v31 = vadd.f32 %v3657_v18, %v3617_v40  ;;  %v8506_v3 = vmov 0.0   ;;  %v8512_v22 = vld [vmem:[#allocation31_spill] sm:$0xff]  ;;  %v8515_v12 = vld [vmem:[#allocation34_spill] sm:$0xff]  ;;  %v8518_v40 = vld [vmem:[#allocation37_spill] sm:$0xff] }
0x1c9a   :  { %5665 = vmatprep.mubr.msk.f32.mxu1 %vm139_vm3, %v3678_v5  ;;  %5923 = vmatpush1.bf16.msra.mxu1 %v8502_v25  ;;  %v3669_v60 = vadd.f32 %v3657_v18, %v3613_v42  ;;  %v3569_v53 = vrot.slane %v3541_v61, %v8501_v54  ;;  %v3621_v55 = vrot.slane %v3572_v20, %v7019_v46  ;;  %v8516_v61 = vld [vmem:[#allocation35_spill] sm:$0xff] }
0x1c9b   :  { %5925 = vmatprep.subr.bf16.mxu1 %v8503_v4  ;;  %v3571_v26 = vcombine.high %v3555_v62, %v3555_v62  ;;  %v3625_v38 = vrot.slane %v3555_v62, %v7019_v46  ;;  %v3686_v29 = vmax.f32 %v3670_v31, 0.0  ;;  %v8517_v62 = vld [vmem:[#allocation36_spill] sm:$0xff]  ;;  %v8519_v31 = vld [vmem:[#allocation38_spill] sm:$0xff] }
0x1c9c   :  { %v3685_v5 = vmax.f32 %v3669_v60, 0.0  ;;  %v3671_v52 = vadd.f32 %v3657_v18, %v3621_v55  ;;  %v3629_v21 = vrot.slane %v3569_v53, %v7019_v46  ;;  %v3573_v8 = vcombine.high %v3569_v53, %v3569_v53  ;;  %v8520_v53 = vld [vmem:[#allocation39_spill] sm:$0xff] }
0x1c9d   :  { %5666 = vmatmul.mubr.msk.f32.gmra.mrb[20].mxu1 %vm139_vm3, %v3679_v0  ;;  %v3672_v9 = vadd.f32 %v3657_v18, %v3625_v38  ;;  %v3633_v37 = vrot.slane %v3571_v26, %v7019_v46  ;;  %v8521_v26 = vld [vmem:[#allocation40_spill] sm:$0xff]  ;;  %v8522_v38 = vld [vmem:[#allocation41_spill] sm:$0xff] }
0x1c9e   :  { %5668 = vmatprep.mubr.msk.f32.mxu1 %vm139_vm3, %v3680_v6  ;;  %5927 = vmatpush1.bf16.msra.mxu1 %v8504_v15  ;;  %v3687_v33 = vmax.f32 %v3671_v52, 0.0  ;;  %v3673_v25 = vadd.f32 %v3657_v18, %v3629_v21  ;;  %v3637_v4 = vrot.slane %v3573_v8, %v7019_v46  ;;  %v8510_v15 = vld [vmem:[#allocation29_spill] sm:$0xff]  ;;  %v8527_v21 = vld [vmem:[#allocation47_spill] sm:$0xff]  ;;  %v8528_v8 = vld [vmem:[#allocation48_spill] sm:$0xff] }
0x1c9f   :  { %5929 = vmatprep.subr.bf16.mxu1 %v8505_v47  ;;  %v3688_v0 = vmax.f32 %v3672_v9, 0.0  ;;  %v3674_v45 = vadd.f32 %v3657_v18, %v3633_v37  ;;  %v8513_v47 = vld [vmem:[#allocation32_spill] sm:$0xff]  ;;  %v8529_v37 = vld [vmem:[#allocation49_spill] sm:$0xff] }
0x1ca0   :  { %v3689_v6 = vmax.f32 %v3673_v25, 0.0  ;;  %v3675_v16 = vadd.f32 %v3657_v18, %v3637_v4  ;;  %v8509_v18 = vld [vmem:[#allocation28_spill] sm:$0xff]  ;;  %v8531_v25 = vld [vmem:[#allocation51_spill] sm:$0xff]  ;;  %v8534_v4 = vld [vmem:[#allocation54_spill] sm:$0xff] }
0x1ca1   :  { %5669 = vmatmul.mubr.msk.f32.gmra.mrb[22].mxu1 %vm139_vm3, %v3681_v34  ;;  %v3690_v48 = vmax.f32 %v3674_v45, 0.0  ;;  %v8511_v34 = vld [vmem:[#allocation30_spill] sm:$0xff]  ;;  %v8533_v45 = vld [vmem:[#allocation53_spill] sm:$0xff] }
0x1ca2   :  { %5671 = vmatprep.mubr.msk.f32.mxu1 %vm139_vm3, %v3682_v63  ;;  %v3691_v39 = vmax.f32 %v3675_v16, 0.0  ;;  %v8514_v63 = vld [vmem:[#allocation33_spill] sm:$0xff]  ;;  %v8536_v16 = vld [vmem:[#allocation56_spill] sm:$0xff] }
0x1ca5   :  { %5672 = vmatmul.mubr.msk.f32.gmra.mrb[24].mxu1 %vm139_vm3, %v3683_v50 }
0x1ca6   :  { %5674 = vmatprep.mubr.msk.f32.mxu1 %vm139_vm3, %v3684_v7 }
0x1ca9   :  { %5675 = vmatmul.mubr.msk.f32.gmra.mrb[26].mxu1 %vm139_vm3, %v3685_v5  ;;  %v8524_v5 = vld [vmem:[#allocation43_spill] sm:$0xff] }
0x1caa   :  { %5677 = vmatprep.mubr.msk.f32.mxu1 %vm139_vm3, %v3686_v29  ;;  %v8525_v29 = vld [vmem:[#allocation45_spill] sm:$0xff] }
0x1cad   :  { %5678 = vmatmul.mubr.msk.f32.gmra.mrb[28].mxu1 %vm139_vm3, %v3687_v33  ;;  %v8530_v33 = vld [vmem:[#allocation50_spill] sm:$0xff] }
0x1cae   :  { %5680 = vmatprep.mubr.msk.f32.mxu1 %vm139_vm3, %v3688_v0  ;;  %v8532_v0 = vld [vmem:[#allocation52_spill] sm:$0xff] }
0x1cb1   :  { %5681 = vmatmul.mubr.msk.f32.gmra.mrb[30].mxu1 %vm139_vm3, %v3689_v6  ;;  %v8535_v6 = vld [vmem:[#allocation55_spill] sm:$0xff] }
0x1cb2   :  { %5683 = vmatprep.mubr.msk.f32.mxu1 %vm139_vm3, %v3690_v48  ;;  %v8537_v48 = vld [vmem:[#allocation57_spill] sm:$0xff] }
0x1cb5   :  { %5684 = vmatmul.mubr.msk.f32.gmra.mrb[32].mxu1 %vm139_vm3, %v3691_v39 }
0x1cb6   :  { %4179 = vmatprep.mubr.f32.mxu1 %v8506_v3 }
0x1cb9   :  { %5287 = vmatmul.mubr.msk.f32.vlgmr.msra.gmra.mrb[34].mxu1 %vm139_vm3, %v7881_v11 }
0x1cba   :  { %4185 = vmatprep.mubr.f32.mxu1 %v8506_v3  ;;  %5931 = vmatpush1.bf16.msra.mxu1 %v8507_v56  ;;  %v8006_v3 = vld [vmem:[%s8338_s3 + $0xc8] ss:$0 sm:$0xff] }
0x1cbb   :  { %5933 = vmatprep.subr.bf16.mxu1 %v8508_v2 }
0x1cbd   :  { %5288 = vmatmul.mubr.msk.f32.gmra.mrb[36].mxu1 %vm139_vm3, %v7887_v14 }
0x1cbe   :  { %5935 = vmatpush1.bf16.msra.mxu1 %v8509_v18 }
0x1cbf   :  { %5937 = vmatprep.subr.bf16.mxu1 %v8510_v15 }
0x1cc2   :  { %5939 = vmatpush1.bf16.msra.mxu1 %v8511_v34 }
0x1cc3   :  { %5941 = vmatprep.subr.bf16.mxu1 %v8512_v22 }
0x1cc6   :  { %5943 = vmatpush1.bf16.msra.mxu1 %v8513_v47 }
0x1cc7   :  { %5945 = vmatprep.subr.bf16.mxu1 %v8514_v63 }
0x1cca   :  { %5947 = vmatpush1.bf16.msra.mxu1 %v8515_v12 }
0x1ccb   :  { %5949 = vmatprep.subr.bf16.mxu1 %v8516_v61 }
0x1ccd   :  { %v3376_v20 = vpop.xlane.xlu0 %3375 }
0x1cce   :  { %v3379_v42 = vsub.f32 %v7902_v32, %v3376_v20  ;;  %5951 = vmatpush1.bf16.msra.mxu1 %v8517_v62  ;;  %v8523_v32 = vld [vmem:[#allocation42_spill] sm:$0xff] }
0x1ccf   :  { %5953 = vmatprep.subr.bf16.mxu1 %v8518_v40 }
0x1cd0   :  { %v3381_v50 = vmul.f32 1.442695, %v3379_v42 }
0x1cd1   :  { %v3378_v60 = vpop.xlane.xlu1 %3377 }
0x1cd2   :  { %6250 = vpow2.f32 %v3381_v50  ;;  %v3380_v7 = vsub.f32 %v7907_v57, %v3378_v60  ;;  %5955 = vmatpush1.bf16.msra.mxu1 %v8519_v31  ;;  %v8526_v57 = vld [vmem:[#allocation46_spill] sm:$0xff] }
0x1cd3   :  { %5957 = vmatprep.subr.bf16.mxu1 %v8520_v53 }
0x1cd4   :  { %v3383_v55 = vmul.f32 1.442695, %v3380_v7 }
0x1cd6   :  { %6252 = vpow2.f32 %v3383_v55  ;;  %5959 = vmatpush1.bf16.msra.mxu1 %v8521_v26 }
0x1cd7   :  { %5961 = vmatprep.subr.bf16.mxu1 %v8522_v38 }
0x1cda   :  { %5963 = vmatpush1.bf16.msra.mxu1 %v8523_v32 }
0x1cdb   :  { %5965 = vmatprep.subr.bf16.mxu1 %v8524_v5 }
0x1cdc   :  { %v7984_v52 = vpop.eup %6250 }
0x1cdd   :  { %3385 = vadd.xlane.f32.xlu0 %v7984_v52 }
0x1cde   :  { %5967 = vmatpush1.bf16.msra.mxu1 %v8525_v29 }
0x1cdf   :  { %5969 = vmatprep.subr.bf16.mxu1 %v8526_v57 }
0x1ce0   :  { %v7989_v9 = vpop.eup %6252 }
0x1ce1   :  { %3387 = vadd.xlane.f32.xlu0 %v7989_v9 }
0x1ce2   :  { %5971 = vmatpush1.bf16.msra.mxu1 %v8527_v21 }
0x1ce3   :  { %5973 = vmatprep.subr.bf16.mxu1 %v8528_v8 }
0x1ce6   :  { %5975 = vmatpush1.bf16.msra.mxu1 %v8529_v37 }
0x1ce7   :  { %5977 = vmatprep.subr.bf16.mxu1 %v8530_v33 }
0x1cea   :  { %5979 = vmatpush1.bf16.msra.mxu1 %v8531_v25 }
0x1ceb   :  { %5981 = vmatprep.subr.bf16.mxu1 %v8532_v0 }
0x1cee   :  { %5983 = vmatpush1.bf16.msra.mxu1 %v8533_v45 }
0x1cef   :  { %5985 = vmatprep.subr.bf16.mxu1 %v8534_v4 }
0x1cf2   :  { %5987 = vmatpush1.bf16.msra.mxu1 %v8535_v6 }
0x1cf3   :  { %5989 = vmatprep.subr.bf16.mxu1 %v8536_v16 }
0x1cf6   :  { %5991 = vmatpush1.bf16.msra.mxu1 %v8537_v48 }
0x1d6c   :  { %v5664_v39 = vpop.f32.mrb[18].mxu1 }
0x1d6d   :  { %v3812_v56 = vadd.f32 %v8006_v3, %v5664_v39  ;;  %v3806_v2 = vpop.f32.mrb[19].mxu1 }
0x1d6e   :  { %v3807_v18 = vadd.f32 %v8006_v3, %v3806_v2 }
0x1d6f   :  { %v5272_v15 = vmul.f32 -1.442695, %v3812_v56 }
0x1d70   :  { %v5271_v34 = vmul.f32 -1.442695, %v3807_v18  ;;  %v5667_v22 = vpop.f32.mrb[20].mxu1 }
0x1d71   :  { %6254 = vpow2.f32 %v5272_v15  ;;  %v3822_v47 = vadd.f32 %v8006_v3, %v5667_v22  ;;  %v3816_v63 = vpop.f32.mrb[21].mxu1 }
0x1d72   :  { %6256 = vpow2.f32 %v5271_v34  ;;  %v3817_v12 = vadd.f32 %v8006_v3, %v3816_v63 }
0x1d73   :  { %v5274_v61 = vmul.f32 -1.442695, %v3822_v47 }
0x1d74   :  { %v5273_v20 = vmul.f32 -1.442695, %v3817_v12  ;;  %v5670_v42 = vpop.f32.mrb[22].mxu1 }
0x1d75   :  { %6258 = vpow2.f32 %v5274_v61  ;;  %v3832_v62 = vadd.f32 %v8006_v3, %v5670_v42  ;;  %v3826_v40 = vpop.f32.mrb[23].mxu1 }
0x1d76   :  { %6260 = vpow2.f32 %v5273_v20  ;;  %v3827_v50 = vadd.f32 %v8006_v3, %v3826_v40 }
0x1d77   :  { %v5276_v60 = vmul.f32 -1.442695, %v3832_v62 }
0x1d78   :  { %v5275_v7 = vmul.f32 -1.442695, %v3827_v50  ;;  %v5673_v31 = vpop.f32.mrb[24].mxu1 }
0x1d79   :  { %6262 = vpow2.f32 %v5276_v60  ;;  %v3842_v53 = vadd.f32 %v8006_v3, %v5673_v31  ;;  %v3836_v55 = vpop.f32.mrb[25].mxu1 }
0x1d7a   :  { %6264 = vpow2.f32 %v5275_v7  ;;  %v3837_v26 = vadd.f32 %v8006_v3, %v3836_v55 }
0x1d7b   :  { %v6255_v38 = vpop.eup %6254  ;;  %v5278_v32 = vmul.f32 -1.442695, %v3842_v53 }
0x1d7c   :  { %v6257_v5 = vpop.eup %6256  ;;  %v3934_v29 = vadd.f32 1.0, %v6255_v38  ;;  %v5277_v57 = vmul.f32 -1.442695, %v3837_v26  ;;  %v5676_v21 = vpop.f32.mrb[26].mxu1  ;;  %v8538_v38 = vld [vmem:[#allocation14_spill] sm:$0xff] }
0x1d7d   :  { %v3933_v8 = vadd.f32 1.0, %v6257_v5  ;;  %6266 = vpow2.f32 %v5278_v32  ;;  %v3852_v37 = vadd.f32 %v8006_v3, %v5676_v21  ;;  %v3846_v33 = vpop.f32.mrb[27].mxu1  ;;  %v3386_v26 = vpop.xlane.xlu0 %3385  ;;  %v8539_v21 = vld [vmem:[#allocation12_spill] sm:$0xff] }
0x1d7e   :  { %6268 = vrcp.f32 %v3934_v29  ;;  %v3847_v25 = vadd.f32 %v8006_v3, %v3846_v33 }
0x1d7f   :  { %v6259_v0 = vpop.eup %6258  ;;  %6270 = vrcp.f32 %v3933_v8  ;;  %v5280_v45 = vmul.f32 -1.442695, %v3852_v37 }
0x1d80   :  { %v6261_v4 = vpop.eup %6260  ;;  %v3936_v6 = vadd.f32 1.0, %v6259_v0  ;;  %6272 = vpow2.f32 %v5277_v57  ;;  %v5279_v16 = vmul.f32 -1.442695, %v3847_v25  ;;  %v5679_v48 = vpop.f32.mrb[28].mxu1 }
0x1d81   :  { %v3935_v39 = vadd.f32 1.0, %v6261_v4  ;;  %6274 = vpow2.f32 %v5280_v45  ;;  %v3862_v56 = vadd.f32 %v8006_v3, %v5679_v48  ;;  %v3856_v2 = vpop.f32.mrb[29].mxu1 }
0x1d82   :  { %6276 = vrcp.f32 %v3936_v6  ;;  %v3857_v18 = vadd.f32 %v8006_v3, %v3856_v2 }
0x1d83   :  { %v6263_v15 = vpop.eup %6262  ;;  %6278 = vrcp.f32 %v3935_v39  ;;  %v5282_v34 = vmul.f32 -1.442695, %v3862_v56 }
0x1d84   :  { %v6265_v22 = vpop.eup %6264  ;;  %v3938_v47 = vadd.f32 1.0, %v6263_v15  ;;  %6280 = vpow2.f32 %v5279_v16  ;;  %v5281_v63 = vmul.f32 -1.442695, %v3857_v18  ;;  %v5682_v12 = vpop.f32.mrb[30].mxu1  ;;  %v8542_v15 = vld [vmem:[#allocation22_spill] sm:$0xff] }
0x1d85   :  { %v3937_v61 = vadd.f32 1.0, %v6265_v22  ;;  %6282 = vpow2.f32 %v5282_v34  ;;  %v3872_v20 = vadd.f32 %v8006_v3, %v5682_v12  ;;  %v3866_v42 = vpop.f32.mrb[31].mxu1  ;;  %v8543_v12 = vld [vmem:[#allocation16_spill] sm:$0xff] }
0x1d86   :  { %6284 = vrcp.f32 %v3938_v47  ;;  %v3867_v62 = vadd.f32 %v8006_v3, %v3866_v42 }
0x1d87   :  { %v6267_v40 = vpop.eup %6266  ;;  %6286 = vrcp.f32 %v3937_v61  ;;  %v5284_v50 = vmul.f32 -1.442695, %v3872_v20  ;;  %v8544_v20 = vld [vmem:[#allocation44_spill] sm:$0xff] }
0x1d88   :  { %v6269_v60 = vpop.eup %6268  ;;  %v3940_v7 = vadd.f32 1.0, %v6267_v40  ;;  %6288 = vpow2.f32 %v5281_v63  ;;  %v5283_v31 = vmul.f32 -1.442695, %v3867_v62  ;;  %v5685_v53 = vpop.f32.mrb[32].mxu1 }
0x1d89   :  { %v6271_v55 = vpop.eup %6270  ;;  %v3982_v32 = vmul.f32 %v6269_v60, %v8538_v38  ;;  %6290 = vpow2.f32 %v5284_v50  ;;  %v3882_v5 = vadd.f32 %v8006_v3, %v5685_v53  ;;  %v3876_v29 = vpop.f32.mrb[33].mxu1  ;;  %v8545_v60 = vld [vmem:[#allocation15_spill] sm:$0xff] }
0x1d8a   :  { %v6273_v57 = vpop.eup %6272  ;;  %v3981_v8 = vmul.f32 %v6271_v55, %v8539_v21  ;;  %6292 = vrcp.f32 %v3940_v7  ;;  %v3877_v37 = vadd.f32 %v8006_v3, %v3876_v29 }
0x1d8b   :  { %v6275_v33 = vpop.eup %6274  ;;  %v3998_v0 = vsel %vm2755_vm4, -1e+11, %v3982_v32  ;;  %v3939_v45 = vadd.f32 1.0, %v6273_v57  ;;  %6294 = vpow2.f32 %v5283_v31  ;;  %v5286_v4 = vmul.f32 -1.442695, %v3882_v5  ;;  %v8547_v32 = vld [vmem:[#allocation23_spill] sm:$0xff] }
0x1d8c   :  { %v6277_v6 = vpop.eup %6276  ;;  %6296 = vrcp.f32 %v3386_v26  ;;  %v4019_v16 = vrot.slane %v3998_v0, 4  ;;  %v3997_v39 = vsel %vm2754_vm0, -1e+11, %v3981_v8  ;;  %v3942_v56 = vadd.f32 1.0, %v6275_v33  ;;  %v4181_v22 = vpop.f32.mrb[34].mxu1 }
0x1d8d   :  { %v6279_v2 = vpop.eup %6278  ;;  %v4013_v18 = vrot.slane %v3997_v39, 4  ;;  %v3984_v34 = vmul.f32 %v6277_v6, %v8542_v15  ;;  %6298 = vrcp.f32 %v3939_v45  ;;  %v5285_v3 = vmul.f32 -1.442695, %v3877_v37  ;;  %v4183_v62 = vpop.f32.mrb[35].mxu1 }
0x1d8e   :  { %v6281_v47 = vpop.eup %6280  ;;  %v4020_v63 = vmax.f32 %v3998_v0, %v4019_v16  ;;  %v3983_v61 = vmul.f32 %v6279_v2, %v8543_v12  ;;  %6300 = vrcp.f32 %v3942_v56  ;;  %v8033_v42 = vadd.f32 %v4181_v22, %v8544_v20  ;;  %v3388_v33 = vpop.xlane.xlu0 %3387 }
0x1d8f   :  { %v6283_v40 = vpop.eup %6282  ;;  %v4014_v50 = vmax.f32 %v3997_v39, %v4013_v18  ;;  %vm8546_vm0 = vcmp.eq.s32.totalorder %v8545_v60, 1  ;;  %v3941_v31 = vadd.f32 1.0, %v6281_v47  ;;  %6302 = vpow2.f32 %v5286_v4 }
0x1d90   :  { %v4000_v7 = vsel %vm8546_vm0, -1e+11, %v3984_v34  ;;  %v6285_v53 = vpop.eup %6284  ;;  %v4021_v55 = vrot.slane %v4020_v63, 2  ;;  %vm8548_vm4 = vcmp.eq.s32.totalorder %v8547_v32, 1  ;;  %v3944_v29 = vadd.f32 1.0, %v6283_v40  ;;  %4317 = vrot.lane.b32.xlu1 %v8033_v42, %s6429_s22  ;;  %v4187_v57 = vpop.f32.mrb[36].mxu1 }
0x1d91   :  { %v4031_v26 = vrot.slane %v4000_v7, 4  ;;  %v3999_v5 = vsel %vm8548_vm4, -1e+11, %v3983_v61  ;;  %v6287_v8 = vpop.eup %6286  ;;  %v4015_v37 = vrot.slane %v4014_v50, 2  ;;  %v3986_v0 = vmul.f32 %v6285_v53, %v7349_v27  ;;  %v8042_v45 = vpop.f32.mrb[37].mxu1 }
0x1d92   :  { %v4025_v25 = vrot.slane %v3999_v5, 4  ;;  %6304 = vrcp.f32 %v3941_v31  ;;  %v6289_v4 = vpop.eup %6288  ;;  %v4022_v6 = vmax.f32 %v4020_v63, %v4021_v55  ;;  %v3985_v48 = vmul.f32 %v6287_v8, %v7341_v36 }
0x1d93   :  { %v4032_v16 = vmax.f32 %v4000_v7, %v4031_v26  ;;  %6306 = vrcp.f32 %v3944_v29  ;;  %v6291_v39 = vpop.eup %6290  ;;  %v4016_v56 = vmax.f32 %v4014_v50, %v4015_v37  ;;  %v3943_v18 = vadd.f32 1.0, %v6289_v4  ;;  %v8551_v29 = vld [vmem:[#allocation58_spill] sm:$0xff] }
0x1d94   :  { %v4026_v2 = vmax.f32 %v3999_v5, %v4025_v25  ;;  %6308 = vpow2.f32 %v5285_v3  ;;  %v6293_v34 = vpop.eup %6292  ;;  %vm8549_vm0 = vcmp.eq.s32.totalorder %v7361_v49, 1  ;;  %v3946_v47 = vadd.f32 1.0, %v6291_v39  ;;  %v8554_v39 = vld [vmem:[#allocation63_spill] sm:$0xff] }
0x1d95   :  { %6310 = vrcp.f32 %v3388_v33  ;;  %v4001_v22 = vsel %vm8549_vm0, -1e+11, %v3985_v48  ;;  %v8048_v61 = vadd.f32 %v4187_v57, %v8544_v20  ;;  %v6295_v40 = vpop.eup %6294  ;;  %v8051_v7 = vadd.f32 %v4183_v62, %v7534_v35  ;;  %v8553_v33 = vld [vmem:[#allocation21_spill] sm:$0xff] }
0x1d96   :  { %v4027_v63 = vrot.slane %v4026_v2, 2  ;;  %v4037_v60 = vrot.slane %v4001_v22, 4  ;;  %6312 = vrcp.f32 %v3943_v18  ;;  %v8053_v50 = vpop.eup %6296  ;;  %v3945_v3 = vadd.f32 1.0, %v6295_v40  ;;  %v8556_v40 = vld [vmem:[#allocation60_spill] sm:$0xff] }
0x1d97   :  { %6314 = vrcp.f32 %v3946_v47  ;;  %4319 = vrot.lane.b32.xlu0 %v8048_v61, %s6429_s22  ;;  %v3988_v49 = vmul.f32 %v6293_v34, %v7714_v58  ;;  %vm8550_vm4 = vcmp.eq.s32.totalorder %v7386_v17, 1  ;;  %v6299_v31 = vpop.eup %6298  ;;  %v4017_v53 = vrot.slane %v4016_v56, 1  ;;  %v8562_v58 = vld [vmem:[#allocation59_spill] sm:$0xff] }
0x1d98   :  { %v4002_v20 = vsel %vm8550_vm4, -1e+11, %v3986_v0  ;;  %v4023_v55 = vrot.slane %v4022_v6, 1  ;;  %v4028_v26 = vmax.f32 %v4026_v2, %v4027_v63  ;;  %v4033_v32 = vrot.slane %v4032_v16, 2  ;;  %v6301_v5 = vpop.eup %6300 }
0x1d99   :  { %6316 = vrcp.f32 %v3945_v3  ;;  %v3987_v62 = vmul.f32 %v6299_v31, %v7365_v30  ;;  %vm8552_vm0 = vcmp.eq.s32.totalorder %v8551_v29, 1  ;;  %v4038_v8 = vmax.f32 %v4001_v22, %v4037_v60  ;;  %v6303_v37 = vpop.eup %6302 }
0x1d9a   :  { %v8063_v57 = vsel %vm8552_vm0, -1e+11, %v3988_v49  ;;  %v3990_v25 = vmul.f32 %v6301_v5, %v8553_v33  ;;  %v4018_v4 = vmax.f32 %v4016_v56, %v4017_v53  ;;  %v4024_v17 = vmax.f32 %v4022_v6, %v4023_v55  ;;  %v8558_v6 = vld [vmem:[#allocation19_spill] sm:$0xff]  ;;  %v8559_v5 = vld [vmem:[#allocation62_spill] sm:$0xff] }
0x1d9b   :  { %v4029_v0 = vrot.slane %v4028_v26, 1  ;;  %v3948_v48 = vadd.f32 1.0, %v6303_v37  ;;  %4375 = vrot.lane.b32.xlu0 %v8051_v7, %s6429_s22  ;;  %vm8555_vm4 = vcmp.eq.s32.totalorder %v8554_v39, 1  ;;  %v4034_v18 = vmax.f32 %v4032_v16, %v4033_v32 }
0x1d9c   :  { %v4003_v2 = vsel %vm8555_vm4, -1e+11, %v3987_v62  ;;  %v4039_v34 = vrot.slane %v4038_v8, 2  ;;  %v6305_v47 = vpop.eup %6304  ;;  %vm8557_vm0 = vcmp.eq.s32.totalorder %v8556_v40, 1  ;;  %v4043_v60 = vrot.slane %v4002_v20, 4  ;;  %v8560_v40 = vld [vmem:[#allocation25_spill] sm:$0xff] }
0x1d9d   :  { %v4006_v63 = vsel %vm8557_vm0, -1e+11, %v3990_v25  ;;  %v4030_v22 = vmax.f32 %v4028_v26, %v4029_v0  ;;  %v4049_v3 = vrot.slane %v4003_v2, 4  ;;  %v6307_v49 = vpop.eup %6306  ;;  %v3989_v31 = vmul.f32 %v6305_v47, %v8558_v6 }
0x1d9e   :  { %v4067_v56 = vrot.slane %v4006_v63, 4  ;;  %6318 = vrcp.f32 %v3948_v48  ;;  %v4035_v53 = vrot.slane %v4034_v18, 1  ;;  %v6309_v55 = vpop.eup %6308  ;;  %v3992_v29 = vmul.f32 %v6307_v49, %v8559_v5 }
0x1d9f   :  { %v4040_v37 = vmax.f32 %v4038_v8, %v4039_v34  ;;  %v4044_v62 = vmax.f32 %v4002_v20, %v4043_v60  ;;  %v4050_v16 = vmax.f32 %v4003_v2, %v4049_v3  ;;  %v8074_v32 = vpop.eup %6310  ;;  %vm8561_vm4 = vcmp.eq.s32.totalorder %v8560_v40, 1  ;;  %v8564_v20 = vld [vmem:[#allocation26_spill] sm:$0xff] }
0x1da0   :  { %v4068_v39 = vmax.f32 %v4006_v63, %v4067_v56  ;;  %v4005_v26 = vsel %vm8561_vm4, -1e+11, %v3989_v31  ;;  %v3947_v25 = vadd.f32 1.0, %v6309_v55  ;;  %v4036_v0 = vmax.f32 %v4034_v18, %v4035_v53  ;;  %v6313_v33 = vpop.eup %6312 }
0x1da1   :  { %v4061_v30 = vrot.slane %v4005_v26, 4  ;;  %vm8563_vm0 = vcmp.eq.s32.totalorder %v8562_v58, 1  ;;  %v4041_v47 = vrot.slane %v4040_v37, 1  ;;  %v4045_v6 = vrot.slane %v4044_v62, 2  ;;  %v6315_v36 = vpop.eup %6314 }
0x1da2   :  { %v4008_v48 = vsel %vm8563_vm0, -1e+11, %v3992_v29  ;;  %v4069_v49 = vrot.slane %v4068_v39, 2  ;;  %v3991_v2 = vmul.f32 %v6313_v33, %v8564_v20  ;;  %6320 = vrcp.f32 %v3947_v25 }
0x1da3   :  { %v4079_v8 = vrot.slane %v4008_v48, 4  ;;  %v4062_v34 = vmax.f32 %v4005_v26, %v4061_v30  ;;  %v3994_v63 = vmul.f32 %v6315_v36, %v7704_v43  ;;  %v4042_v60 = vmax.f32 %v4040_v37, %v4041_v47  ;;  %v6317_v56 = vpop.eup %6316 }
0x1da4   :  { %v4046_v3 = vmax.f32 %v4044_v62, %v4045_v6  ;;  %v4070_v18 = vmax.f32 %v4068_v39, %v4069_v49  ;;  %v4007_v58 = vsel %vm2764_vm14, -1e+11, %v3991_v2  ;;  %v4051_v53 = vrot.slane %v4050_v16, 2 }
0x1da5   :  { %v4080_v31 = vmax.f32 %v4008_v48, %v4079_v8  ;;  %v4063_v55 = vrot.slane %v4062_v34, 2  ;;  %v4073_v29 = vrot.slane %v4007_v58, 4  ;;  %v3993_v40 = vmul.f32 %v6317_v56, %v7687_v41 }
0x1da6   :  { %v4047_v5 = vrot.slane %v4046_v3, 1  ;;  %v4052_v27 = vmax.f32 %v4050_v16, %v4051_v53  ;;  %v4055_v33 = vrot.slane %v8063_v57, 4  ;;  %v4208_v30 = vsel %vm298_vm2, %v4024_v17, %v4018_v4 }
0x1da7   :  { %v4010_v36 = vsel %vm2767_vm15, -1e+11, %v3994_v63  ;;  %v4064_v6 = vmax.f32 %v4062_v34, %v4063_v55  ;;  %v4074_v37 = vmax.f32 %v4007_v58, %v4073_v29  ;;  %v4009_v19 = vsel %vm2766_vm8, -1e+11, %v3993_v40 }
0x1da8   :  { %v4048_v62 = vmax.f32 %v4046_v3, %v4047_v5  ;;  %v6319_v39 = vpop.eup %6318  ;;  %v4085_v26 = vrot.slane %v4009_v19, 4  ;;  %v4053_v25 = vrot.slane %v4052_v27, 1  ;;  %v4056_v48 = vmax.f32 %v8063_v57, %v4055_v33 }
0x1da9   :  { %v4209_v16 = vsel %vm2997_vm9, %v4030_v22, %v4208_v30  ;;  %v4075_v47 = vrot.slane %v4074_v37, 2  ;;  %v3996_v4 = vmul.f32 %v6319_v39, %v7810_v10  ;;  %v4065_v1 = vrot.slane %v4064_v6, 1 }
0x1daa   :  { %v4210_v49 = vsel %vm2999_vm10, %v4036_v0, %v4209_v16  ;;  %v4054_v17 = vmax.f32 %v4052_v27, %v4053_v25  ;;  %v4057_v8 = vrot.slane %v4056_v48, 2  ;;  %v4071_v51 = vrot.slane %v4070_v18, 1 }
0x1dab   :  { %v4211_v2 = vsel %vm3001_vm11, %v4042_v60, %v4210_v49  ;;  %v4012_v34 = vsel %vm2769_vm5, -1e+11, %v3996_v4  ;;  %v4066_v63 = vmax.f32 %v4064_v6, %v4065_v1  ;;  %v4076_v57 = vmax.f32 %v4074_v37, %v4075_v47 }
0x1dac   :  { %v4212_v5 = vsel %vm3003_vm7, %v4048_v62, %v4211_v2  ;;  %v6321_v3 = vpop.eup %6320  ;;  %v4058_v22 = vmax.f32 %v4056_v48, %v4057_v8  ;;  %v4072_v0 = vmax.f32 %v4070_v18, %v4071_v51  ;;  %v4081_v58 = vrot.slane %v4080_v31, 2 }
0x1dad   :  { %v4213_v56 = vsel %vm3005_vm13, %v4054_v17, %v4212_v5  ;;  %v3995_v53 = vmul.f32 %v6321_v3, %v7718_v44  ;;  %v4077_v27 = vrot.slane %v4076_v57, 1  ;;  %v4086_v55 = vmax.f32 %v4009_v19, %v4085_v26 }
0x1dae   :  { %v4091_v29 = vrot.slane %v4010_v36, 4  ;;  %v4059_v60 = vrot.slane %v4058_v22, 1  ;;  %v4082_v40 = vmax.f32 %v4080_v31, %v4081_v58  ;;  %v4103_v33 = vrot.slane %v4012_v34, 4 }
0x1daf   :  { %v4215_v30 = vsel %vm298_vm2, %v4072_v0, %v4066_v63  ;;  %v4011_v23 = vsel %vm2768_vm12, -1e+11, %v3995_v53  ;;  %v4078_v6 = vmax.f32 %v4076_v57, %v4077_v27  ;;  %v4087_v37 = vrot.slane %v4086_v55, 2 }
0x1db0   :  { %v4092_v62 = vmax.f32 %v4010_v36, %v4091_v29  ;;  %v4060_v39 = vmax.f32 %v4058_v22, %v4059_v60  ;;  %v4083_v25 = vrot.slane %v4082_v40, 1  ;;  %v4097_v18 = vrot.slane %v4011_v23, 4 }
0x1db1   :  { %v4104_v48 = vmax.f32 %v4012_v34, %v4103_v33  ;;  %v3391_v16 = vmul.f32 %v8053_v50, %v7984_v52  ;;  %v4088_v19 = vmax.f32 %v4086_v55, %v4087_v37  ;;  %v4216_v31 = vsel %vm2997_vm9, %v4078_v6, %v4215_v30 }
0x1db2   :  { %v4093_v26 = vrot.slane %v4092_v62, 2  ;;  %v4214_v47 = vsel %vm3007_vm1, %v4060_v39, %v4213_v56  ;;  %v4084_v49 = vmax.f32 %v4082_v40, %v4083_v25  ;;  %v4098_v4 = vmax.f32 %v4011_v23, %v4097_v18 }
0x1db3   :  { %v4105_v24 = vrot.slane %v4104_v48, 2  ;;  %4288 = vmatprep.mubr.f32.mxu1 %v4214_v47  ;;  %v4089_v1 = vrot.slane %v4088_v19, 1  ;;  %v3392_v53 = vmul.f32 %v8074_v32, %v7989_v9 }
0x1db4   :  { %v4094_v17 = vmax.f32 %v4092_v62, %v4093_v26  ;;  %4289 = vmatmul.mubr.f32.vlgmr.msra.gmra.mrb[38].mxu1 %v3391_v16  ;;  %v4099_v36 = vrot.slane %v4098_v4, 2  ;;  %v4217_v2 = vsel %vm2999_vm10, %v4084_v49, %v4216_v31  ;;  %v4190_v26 = vadd.f32 %v8042_v45, %v7534_v35 }
0x1db5   :  { %v4106_v8 = vmax.f32 %v4104_v48, %v4105_v24  ;;  %v4090_v51 = vmax.f32 %v4088_v19, %v4089_v1 }
0x1db6   :  { %v4095_v5 = vrot.slane %v4094_v17, 1  ;;  %v4100_v52 = vmax.f32 %v4098_v4, %v4099_v36 }
0x1db7   :  { %v4107_v34 = vrot.slane %v4106_v8, 1  ;;  %v4218_v63 = vsel %vm3001_vm11, %v4090_v51, %v4217_v2 }
0x1db8   :  { %v4096_v50 = vmax.f32 %v4094_v17, %v4095_v5  ;;  %v4101_v57 = vrot.slane %v4100_v52, 1 }
0x1db9   :  { %v4108_v56 = vmax.f32 %v4106_v8, %v4107_v34  ;;  %v4533_v34 = vld [vmem:[%s8338_s3 + $0x88] sm:$0xff] }
0x1dba   :  { %v4219_v3 = vsel %vm3003_vm7, %v4096_v50, %v4218_v63  ;;  %v4102_v22 = vmax.f32 %v4100_v52, %v4101_v57  ;;  %v4532_v50 = vld [vmem:[%s8338_s3 + $0x80] sm:$0xff] }
0x1dbb   :  { %v6000_v57 = vpack.c.bf16 %v4533_v34, %v4532_v50 }
0x1dbc   :  { %v4220_v0 = vsel %vm3005_vm13, %v4102_v22, %v4219_v3 }
0x1dbd   :  { %v4221_v58 = vsel %vm3007_vm1, %v4108_v56, %v4220_v0  ;;  %6001 = vmatprep.subr.bf16.mxu0 %v6000_v57 }
0x1dbe   :  { %4294 = vmatprep.mubr.f32.mxu1 %v4221_v58 }
0x1dbf   :  { %4295 = vmatmul.mubr.f32.gmra.mrb[40].mxu1 %v3392_v53 }
0x1e02   :  { %v4318_v48 = vpop.permute.xlu1 %4317 }
0x1e09   :  { %v4320_v9 = vpop.permute.xlu0 %4319 }
0x1e0d   :  { %v4376_v16 = vpop.permute.xlu0 %4375 }
0x1e87   :  { %v4290_v27 = vpop.f32.mrb[38].mxu1 }
0x1e88   :  { %v4291_v55 = vadd.f32 %v4290_v27, %v7842_v28  ;;  %v4292_v29 = vpop.f32.mrb[39].mxu1 }
0x1e89   :  { %v4293_v45 = vadd.f32 %v4292_v29, %v7863_v59 }
0x1e8a   :  { %v4301_v60 = vadd.f32 %v4291_v55, %v8033_v42 }
0x1e8c   :  { %v5289_v40 = vmul.f32 -1.442695, %v4301_v60 }
0x1e8e   :  { %6322 = vpow2.f32 %v5289_v40 }
0x1e92   :  { %v4296_v33 = vpop.f32.mrb[40].mxu1 }
0x1e93   :  { %v4297_v30 = vadd.f32 %v4296_v33, %v7842_v28  ;;  %v4298_v23 = vpop.f32.mrb[41].mxu1  ;;  %v4359_v33 = vadd.f32 %v4293_v45, %v8051_v7  ;;  %v4535_v7 = vld [vmem:[%s8338_s3 + $0x98] sm:$0xff] }
0x1e94   :  { %v4299_v2 = vadd.f32 %v4298_v23, %v7863_v59 }
0x1e95   :  { %v4302_v6 = vadd.f32 %v4297_v30, %v8048_v61 }
0x1e96   :  { %v4360_v23 = vadd.f32 %v4299_v2, %v4190_v26 }
0x1e97   :  { %v5290_v37 = vmul.f32 -1.442695, %v4302_v6 }
0x1e98   :  { %v6323_v62 = vpop.eup %6322  ;;  %v5292_v6 = vmul.f32 -1.442695, %v4360_v23 }
0x1e99   :  { %v4309_v39 = vadd.f32 1.0, %v6323_v62  ;;  %6324 = vpow2.f32 %v5290_v37 }
0x1e9b   :  { %6326 = vrcp.f32 %v4309_v39 }
0x1ea3   :  { %v6325_v32 = vpop.eup %6324 }
0x1ea4   :  { %v4310_v25 = vadd.f32 1.0, %v6325_v32 }
0x1ea5   :  { %v6327_v18 = vpop.eup %6326 }
0x1ea6   :  { %6328 = vrcp.f32 %v4310_v25  ;;  %v4381_v42 = vmul.f32 %v6327_v18, %v4376_v16  ;;  %v4323_v19 = vmul.f32 %v6327_v18, %v4318_v48  ;;  %v4337_v63 = vsub.f32 1.0, %v6327_v18 }
0x1ea8   :  { %4385 = vrot.lane.b32.xlu0 %v4381_v42, %s6429_s22  ;;  %4327 = vrot.lane.b32.xlu1 %v4323_v19, %s6429_s22 }
0x1eb0   :  { %v6329_v28 = vpop.eup %6328 }
0x1eb1   :  { %v4324_v61 = vmul.f32 %v6329_v28, %v4320_v9  ;;  %v4338_v59 = vsub.f32 1.0, %v6329_v28 }
0x1eb3   :  { %4329 = vrot.lane.b32.xlu1 %v4324_v61, %s6429_s22 }
0x1eb7   :  { %4377 = vrot.lane.b32.xlu1 %v4190_v26, %s6429_s22 }
0x1f1a   :  { %v4328_v31 = vpop.permute.xlu1 %4327  ;;  %v4386_v35 = vpop.permute.xlu0 %4385 }
0x1f1b   :  { %v4333_v47 = vadd.f32 %v4328_v31, %v4291_v55  ;;  %v4391_v8 = vadd.f32 %v4386_v35, %v4293_v45  ;;  %v4843_v35 = vld [vmem:[%s8338_s3 + $0xc0] sm:$0xff] }
0x1f1d   :  { %6330 = vtanh.f32 %v4333_v47 }
0x1f25   :  { %v4330_v49 = vpop.permute.xlu1 %4329 }
0x1f26   :  { %v4334_v4 = vadd.f32 %v4330_v49, %v4297_v30  ;;  %v5291_v30 = vmul.f32 -1.442695, %v4359_v33 }
0x1f27   :  { %v6331_v24 = vpop.eup %6330 }
0x1f28   :  { %6332 = vtanh.f32 %v4334_v4  ;;  %4341 = vrot.lane.b32.xlu0 %v6331_v24, %s6431_s24 }
0x1f29   :  { %v4378_v1 = vpop.permute.xlu1 %4377  ;;  %6334 = vtanh.f32 %v4391_v8 }
0x1f2a   :  { %v4382_v17 = vmul.f32 %v6329_v28, %v4378_v1 }
0x1f2c   :  { %4387 = vrot.lane.b32.xlu1 %v4382_v17, %s6429_s22  ;;  %v4841_v17 = vld [vmem:[%s8338_s3 + $0xb0] sm:$0xff] }
0x1f30   :  { %4349 = vrot.lane.b32.xlu1 %v7881_v11, %s6430_s23 }
0x1f32   :  { %v6333_v36 = vpop.eup %6332 }
0x1f33   :  { %4343 = vrot.lane.b32.xlu0 %v6333_v36, %s6431_s24  ;;  %v6335_v60 = vpop.eup %6334 }
0x1f34   :  { %4351 = vrot.lane.b32.xlu1 %v7887_v14, %s6430_s23 }
0x1f9a   :  { %v4342_v5 = vpop.permute.xlu0 %4341 }
0x1f9b   :  { %v4347_v22 = vmul.f32 %v4342_v5, %v4337_v63  ;;  %v6423_v63 = vld [vmem:[%s8338_s3 + $0x78] ss:$0 sm:$0xff] }
0x1f9e   :  { %v4388_v51 = vpop.permute.xlu1 %4387 }
0x1f9f   :  { %v4392_v52 = vadd.f32 %v4388_v51, %v4299_v2  ;;  %v5295_v51 = vld [vmem:[%s8338_s3 + $0xa0] ss:$0 sm:$0xff] }
0x1fa1   :  { %6336 = vtanh.f32 %v4392_v52 }
0x1fa2   :  { %v4350_v3 = vpop.permute.xlu1 %4349  ;;  %6338 = vpow2.f32 %v5291_v30 }
0x1fa3   :  { %v4355_v56 = vmul.f32 %v6327_v18, %v4350_v3  ;;  %6340 = vpow2.f32 %v5292_v6  ;;  %v4534_v18 = vld [vmem:[%s8338_s3 + $0x90] sm:$0xff] }
0x1fa4   :  { %v6004_v16 = vpack.c.bf16 %v4535_v7, %v4534_v18 }
0x1fa5   :  { %v4357_v0 = vadd.f32 %v4355_v56, %v4347_v22  ;;  %v4344_v58 = vpop.permute.xlu0 %4343 }
0x1fa6   :  { %v4348_v53 = vmul.f32 %v4344_v58, %v4338_v59  ;;  %v4352_v27 = vpop.permute.xlu1 %4351  ;;  %v6424_v59 = vld [vmem:[%s8340_s1] sm:$0xff] }
0x1fa7   :  { %v4356_v55 = vmul.f32 %v6329_v28, %v4352_v27  ;;  %4413 = vrot.lane.b32.xlu0 %v4357_v0, %s6431_s24 }
0x1fa9   :  { %v4358_v29 = vadd.f32 %v4356_v55, %v4348_v53 }
0x1fab   :  { %4399 = vrot.lane.b32.xlu0 %v6335_v60, %s6431_s24  ;;  %4415 = vrot.lane.b32.xlu1 %v4358_v29, %s6431_s24  ;;  %v6337_v40 = vpop.eup %6336 }
0x1fac   :  { %v6339_v37 = vpop.eup %6338 }
0x1fad   :  { %v4367_v62 = vadd.f32 1.0, %v6339_v37  ;;  %v6341_v39 = vpop.eup %6340 }
0x1fae   :  { %v4368_v9 = vadd.f32 1.0, %v6341_v39 }
0x1faf   :  { %4401 = vrot.lane.b32.xlu1 %v6337_v40, %s6431_s24  ;;  %6342 = vrcp.f32 %v4367_v62 }
0x1fb0   :  { %6344 = vrcp.f32 %v4368_v9 }
0x1fb9   :  { %v6343_v32 = vpop.eup %6342 }
0x1fba   :  { %v4395_v48 = vsub.f32 1.0, %v6343_v32  ;;  %v6345_v42 = vpop.eup %6344  ;;  %v4407_v61 = vmul.f32 %v6343_v32, %v7881_v11  ;;  %v4840_v11 = vld [vmem:[%s8338_s3 + $0xa8] sm:$0xff] }
0x1fbb   :  { %v4396_v47 = vsub.f32 1.0, %v6345_v42  ;;  %v4408_v4 = vmul.f32 %v6345_v42, %v7887_v14  ;;  %v6008_v36 = vpack.c.bf16 %v4841_v17, %v4840_v11  ;;  %v4842_v14 = vld [vmem:[%s8338_s3 + $0xb8] sm:$0xff] }
0x1fbc   :  { %v6012_v45 = vpack.c.bf16 %v4843_v35, %v4842_v14 }
0x2019   :  { %v4414_v25 = vpop.permute.xlu0 %4413 }
0x201a   :  { %5694 = vmatprep.mubr.msk.f32.mxu0 %vm139_vm3, %v4414_v25 }
0x201d   :  { %v4400_v19 = vpop.permute.xlu0 %4399  ;;  %v4416_v28 = vpop.permute.xlu1 %4415 }
0x201e   :  { %v4405_v26 = vmul.f32 %v4400_v19, %v4395_v48  ;;  %5695 = vmatmul.mubr.msk.f32.vlgmr.msra.gmra.mrb[32].mxu0 %vm139_vm3, %v4416_v28 }
0x201f   :  { %6003 = vmatpush3.bf16.msra.mxu0 %v6000_v57 }
0x2020   :  { %v4409_v31 = vadd.f32 %v4407_v61, %v4405_v26  ;;  %6005 = vmatprep.subr.bf16.mxu0 %v6004_v16 }
0x2021   :  { %v4402_v49 = vpop.permute.xlu1 %4401 }
0x2022   :  { %v4406_v24 = vmul.f32 %v4402_v49, %v4396_v47  ;;  %5705 = vmatprep.mubr.msk.f32.mxu0 %vm139_vm3, %v4409_v31 }
0x2023   :  { %6007 = vmatpush3.bf16.msra.mxu0 %v6004_v16 }
0x2024   :  { %v4410_v1 = vadd.f32 %v4408_v4, %v4406_v24  ;;  %6009 = vmatprep.subr.bf16.mxu0 %v6008_v36 }
0x2026   :  { %5706 = vmatmul.mubr.msk.f32.vlgmr.msra.gmra.mrb[34].mxu0 %vm139_vm3, %v4410_v1 }
0x2027   :  { %6011 = vmatpush3.bf16.msra.mxu0 %v6008_v36 }
0x2028   :  { %6013 = vmatprep.subr.bf16.mxu0 %v6012_v45 }
0x202b   :  { %6015 = vmatpush3.bf16.msra.mxu0 %v6012_v45 }
0x20f1   :  { %v5696_v8 = vpop.f32.mrb[32].mxu0 }
0x20f2   :  { %v4487_v2 = vpop.f32.mrb[33].mxu0  ;;  %v4493_v3 = vadd.f32 %v6423_v63, %v5696_v8 }
0x20f3   :  { %v4488_v57 = vadd.f32 %v6423_v63, %v4487_v2 }
0x20f4   :  { %v8184_v56 = vsel %vm1865_vm6, %v4493_v3, -1e+30 }
0x20f5   :  { %v8179_v22 = vsel %vm1865_vm6, %v4488_v57, -1e+30 }
0x20f9   :  { %v5707_v5 = vpop.f32.mrb[34].mxu0 }
0x20fa   :  { %v4619_v52 = vadd.f32 %v5707_v5, %v5295_v51  ;;  %v4613_v50 = vpop.f32.mrb[35].mxu0 }
0x20fb   :  { %v4614_v34 = vadd.f32 %v5295_v51, %v4613_v50 }
0x20fc   :  { %4804 = vrot.lane.b32.xlu1 %v4619_v52, %s6431_s24  ;;  %v4680_v32 = vrot.slane %v4619_v52, %v8501_v54  ;;  %v4673_v26 = vcombine.high %v4619_v52, %v4619_v52 }
0x20fd   :  { %4802 = vrot.lane.b32.xlu0 %v4614_v34, %s6431_s24  ;;  %v4631_v0 = vrot.slane %v4614_v34, %v8501_v54  ;;  %v4624_v58 = vcombine.high %v4614_v34, %v4614_v34 }
0x20fe   :  { %v4688_v31 = vcombine.high %v4680_v32, %v4680_v32  ;;  %v4696_v4 = vrot.slane %v4680_v32, %v8501_v54  ;;  %v4687_v14 = vrot.slane %v4673_v26, %v8501_v54 }
0x20ff   :  { %v4639_v53 = vcombine.high %v4631_v0, %v4631_v0  ;;  %v4647_v27 = vrot.slane %v4631_v0, %v8501_v54  ;;  %v4638_v55 = vrot.slane %v4624_v58, %v8501_v54 }
0x2100   :  { %v4710_v35 = vrot.slane %v4688_v31, %v8501_v54  ;;  %v4718_v2 = vcombine.high %v4696_v4, %v4696_v4  ;;  %v4757_v51 = vrot.slane %v4696_v4, %v7019_v46  ;;  %v4689_v63 = vcombine.high %v4687_v14, %v4687_v14  ;;  %v6425_v4 = vld [vmem:[%s8340_s1 + $0x8] sm:$0xff] }
0x2101   :  { %v4661_v29 = vrot.slane %v4639_v53, %v8501_v54  ;;  %v4669_v13 = vcombine.high %v4647_v27, %v4647_v27  ;;  %v4640_v60 = vcombine.high %v4638_v55, %v4638_v55  ;;  %v4654_v33 = vrot.slane %v4638_v55, %v8501_v54 }
0x2102   :  { %v4725_v30 = vrot.slane %v4647_v27, %v7019_v46  ;;  %v4720_v57 = vcombine.high %v4710_v35, %v4710_v35  ;;  %v4761_v3 = vrot.slane %v4710_v35, %v7019_v46  ;;  %v4765_v0 = vrot.slane %v4718_v2, %v7019_v46 }
0x2103   :  { %v4671_v40 = vcombine.high %v4661_v29, %v4661_v29  ;;  %v4729_v23 = vrot.slane %v4661_v29, %v7019_v46  ;;  %v4733_v6 = vrot.slane %v4669_v13, %v7019_v46  ;;  %v4668_v25 = vrot.slane %v4640_v60, %v8501_v54 }
0x2104   :  { %v4670_v7 = vcombine.high %v4654_v33, %v4654_v33  ;;  %v4741_v42 = vrot.slane %v4654_v33, %v7019_v46  ;;  %v4717_v29 = vrot.slane %v4689_v63, %v8501_v54  ;;  %v4769_v13 = vrot.slane %v4720_v57, %v7019_v46 }
0x2105   :  { %v4737_v18 = vrot.slane %v4671_v40, %v7019_v46  ;;  %v4745_v47 = vrot.slane %v4668_v25, %v7019_v46  ;;  %v4672_v49 = vcombine.high %v4668_v25, %v4668_v25 }
0x2106   :  { %v4749_v24 = vrot.slane %v4670_v7, %v7019_v46 }
0x2107   :  { %v4753_v8 = vrot.slane %v4672_v49, %v7019_v46 }
0x211c   :  { %4498 = vmax.xlane.f32.xlu0 %v8179_v22 }
0x2120   :  { %4500 = vmax.xlane.f32.xlu1 %v8184_v56 }
0x2131   :  { %4520 = vperm.xlu1 %6025, %v6424_v59   ;;  %v4703_v59 = vrot.slane %v4687_v14, %v8501_v54 }
0x2133   :  { %v4719_v60 = vcombine.high %v4703_v59, %v4703_v59  ;;  %v4773_v40 = vrot.slane %v4703_v59, %v7019_v46 }
0x2135   :  { %v4781_v54 = vrot.slane %v4719_v60, %v7019_v46 }
0x216e   :  { %v4805_v45 = vpop.permute.xlu1 %4804 }
0x216f   :  { %v4803_v37 = vpop.permute.xlu0 %4802  ;;  %v4816_v34 = vadd.f32 %v4805_v45, %v4757_v51  ;;  %v4817_v53 = vadd.f32 %v4805_v45, %v4761_v3  ;;  %v4818_v55 = vadd.f32 %v4805_v45, %v4765_v0  ;;  %v4822_v25 = vadd.f32 %v4805_v45, %v4781_v54 }
0x2170   :  { %v4808_v62 = vadd.f32 %v4803_v37, %v4725_v30  ;;  %v4809_v39 = vadd.f32 %v4803_v37, %v4729_v23  ;;  %v4810_v9 = vadd.f32 %v4803_v37, %v4733_v6  ;;  %v4811_v19 = vadd.f32 %v4803_v37, %v4737_v18 }
0x2171   :  { %v4812_v61 = vadd.f32 %v4803_v37, %v4741_v42  ;;  %v4813_v11 = vadd.f32 %v4803_v37, %v4745_v47  ;;  %v4814_v36 = vadd.f32 %v4803_v37, %v4749_v24  ;;  %v4815_v52 = vadd.f32 %v4803_v37, %v4753_v8 }
0x2172   :  { %v4824_v48 = vmax.f32 %v4808_v62, 0.0  ;;  %v4825_v16 = vmax.f32 %v4809_v39, 0.0  ;;  %v4826_v28 = vmax.f32 %v4810_v9, 0.0  ;;  %v4827_v1 = vmax.f32 %v4811_v19, 0.0 }
0x2173   :  { %v4828_v17 = vmax.f32 %v4812_v61, 0.0  ;;  %v4829_v5 = vmax.f32 %v4813_v11, 0.0  ;;  %v4830_v50 = vmax.f32 %v4814_v36, 0.0  ;;  %v4831_v58 = vmax.f32 %v4815_v52, 0.0 }
0x2174   :  { %5716 = vmatprep.mubr.msk.f32.mxu0 %vm139_vm3, %v4824_v48  ;;  %v4832_v27 = vmax.f32 %v4816_v34, 0.0  ;;  %v4833_v33 = vmax.f32 %v4817_v53, 0.0  ;;  %v4819_v30 = vadd.f32 %v4805_v45, %v4769_v13  ;;  %v4834_v23 = vmax.f32 %v4818_v55, 0.0 }
0x2175   :  { %5717 = vmatmul.mubr.msk.f32.vlgmr.msra.gmra.mrb[36].mxu0 %vm139_vm3, %v4825_v16  ;;  %v4820_v6 = vadd.f32 %v4805_v45, %v4773_v40  ;;  %v4777_v37 = vrot.slane %v4717_v29, %v7019_v46  ;;  %v4721_v62 = vcombine.high %v4717_v29, %v4717_v29  ;;  %v4838_v16 = vmax.f32 %v4822_v25, 0.0 }
0x2176   :  { %5719 = vmatprep.mubr.msk.f32.mxu0 %vm139_vm3, %v4826_v28  ;;  %v4835_v39 = vmax.f32 %v4819_v30, 0.0 }
0x2177   :  { %v4821_v9 = vadd.f32 %v4805_v45, %v4777_v37  ;;  %v4836_v32 = vmax.f32 %v4820_v6, 0.0  ;;  %v4785_v18 = vrot.slane %v4721_v62, %v7019_v46 }
0x2179   :  { %5720 = vmatmul.mubr.msk.f32.gmra.mrb[38].mxu0 %vm139_vm3, %v4827_v1  ;;  %v4837_v7 = vmax.f32 %v4821_v9, 0.0  ;;  %v4823_v48 = vadd.f32 %v4805_v45, %v4785_v18 }
0x217a   :  { %5722 = vmatprep.mubr.msk.f32.mxu0 %vm139_vm3, %v4828_v17 }
0x217b   :  { %v4839_v42 = vmax.f32 %v4823_v48, 0.0 }
0x217d   :  { %5723 = vmatmul.mubr.msk.f32.gmra.mrb[40].mxu0 %vm139_vm3, %v4829_v5 }
0x217e   :  { %5725 = vmatprep.mubr.msk.f32.mxu0 %vm139_vm3, %v4830_v50 }
0x2181   :  { %5726 = vmatmul.mubr.msk.f32.gmra.mrb[42].mxu0 %vm139_vm3, %v4831_v58 }
0x2182   :  { %5728 = vmatprep.mubr.msk.f32.mxu0 %vm139_vm3, %v4832_v27 }
0x2185   :  { %5729 = vmatmul.mubr.msk.f32.gmra.mrb[44].mxu0 %vm139_vm3, %v4833_v33 }
0x2186   :  { %5731 = vmatprep.mubr.msk.f32.mxu0 %vm139_vm3, %v4834_v23 }
0x2189   :  { %5732 = vmatmul.mubr.msk.f32.gmra.mrb[46].mxu0 %vm139_vm3, %v4835_v39 }
0x218a   :  { %5734 = vmatprep.mubr.msk.f32.mxu0 %vm139_vm3, %v4836_v32 }
0x218d   :  { %5735 = vmatmul.mubr.msk.f32.gmra.mrb[48].mxu0 %vm139_vm3, %v4837_v7 }
0x218e   :  { %5737 = vmatprep.mubr.msk.f32.mxu0 %vm139_vm3, %v4838_v16 }
0x2191   :  { %5738 = vmatmul.mubr.msk.f32.gmra.mrb[50].mxu0 %vm139_vm3, %v4839_v42 }
0x21a9   :  { %v4499_v19 = vpop.xlane.xlu0 %4498 }
0x21aa   :  { %v8235_v61 = vsub.f32 %v8179_v22, %v4499_v19  ;;  %v8248_v22 = vld [vmem:[%s8338_s3 + $0xc8] ss:$0 sm:$0xff] }
0x21ac   :  { %v4504_v31 = vmul.f32 1.442695, %v8235_v61 }
0x21ad   :  { %v4501_v28 = vpop.xlane.xlu1 %4500 }
0x21ae   :  { %v8238_v26 = vsub.f32 %v8184_v56, %v4501_v28 }
0x21b0   :  { %v4506_v46 = vmul.f32 1.442695, %v8238_v26 }
0x21b2   :  { %6346 = vpow2.f32 %v4506_v46  ;;  %v4521_v46 = vpop.permute.xlu1 %4520 }
0x21b3   :  { %6348 = vpow2.f32 %v4504_v31 }
0x21bc   :  { %v6347_v47 = vpop.eup %6346 }
0x21bd   :  { %4510 = vadd.xlane.f32.xlu0 %v6347_v47  ;;  %v6349_v49 = vpop.eup %6348 }
0x21c1   :  { %4508 = vadd.xlane.f32.xlu0 %v6349_v49 }
0x21d7   :  { %4525 = vperm.xlu0 %6024, %v6425_v4  }
0x2248   :  { %v5718_v56 = vpop.f32.mrb[36].mxu0 }
0x2249   :  { %v4969_v24 = vadd.f32 %v5718_v56, %v8248_v22  ;;  %v4963_v1 = vpop.f32.mrb[37].mxu0 }
0x224a   :  { %v4964_v11 = vadd.f32 %v8248_v22, %v4963_v1  ;;  %v4511_v17 = vpop.xlane.xlu0 %4510 }
0x224b   :  { %v5316_v36 = vmul.f32 -1.442695, %v4969_v24  ;;  %6350 = vlog2.f32 %v4511_v17 }
0x224c   :  { %v5315_v14 = vmul.f32 -1.442695, %v4964_v11  ;;  %v5721_v35 = vpop.f32.mrb[38].mxu0 }
0x224d   :  { %6352 = vpow2.f32 %v5316_v36  ;;  %v4979_v45 = vadd.f32 %v5721_v35, %v8248_v22  ;;  %v4973_v8 = vpop.f32.mrb[39].mxu0 }
0x224e   :  { %6354 = vpow2.f32 %v5315_v14  ;;  %v4974_v2 = vadd.f32 %v8248_v22, %v4973_v8  ;;  %v4509_v51 = vpop.xlane.xlu0 %4508 }
0x224f   :  { %v5318_v5 = vmul.f32 -1.442695, %v4979_v45  ;;  %6356 = vlog2.f32 %v4509_v51 }
0x2250   :  { %v5317_v52 = vmul.f32 -1.442695, %v4974_v2  ;;  %v5724_v50 = vpop.f32.mrb[40].mxu0 }
0x2251   :  { %6358 = vpow2.f32 %v5318_v5  ;;  %v4989_v34 = vadd.f32 %v5724_v50, %v8248_v22  ;;  %v4983_v63 = vpop.f32.mrb[41].mxu0 }
0x2252   :  { %6360 = vpow2.f32 %v5317_v52  ;;  %v4984_v57 = vadd.f32 %v8248_v22, %v4983_v63 }
0x2253   :  { %v5320_v3 = vmul.f32 -1.442695, %v4989_v34 }
0x2254   :  { %v5319_v59 = vmul.f32 -1.442695, %v4984_v57  ;;  %v5727_v0 = vpop.f32.mrb[42].mxu0 }
0x2255   :  { %v6351_v58 = vpop.eup %6350  ;;  %6362 = vpow2.f32 %v5320_v3  ;;  %v4999_v53 = vadd.f32 %v5727_v0, %v8248_v22  ;;  %v4993_v27 = vpop.f32.mrb[43].mxu0 }
0x2256   :  { %v4515_v55 = vmul.f32 0.6931472, %v6351_v58  ;;  %6364 = vpow2.f32 %v5319_v59  ;;  %v4994_v29 = vadd.f32 %v8248_v22, %v4993_v27  ;;  %v4526_v54 = vpop.permute.xlu0 %4525 }
0x2257   :  { %v6353_v13 = vpop.eup %6352  ;;  %v5322_v60 = vmul.f32 -1.442695, %v4999_v53 }
0x2258   :  { %v6355_v40 = vpop.eup %6354  ;;  %v5091_v33 = vadd.f32 1.0, %v6353_v13  ;;  %v5321_v30 = vmul.f32 -1.442695, %v4994_v29  ;;  %v4517_v23 = vsub.f32 %v8238_v26, %v4515_v55  ;;  %v5730_v6 = vpop.f32.mrb[44].mxu0 }
0x2259   :  { %v6357_v37 = vpop.eup %6356  ;;  %v5090_v62 = vadd.f32 1.0, %v6355_v40  ;;  %6366 = vpow2.f32 %v5322_v60  ;;  %v5009_v39 = vadd.f32 %v5730_v6, %v8248_v22  ;;  %v5003_v9 = vpop.f32.mrb[45].mxu0 }
0x225a   :  { %6368 = vrcp.f32 %v5091_v33  ;;  %v4513_v32 = vmul.f32 0.6931472, %v6357_v37  ;;  %v4529_v25 = vmul.f32 %v4526_v54, %v4517_v23  ;;  %v5004_v18 = vadd.f32 %v8248_v22, %v5003_v9 }
0x225b   :  { %v6359_v7 = vpop.eup %6358  ;;  %6370 = vrcp.f32 %v5090_v62  ;;  %v5324_v48 = vmul.f32 -1.442695, %v5009_v39  ;;  %v8565_v62 = vld [vmem:[#allocation17_spill] sm:$0xff] }
0x225c   :  { %v6361_v16 = vpop.eup %6360  ;;  %v5093_v42 = vadd.f32 1.0, %v6359_v7  ;;  %v4516_v19 = vsub.f32 %v8235_v61, %v4513_v32  ;;  %6372 = vpow2.f32 %v5321_v30  ;;  %4531 = vst [vmem:[%s8343_s5 + $0x8] sm:$0xff] %v4529_v25  ;;  %v5323_v28 = vmul.f32 -1.442695, %v5004_v18  ;;  %v5733_v26 = vpop.f32.mrb[46].mxu0  ;;  %v8566_v39 = vld [vmem:[#allocation13_spill] sm:$0xff] }
0x225d   :  { %v5092_v31 = vadd.f32 1.0, %v6361_v16  ;;  %6374 = vpow2.f32 %v5324_v48  ;;  %v5019_v47 = vadd.f32 %v5733_v26, %v8248_v22  ;;  %v5013_v49 = vpop.f32.mrb[47].mxu0  ;;  %v8567_v16 = vld [vmem:[#allocation61_spill] sm:$0xff] }
0x225e   :  { %6376 = vrcp.f32 %v5093_v42  ;;  %v4528_v4 = vmul.f32 %v4521_v46, %v4516_v19  ;;  %v5014_v56 = vadd.f32 %v8248_v22, %v5013_v49  ;;  %v8568_v46 = vld [vmem:[#allocation24_spill] sm:$0xff]  ;;  %v8569_v49 = vld [vmem:[#allocation21_spill] sm:$0xff] }
0x225f   :  { %v6363_v24 = vpop.eup %6362  ;;  %6378 = vrcp.f32 %v5092_v31  ;;  %v5326_v61 = vmul.f32 -1.442695, %v5019_v47 }
0x2260   :  { %v6365_v1 = vpop.eup %6364  ;;  %v5095_v11 = vadd.f32 1.0, %v6363_v24  ;;  %4530 = vst [vmem:[%s8343_s5] sm:$0xff] %v4528_v4  ;;  %6380 = vpow2.f32 %v5323_v28  ;;  %v5325_v17 = vmul.f32 -1.442695, %v5014_v56  ;;  %v5736_v36 = vpop.f32.mrb[48].mxu0 }
0x2261   :  { %v5094_v14 = vadd.f32 1.0, %v6365_v1  ;;  %6382 = vpow2.f32 %v5326_v61  ;;  %v5029_v35 = vadd.f32 %v5736_v36, %v8248_v22  ;;  %v5023_v45 = vpop.f32.mrb[49].mxu0 }
0x2262   :  { %6384 = vrcp.f32 %v5095_v11  ;;  %v5024_v8 = vadd.f32 %v8248_v22, %v5023_v45 }
0x2263   :  { %v6367_v2 = vpop.eup %6366  ;;  %6386 = vrcp.f32 %v5094_v14  ;;  %v5328_v51 = vmul.f32 -1.442695, %v5029_v35  ;;  %v8571_v14 = vld [vmem:[#allocation62_spill] sm:$0xff] }
0x2264   :  { %v6369_v5 = vpop.eup %6368  ;;  %v5097_v52 = vadd.f32 1.0, %v6367_v2  ;;  %6388 = vpow2.f32 %v5325_v17  ;;  %v5327_v50 = vmul.f32 -1.442695, %v5024_v8  ;;  %v5739_v34 = vpop.f32.mrb[50].mxu0  ;;  %v8570_v17 = vld [vmem:[#allocation19_spill] sm:$0xff] }
0x2265   :  { %v6371_v63 = vpop.eup %6370  ;;  %v5139_v57 = vmul.f32 %v6369_v5, %v8538_v38  ;;  %6390 = vpow2.f32 %v5328_v51  ;;  %v5039_v3 = vadd.f32 %v5739_v34, %v8248_v22  ;;  %v5033_v59 = vpop.f32.mrb[51].mxu0 }
0x2266   :  { %v6373_v0 = vpop.eup %6372  ;;  %v5138_v58 = vmul.f32 %v6371_v63, %v8539_v21  ;;  %6392 = vrcp.f32 %v5097_v52  ;;  %v5034_v53 = vadd.f32 %v8248_v22, %v5033_v59 }
0x2267   :  { %v6375_v27 = vpop.eup %6374  ;;  %5155 = vst [vmem:[%s8344_s6 + $0x8] sm:$0xff] %v5139_v57  ;;  %v5096_v55 = vadd.f32 1.0, %v6373_v0  ;;  %6394 = vpow2.f32 %v5327_v50  ;;  %v5330_v29 = vmul.f32 -1.442695, %v5039_v3 }
0x2268   :  { %v6377_v13 = vpop.eup %6376  ;;  %5154 = vst [vmem:[%s8344_s6] sm:$0xff] %v5138_v58  ;;  %v5099_v38 = vadd.f32 1.0, %v6375_v27  ;;  %v5329_v60 = vmul.f32 -1.442695, %v5034_v53 }
0x2269   :  { %v6379_v40 = vpop.eup %6378  ;;  %v5141_v21 = vmul.f32 %v6377_v13, %v8542_v15  ;;  %6396 = vrcp.f32 %v5096_v55 }
0x226a   :  { %v6381_v22 = vpop.eup %6380  ;;  %v5140_v33 = vmul.f32 %v6379_v40, %v8543_v12  ;;  %6398 = vrcp.f32 %v5099_v38 }
0x226b   :  { %v6383_v30 = vpop.eup %6382  ;;  %5157 = vst [vmem:[%s8344_s6 + $0x18] sm:$0xff] %v5141_v21  ;;  %v5098_v23 = vadd.f32 1.0, %v6381_v22  ;;  %6400 = vpow2.f32 %v5330_v29 }
0x226c   :  { %v6385_v6 = vpop.eup %6384  ;;  %5156 = vst [vmem:[%s8344_s6 + $0x10] sm:$0xff] %v5140_v33  ;;  %v5101_v37 = vadd.f32 1.0, %v6383_v30  ;;  %6402 = vpow2.f32 %v5329_v60 }
0x226d   :  { %v6387_v15 = vpop.eup %6386  ;;  %v5143_v54 = vmul.f32 %v6385_v6, %v8565_v62  ;;  %6404 = vrcp.f32 %v5098_v23 }
0x226e   :  { %v6389_v12 = vpop.eup %6388  ;;  %v5142_v9 = vmul.f32 %v6387_v15, %v8566_v39  ;;  %6406 = vrcp.f32 %v5101_v37 }
0x226f   :  { %v6391_v32 = vpop.eup %6390  ;;  %5159 = vst [vmem:[%s8344_s6 + $0x28] sm:$0xff] %v5143_v54  ;;  %v5100_v25 = vadd.f32 1.0, %v6389_v12 }
0x2270   :  { %v6393_v18 = vpop.eup %6392  ;;  %5158 = vst [vmem:[%s8344_s6 + $0x20] sm:$0xff] %v5142_v9  ;;  %v5103_v7 = vadd.f32 1.0, %v6391_v32 }
0x2271   :  { %v6395_v48 = vpop.eup %6394  ;;  %v5145_v42 = vmul.f32 %v6393_v18, %v8567_v16  ;;  %6408 = vrcp.f32 %v5100_v25 }
0x2272   :  { %6410 = vrcp.f32 %v5103_v7  ;;  %v5102_v19 = vadd.f32 1.0, %v6395_v48 }
0x2273   :  { %v6397_v28 = vpop.eup %6396  ;;  %5161 = vst [vmem:[%s8344_s6 + $0x38] sm:$0xff] %v5145_v42 }
0x2274   :  { %v6399_v26 = vpop.eup %6398  ;;  %v5144_v31 = vmul.f32 %v6397_v28, %v8568_v46  ;;  %6412 = vrcp.f32 %v5102_v19 }
0x2275   :  { %v6401_v47 = vpop.eup %6400  ;;  %v5147_v4 = vmul.f32 %v6399_v26, %v8569_v49 }
0x2276   :  { %v6403_v56 = vpop.eup %6402  ;;  %5160 = vst [vmem:[%s8344_s6 + $0x30] sm:$0xff] %v5144_v31  ;;  %v5105_v24 = vadd.f32 1.0, %v6401_v47 }
0x2277   :  { %v6405_v61 = vpop.eup %6404  ;;  %5163 = vst [vmem:[%s8344_s6 + $0x48] sm:$0xff] %v5147_v4  ;;  %v5104_v1 = vadd.f32 1.0, %v6403_v56 }
0x2278   :  { %v6407_v11 = vpop.eup %6406  ;;  %v5146_v36 = vmul.f32 %v6405_v61, %v8570_v17  ;;  %6414 = vrcp.f32 %v5105_v24 }
0x2279   :  { %v5149_v35 = vmul.f32 %v6407_v11, %v8571_v14  ;;  %6416 = vrcp.f32 %v5104_v1 }
0x227a   :  { %5162 = vst [vmem:[%s8344_s6 + $0x40] sm:$0xff] %v5146_v36 }
0x227b   :  { %v6409_v45 = vpop.eup %6408  ;;  %5165 = vst [vmem:[%s8344_s6 + $0x58] sm:$0xff] %v5149_v35 }
0x227c   :  { %v6411_v8 = vpop.eup %6410  ;;  %v5148_v2 = vmul.f32 %v6409_v45, %v8564_v20 }
0x227d   :  { %v5151_v51 = vmul.f32 %v6411_v8, %v7704_v43 }
0x227e   :  { %v6413_v5 = vpop.eup %6412  ;;  %5164 = vst [vmem:[%s8344_s6 + $0x50] sm:$0xff] %v5148_v2 }
0x227f   :  { %5167 = vst [vmem:[%s8344_s6 + $0x68] sm:$0xff] %v5151_v51  ;;  %v5150_v52 = vmul.f32 %v6413_v5, %v7687_v41 }
0x2281   :  { %5166 = vst [vmem:[%s8344_s6 + $0x60] sm:$0xff] %v5150_v52 }
0x2282   :  { %v6415_v50 = vpop.eup %6414 }
0x2283   :  { %v6417_v34 = vpop.eup %6416  ;;  %v5153_v20 = vmul.f32 %v6415_v50, %v7810_v10 }
0x2284   :  { %v5152_v43 = vmul.f32 %v6417_v34, %v7718_v44 }
0x2285   :  { %5169 = vst [vmem:[%s8344_s6 + $0x78] sm:$0xff] %v5153_v20 }
0x2286   :  { %5168 = vst [vmem:[%s8344_s6 + $0x70] sm:$0xff] %v5152_v43 }

</bundles_post_ra>
